<compile_context>
chip_gen: v7x
topology: tpu7x:2x2x1
jax: 0.10.0
libtpu: 0.0.40
codegen_flags: <defaults>
</compile_context>

<pallas_src>
import functools
import math

import jax
import jax.numpy as jnp
from jax import lax
from jax.experimental import pallas as pl
from jax.experimental.pallas import tpu as pltpu

# ----------------------------- model config (small) -----------------------------
C_IN = 1
C_OUT = 1
STRIDE = (2, 2, 3, 3, 5)
CHANNEL_MULT = (1, 2, 2, 4, 8)
BASE_CHANNEL = 8            # small, shape-consistent stand-in for 128
EMBEDDING_SIZE = 32         # small stand-in for 256

_MAX_TM = 512               # time-tile cap (keeps tiles well inside VMEM at scale)


def _vmem_specs(n):
    return [pl.BlockSpec(memory_space=pltpu.MemorySpace.VMEM) for _ in range(n)]


def _pick_time_tile(tn, cap=_MAX_TM):
    # full extent when small (single tile per batch), else a multiple-of-8 divisor.
    if tn <= cap:
        return tn
    for cand in range(cap - cap % 8, 7, -8):
        if tn % cand == 0:
            return cand
    return cap  # ragged last tile; Pallas masks OOB reads/writes


def _vmem_limit(nbytes):
    # explicit scoped-VMEM budget: double-buffer headroom + slack, floored at 4 MiB
    return int(max(2 * nbytes + (1 << 20), 4 << 20))


# ------------------- down GBlock kernel: strided conv (+fused FiLM bias) + SiLU -------------------
def _down_block_kernel(x_ref, w_ref, beta_ref, o_ref):
    # x    : (TM, K=s*Cin)  bf16
    # w    : (K, Cout)      bf16
    # beta : (1, Cout)      f32   (= conv bias + FiLM(emb), hoisted in wrapper)
    # o    : (TM, Cout)
    y = jnp.dot(x_ref[...], w_ref[...], preferred_element_type=jnp.float32)
    y = y + beta_ref[...]
    o_ref[...] = (y * jax.nn.sigmoid(y)).astype(o_ref.dtype)          # SiLU, f32 math


# --------------- up GBlock kernel: skip-add + transposed conv (+fused FiLM bias) + SiLU -------------
def _up_block_kernel(x_ref, skip_ref, w_ref, beta_ref, o_ref):
    # x, skip : (TM, Cin)     bf16
    # w       : (Cin, s*Cout) bf16 (columns k-major -> free reshape to (TM*s, Cout) outside)
    # beta    : (1, s*Cout)   f32
    # o       : (TM, s*Cout)
    xs = x_ref[...] + skip_ref[...]                                   # native bf16 add
    y = jnp.dot(xs, w_ref[...], preferred_element_type=jnp.float32)
    y = y + beta_ref[...]
    o_ref[...] = (y * jax.nn.sigmoid(y)).astype(o_ref.dtype)          # SiLU, f32 math


# ------------------------- bidirectional GRU middle-layer kernel -------------------------
def _bigru_kernel(xf_ref, xb_ref, wih_f_ref, wih_b_ref, whh_f_ref, whh_b_ref,
                  bih_f_ref, bih_b_ref, bhh_f_ref, bhh_b_ref,
                  of_ref, ob_ref, xgf_ref, xgb_ref, *, batch, hidden, unroll):
    # xf / xb : (T*B, C) bf16, time-major; xb is time-reversed (prepared in wrapper)
    # wih_*   : (C, 3H) bf16    whh_* : (H, 3H) bf16    biases : (1, 3H) f32
    # of / ob : (T*B, H) f32, time-major; ob already un-reversed (original time order)
    # xg*_ref : (T*B, 3H) bf16 scratch (hoisted whole-sequence input-gate projections)
    TB, _ = xf_ref.shape
    B = batch
    T = TB // B
    H = hidden
    H3 = 3 * H

    # ---- hoisted input-gate matmuls: one big MXU call per direction ----
    xgf_ref[...] = (jnp.dot(xf_ref[...], wih_f_ref[...],
                            preferred_element_type=jnp.float32)
                    + bih_f_ref[...]).astype(xgf_ref.dtype)
    xgb_ref[...] = (jnp.dot(xb_ref[...], wih_b_ref[...],
                            preferred_element_type=jnp.float32)
                    + bih_b_ref[...]).astype(xgb_ref.dtype)

    # ---- recurrence constants hoisted out of the serial loop ----
    whh_f = whh_f_ref[...]
    whh_b = whh_b_ref[...]
    bhh_f = bhh_f_ref[...]
    bhh_b = bhh_b_ref[...]

    def gru_cell(xg, hg, h):
        # PyTorch GRU semantics: gate order r, z, n; bhh_n inside r * (.)
        r = jax.nn.sigmoid(xg[:, 0:H] + hg[:, 0:H])
        z = jax.nn.sigmoid(xg[:, H:2 * H] + hg[:, H:2 * H])
        n = jnp.tanh(xg[:, 2 * H:H3] + r * hg[:, 2 * H:H3])
        return (1.0 - z) * n + z * h

    def step(i, carry):
        h_f, h_b = carry                                              # (B, H) f32 each
        # contiguous row slices of the time-major gate scratches (no per-step concat)
        xg_f = xgf_ref[pl.ds(i * B, B), :].astype(jnp.float32)
        xg_b = xgb_ref[pl.ds(i * B, B), :].astype(jnp.float32)
        hg_f = jnp.dot(h_f.astype(whh_f.dtype), whh_f,
                       preferred_element_type=jnp.float32) + bhh_f
        hg_b = jnp.dot(h_b.astype(whh_b.dtype), whh_b,
                       preferred_element_type=jnp.float32) + bhh_b
        h_f = gru_cell(xg_f, hg_f, h_f)
        h_b = gru_cell(xg_b, hg_b, h_b)
        # contiguous per-step stores; backward written at its original time index
        of_ref[pl.ds(i * B, B), :] = h_f
        ob_ref[pl.ds((T - 1 - i) * B, B), :] = h_b
        return (h_f, h_b)

    h0 = jnp.zeros((B, H), jnp.float32)
    lax.fori_loop(0, T, step, (h0, h0), unroll=unroll)


# ----------------------------------- JAX glue wrappers -----------------------------------
def fourier_feature(sigma_t, fourier_B):
    # Gaussian Fourier features of sigma_t -> (B, E)   (tiny; kept in plain JAX)
    proj = 2.0 * jnp.pi * sigma_t[:, None] * fourier_B[None, :]
    return jnp.concatenate([jnp.sin(proj), jnp.cos(proj)], axis=-1)


def _fused_bias(emb_f32, p):
    # conv bias + FiLM bias + FiLM(emb): grid-invariant -> computed once per forward.
    film = jnp.dot(emb_f32, p["wf"].astype(jnp.float32))
    return (p["b"] + p["bf"] + film)[:, None, :]                      # (B, 1, Cout*) f32


def down_block(x_btc, emb_f32, p, s, out_dtype=jnp.bfloat16):
    # x: (B, T, C) channels-last.  Non-overlapping patch extraction is a free
    # contiguous reshape (B, T, C) -> (B, T//s, s*C), row index k-major (k*Cin+ci).
    B, T, C = x_btc.shape
    Tn, K = T // s, s * C
    Cout = p["w"].shape[1]
    xp = x_btc.reshape(B, Tn, K).astype(jnp.bfloat16)
    beta = _fused_bias(emb_f32, p)                                    # (B, 1, Cout)
    TM = _pick_time_tile(Tn)
    grid = (B, pl.cdiv(Tn, TM))
    tile_bytes = TM * (K + Cout) * 2 + K * Cout * 2 + TM * Cout * 4
    return pl.pallas_call(
        _down_block_kernel,
        out_shape=jax.ShapeDtypeStruct((B, Tn, Cout), out_dtype),
        grid=grid,
        in_specs=[
            pl.BlockSpec((None, TM, K), lambda b, t: (b, t, 0)),
            pl.BlockSpec((K, Cout), lambda b, t: (0, 0)),
            pl.BlockSpec((None, 1, Cout), lambda b, t: (b, 0, 0)),
        ],
        out_specs=pl.BlockSpec((None, TM, Cout), lambda b, t: (b, t, 0)),
        compiler_params=pltpu.CompilerParams(
            dimension_semantics=("parallel", "parallel"),
            vmem_limit_bytes=_vmem_limit(tile_bytes)),
        cost_estimate=pl.CostEstimate(
            flops=2 * B * Tn * K * Cout,
            transcendentals=B * Tn * Cout,
            bytes_accessed=2 * (B * Tn * K + K * Cout + B * Tn * Cout)),
    )(xp, p["w"], beta)


def up_block(x_btc, skip_btc, emb_f32, p, s, out_dtype=jnp.bfloat16):
    # x, skip: (B, T, Cin) channels-last.  ConvTranspose1d with kernel==stride:
    # (x+skip) @ W with W columns k-major, so (B, T, s*Cout) -> (B, T*s, Cout) is free.
    B, T, Cin = x_btc.shape
    Ks = p["w"].shape[1]
    Cout = Ks // s
    beta = _fused_bias(emb_f32, p)                                    # (B, 1, s*Cout)
    TM = _pick_time_tile(T)
    grid = (B, pl.cdiv(T, TM))
    tile_bytes = TM * (2 * Cin + Ks) * 2 + Cin * Ks * 2 + TM * Ks * 4
    y = pl.pallas_call(
        _up_block_kernel,
        out_shape=jax.ShapeDtypeStruct((B, T, Ks), out_dtype),
        grid=grid,
        in_specs=[
            pl.BlockSpec((None, TM, Cin), lambda b, t: (b, t, 0)),
            pl.BlockSpec((None, TM, Cin), lambda b, t: (b, t, 0)),
            pl.BlockSpec((Cin, Ks), lambda b, t: (0, 0)),
            pl.BlockSpec((None, 1, Ks), lambda b, t: (b, 0, 0)),
        ],
        out_specs=pl.BlockSpec((None, TM, Ks), lambda b, t: (b, t, 0)),
        compiler_params=pltpu.CompilerParams(
            dimension_semantics=("parallel", "parallel"),
            vmem_limit_bytes=_vmem_limit(tile_bytes)),
        cost_estimate=pl.CostEstimate(
            flops=2 * B * T * Cin * Ks,
            transcendentals=B * T * Ks,
            bytes_accessed=2 * (2 * B * T * Cin + Cin * Ks + B * T * Ks)),
    )(x_btc.astype(jnp.bfloat16), skip_btc.astype(jnp.bfloat16), p["w"], beta)
    # TODO(synk): production — lane-dense out_spec for the final (Ks==s) block.
    return y.reshape(B, T * s, Cout)


def bigru(x_btc, g):
    # x: (B, T, C) at the bottleneck resolution (tiny T).  Time-major and
    # time-reversed copies are prepared here (cheap XLA ops at bottleneck res).
    B, T, C = x_btc.shape
    H = C // 2
    xf = jnp.transpose(x_btc, (1, 0, 2)).reshape(T * B, C).astype(jnp.bfloat16)
    xb = jnp.transpose(x_btc[:, ::-1, :], (1, 0, 2)).reshape(T * B, C).astype(jnp.bfloat16)
    unroll = max(1, math.gcd(T, 8))

    vmem_need = (2 * T * B * C * 2            # xf, xb (bf16)
                 + 2 * T * B * 3 * H * 2      # gate scratches (bf16)
                 + 2 * T * B * H * 4          # per-direction outputs (f32)
                 + (2 * C + 2 * H) * 3 * H * 2)  # weights (bf16)
    # TODO(synk): at production T, stream xf/xb and the gate scratches from HBM
    # in chunks (emit_pipeline) instead of holding the whole sequence in VMEM.
    of, ob = pl.pallas_call(
        functools.partial(_bigru_kernel, batch=B, hidden=H, unroll=unroll),
        out_shape=(jax.ShapeDtypeStruct((T * B, H), jnp.float32),
                   jax.ShapeDtypeStruct((T * B, H), jnp.float32)),
        in_specs=_vmem_specs(10),
        out_specs=(pl.BlockSpec(memory_space=pltpu.MemorySpace.VMEM),
                   pl.BlockSpec(memory_space=pltpu.MemorySpace.VMEM)),
        scratch_shapes=[
            pltpu.VMEM((T * B, 3 * H), jnp.bfloat16),   # fwd input gates (time-major)
            pltpu.VMEM((T * B, 3 * H), jnp.bfloat16),   # bwd input gates (time-reversed)
        ],
        compiler_params=pltpu.CompilerParams(
            vmem_limit_bytes=_vmem_limit(vmem_need)),
        cost_estimate=pl.CostEstimate(
            flops=2 * T * B * C * 6 * H + 2 * T * B * H * 6 * H,
            transcendentals=6 * T * B * H,
            bytes_accessed=2 * T * B * (2 * C + 6 * H + 2 * H) * 2),
    )(xf, xb, g["wih_f"], g["wih_b"], g["whh_f"], g["whh_b"],
      g["bih_f"], g["bih_b"], g["bhh_f"], g["bhh_b"])

    of = of.reshape(T, B, H)
    ob = ob.reshape(T, B, H)
    out = jnp.concatenate([of, ob], axis=-1)              # (T, B, 2H): [fwd | bwd]
    return jnp.transpose(out, (1, 0, 2)).astype(jnp.bfloat16)   # (B, T, 2H)


def dag_forward(params, x, sigma_t):
    # x: (B, T) -> channels-last (B, T, 1); no NCT<->BTC transposes around kernels.
    emb = fourier_feature(sigma_t, params["fourier_B"])              # (B, E) f32
    h = x[:, :, None].astype(jnp.bfloat16)
    skips = []
    for i, s in enumerate(STRIDE):
        h = down_block(h, emb, params["down"][i], s)
        skips.append(h)
    h = bigru(h, params["gru"])                                      # (B, T, C)
    n_up = len(STRIDE)
    for i, s in enumerate(reversed(STRIDE)):
        skip = skips.pop()
        out_dtype = jnp.float32 if i == n_up - 1 else jnp.bfloat16
        h = up_block(h, skip, emb, params["up"][i], s, out_dtype=out_dtype)
    return h[:, :, 0]                                                # (B, T*, 1) -> (B, T*)


# ----------------------------------- parameter init -----------------------------------
def init_params(key):
    channels = [BASE_CHANNEL * c for c in CHANNEL_MULT]
    c_in_down = [C_IN] + channels[:-1]
    c_out_down = channels[:]
    c_in_up = list(reversed(channels))
    c_out_up = list(reversed([C_OUT] + channels[:-1]))

    keys = iter(jax.random.split(key, 128))

    def dense(shape, fan_in, dtype=jnp.bfloat16):
        w = jax.random.normal(next(keys), shape, jnp.float32) / math.sqrt(fan_in)
        return w.astype(dtype)

    params = {"fourier_B": jax.random.normal(next(keys), (EMBEDDING_SIZE // 2,), jnp.float32)}

    # down: conv weight stored kernel-ready (s*Cin, Cout), row index = k*Cin + ci
    #       (from PyTorch Conv1d (Cout, Cin, s): w.transpose(2, 1, 0).reshape(s*Cin, Cout))
    params["down"] = [
        dict(w=dense((s * ci, co), ci * s),
             b=jnp.zeros((1, co), jnp.float32),
             wf=dense((EMBEDDING_SIZE, co), EMBEDDING_SIZE),
             bf=jnp.zeros((1, co), jnp.float32))
        for ci, co, s in zip(c_in_down, c_out_down, STRIDE)
    ]

    # up: ConvTranspose1d weight stored kernel-ready (Cin, s*Cout), columns k-major
    #     (from PyTorch (Cin, Cout, s): w.transpose(0, 2, 1).reshape(Cin, s*Cout)).
    #     bias / FiLM pre-tiled over the kernel axis ONCE here (not per forward).
    up = []
    for ci, co, s in zip(c_in_up, c_out_up, reversed(STRIDE)):
        b = jnp.zeros((co,), jnp.float32)
        bf = jnp.zeros((co,), jnp.float32)
        wf = dense((EMBEDDING_SIZE, co), EMBEDDING_SIZE)
        up.append(dict(
            w=dense((ci, s * co), ci),
            b=jnp.tile(b, s).reshape(1, s * co),
            bf=jnp.tile(bf, s).reshape(1, s * co),
            wf=jnp.tile(wf, (1, s)),
        ))
    params["up"] = up

    C = channels[-1]
    H = C // 2
    params["gru"] = {
        "wih_f": dense((C, 3 * H), C),
        "wih_b": dense((C, 3 * H), C),
        "whh_f": dense((H, 3 * H), H),
        "whh_b": dense((H, 3 * H), H),
        "bih_f": jnp.zeros((1, 3 * H), jnp.float32),
        "bih_b": jnp.zeros((1, 3 * H), jnp.float32),
        "bhh_f": jnp.zeros((1, 3 * H), jnp.float32),
        "bhh_b": jnp.zeros((1, 3 * H), jnp.float32),
    }
    return params


# ----------------------------------------- main -----------------------------------------
if __name__ == "__main__":
    key = jax.random.PRNGKey(0)
    k_p, k_x, k_s = jax.random.split(key, 3)

    B = 2
    T = 2 * 180                     # must be a multiple of prod(STRIDE) = 180
    x = jax.random.normal(k_x, (B, T), jnp.float32)
    sigma_t = jax.random.uniform(k_s, (B,), jnp.float32, 0.01, 1.0)

    params = init_params(k_p)

    fwd = jax.jit(dag_forward)
    out = jax.block_until_ready(fwd(params, x, sigma_t))

    assert out.shape == (B, T), out.shape
    assert jnp.isfinite(out).all()
    print("KERNEL_OK")
</pallas_src>

<mosaic_0001>
module attributes {stable_mosaic.version = 11 : i64} {
  func.func @_down_block_kernel(%arg0: i32, %arg1: i32, %arg2: memref<1x180x2xbf16, #tpu.memory_space<vmem>>, %arg3: memref<2x8xbf16, #tpu.memory_space<vmem>>, %arg4: memref<1x1x8xf32, #tpu.memory_space<vmem>>, %arg5: memref<1x180x8xbf16, #tpu.memory_space<vmem>>) attributes {dimension_semantics = [#tpu.dimension_semantics<parallel>, #tpu.dimension_semantics<parallel>], iteration_bounds = array<i64: 2, 1>, scalar_prefetch = 0 : i64, scratch_operands = 0 : i64, tpu.core_type = #tpu.core_type<tc>, window_params = [{transform_indices = @transform_0, window_bounds = array<i64: 1, 180, 2>}, {pipeline_mode = #tpu.pipeline_mode<synchronous>, transform_indices = @transform_1, window_bounds = array<i64: 2, 8>}, {transform_indices = @transform_2, window_bounds = array<i64: 1, 1, 8>}, {transform_indices = @transform_3, window_bounds = array<i64: 1, 180, 8>}]} {
    %c0 = arith.constant 0 : index
    %c0_0 = arith.constant 0 : index
    %c0_1 = arith.constant 0 : index
    %0 = vector.load %arg2[%c0, %c0_0, %c0_1] : memref<1x180x2xbf16, #tpu.memory_space<vmem>>, vector<1x180x2xbf16>
    %1 = vector.shape_cast %0 : vector<1x180x2xbf16> to vector<180x2xbf16>
    %c0_2 = arith.constant 0 : index
    %c0_3 = arith.constant 0 : index
    %2 = vector.load %arg3[%c0_2, %c0_3] : memref<2x8xbf16, #tpu.memory_space<vmem>>, vector<2x8xbf16>
    %cst = arith.constant dense<0.000000e+00> : vector<180x8xf32>
    %3 = tpu.matmul %1, %2, %cst {dimension_numbers = #tpu.dot_dimension_numbers<[1], [0], [0], [1], [0, 0, 1, 1], [], []>} : vector<180x2xbf16>, vector<2x8xbf16>, vector<180x8xf32> -> vector<180x8xf32>
    %c0_4 = arith.constant 0 : index
    %c0_5 = arith.constant 0 : index
    %c0_6 = arith.constant 0 : index
    %4 = vector.load %arg4[%c0_4, %c0_5, %c0_6] : memref<1x1x8xf32, #tpu.memory_space<vmem>>, vector<1x1x8xf32>
    %5 = vector.shape_cast %4 : vector<1x1x8xf32> to vector<1x8xf32>
    %6 = vector.broadcast %5 : vector<1x8xf32> to vector<180x8xf32>
    %7 = arith.addf %3, %6 : vector<180x8xf32>
    %8 = arith.negf %7 : vector<180x8xf32>
    %9 = math.exp %8 : vector<180x8xf32>
    %cst_7 = arith.constant 1.000000e+00 : f32
    %10 = vector.broadcast %cst_7 : f32 to vector<180x8xf32>
    %11 = arith.addf %10, %9 : vector<180x8xf32>
    %12 = arith.divf %10, %11 : vector<180x8xf32>
    %13 = arith.mulf %7, %12 : vector<180x8xf32>
    %14 = arith.truncf %13 : vector<180x8xf32> to vector<180x8xbf16>
    %c0_8 = arith.constant 0 : index
    %c0_9 = arith.constant 0 : index
    %c0_10 = arith.constant 0 : index
    %15 = vector.load %arg5[%c0_8, %c0_9, %c0_10] : memref<1x180x8xbf16, #tpu.memory_space<vmem>>, vector<1x180x8xbf16>
    %16 = vector.shape_cast %15 : vector<1x180x8xbf16> to vector<180x8xbf16>
    %17 = vector.shape_cast %14 : vector<180x8xbf16> to vector<1x180x8xbf16>
    tpu.vector_store %arg5[%c0_8, %c0_9, %c0_10], %17 {strides = array<i32>} : memref<1x180x8xbf16, #tpu.memory_space<vmem>>, vector<1x180x8xbf16>,
    return
  }
  func.func @transform_0(%arg0: i32, %arg1: i32) -> (i32, i32, i32) {
    %c0_i32 = arith.constant 0 : i32
    %c0_i32_0 = arith.constant 0 : i32
    return %arg0, %arg1, %c0_i32 : i32, i32, i32
  }
  func.func @transform_1(%arg0: i32, %arg1: i32) -> (i32, i32) {
    %c0_i32 = arith.constant 0 : i32
    %c0_i32_0 = arith.constant 0 : i32
    %c0_i32_1 = arith.constant 0 : i32
    return %c0_i32, %c0_i32_0 : i32, i32
  }
  func.func @transform_2(%arg0: i32, %arg1: i32) -> (i32, i32, i32) {
    %c0_i32 = arith.constant 0 : i32
    %c0_i32_0 = arith.constant 0 : i32
    %c0_i32_1 = arith.constant 0 : i32
    return %arg0, %c0_i32, %c0_i32_0 : i32, i32, i32
  }
  func.func @transform_3(%arg0: i32, %arg1: i32) -> (i32, i32, i32) {
    %c0_i32 = arith.constant 0 : i32
    %c0_i32_0 = arith.constant 0 : i32
    return %arg0, %arg1, %c0_i32 : i32, i32, i32
  }
}

module attributes {stable_mosaic.version = 11 : i64} {
  func.func @_down_block_kernel(%arg0: i32, %arg1: i32, %arg2: memref<1x90x16xbf16, #tpu.memory_space<vmem>>, %arg3: memref<16x16xbf16, #tpu.memory_space<vmem>>, %arg4: memref<1x1x16xf32, #tpu.memory_space<vmem>>, %arg5: memref<1x90x16xbf16, #tpu.memory_space<vmem>>) attributes {dimension_semantics = [#tpu.dimension_semantics<parallel>, #tpu.dimension_semantics<parallel>], iteration_bounds = array<i64: 2, 1>, scalar_prefetch = 0 : i64, scratch_operands = 0 : i64, tpu.core_type = #tpu.core_type<tc>, window_params = [{transform_indices = @transform_0, window_bounds = array<i64: 1, 90, 16>}, {pipeline_mode = #tpu.pipeline_mode<synchronous>, transform_indices = @transform_1, window_bounds = array<i64: 16, 16>}, {transform_indices = @transform_2, window_bounds = array<i64: 1, 1, 16>}, {transform_indices = @transform_3, window_bounds = array<i64: 1, 90, 16>}]} {
    %c0 = arith.constant 0 : index
    %c0_0 = arith.constant 0 : index
    %c0_1 = arith.constant 0 : index
    %0 = vector.load %arg2[%c0, %c0_0, %c0_1] : memref<1x90x16xbf16, #tpu.memory_space<vmem>>, vector<1x90x16xbf16>
    %1 = vector.shape_cast %0 : vector<1x90x16xbf16> to vector<90x16xbf16>
    %c0_2 = arith.constant 0 : index
    %c0_3 = arith.constant 0 : index
    %2 = vector.load %arg3[%c0_2, %c0_3] : memref<16x16xbf16, #tpu.memory_space<vmem>>, vector<16x16xbf16>
    %cst = arith.constant dense<0.000000e+00> : vector<90x16xf32>
    %3 = tpu.matmul %1, %2, %cst {dimension_numbers = #tpu.dot_dimension_numbers<[1], [0], [0], [1], [0, 0, 1, 1], [], []>} : vector<90x16xbf16>, vector<16x16xbf16>, vector<90x16xf32> -> vector<90x16xf32>
    %c0_4 = arith.constant 0 : index
    %c0_5 = arith.constant 0 : index
    %c0_6 = arith.constant 0 : index
    %4 = vector.load %arg4[%c0_4, %c0_5, %c0_6] : memref<1x1x16xf32, #tpu.memory_space<vmem>>, vector<1x1x16xf32>
    %5 = vector.shape_cast %4 : vector<1x1x16xf32> to vector<1x16xf32>
    %6 = vector.broadcast %5 : vector<1x16xf32> to vector<90x16xf32>
    %7 = arith.addf %3, %6 : vector<90x16xf32>
    %8 = arith.negf %7 : vector<90x16xf32>
    %9 = math.exp %8 : vector<90x16xf32>
    %cst_7 = arith.constant 1.000000e+00 : f32
    %10 = vector.broadcast %cst_7 : f32 to vector<90x16xf32>
    %11 = arith.addf %10, %9 : vector<90x16xf32>
    %12 = arith.divf %10, %11 : vector<90x16xf32>
    %13 = arith.mulf %7, %12 : vector<90x16xf32>
    %14 = arith.truncf %13 : vector<90x16xf32> to vector<90x16xbf16>
    %c0_8 = arith.constant 0 : index
    %c0_9 = arith.constant 0 : index
    %c0_10 = arith.constant 0 : index
    %15 = vector.load %arg5[%c0_8, %c0_9, %c0_10] : memref<1x90x16xbf16, #tpu.memory_space<vmem>>, vector<1x90x16xbf16>
    %16 = vector.shape_cast %15 : vector<1x90x16xbf16> to vector<90x16xbf16>
    %17 = vector.shape_cast %14 : vector<90x16xbf16> to vector<1x90x16xbf16>
    tpu.vector_store %arg5[%c0_8, %c0_9, %c0_10], %17 {strides = array<i32>} : memref<1x90x16xbf16, #tpu.memory_space<vmem>>, vector<1x90x16xbf16>,
    return
  }
  func.func @transform_0(%arg0: i32, %arg1: i32) -> (i32, i32, i32) {
    %c0_i32 = arith.constant 0 : i32
    %c0_i32_0 = arith.constant 0 : i32
    return %arg0, %arg1, %c0_i32 : i32, i32, i32
  }
  func.func @transform_1(%arg0: i32, %arg1: i32) -> (i32, i32) {
    %c0_i32 = arith.constant 0 : i32
    %c0_i32_0 = arith.constant 0 : i32
    %c0_i32_1 = arith.constant 0 : i32
    return %c0_i32, %c0_i32_0 : i32, i32
  }
  func.func @transform_2(%arg0: i32, %arg1: i32) -> (i32, i32, i32) {
    %c0_i32 = arith.constant 0 : i32
    %c0_i32_0 = arith.constant 0 : i32
    %c0_i32_1 = arith.constant 0 : i32
    return %arg0, %c0_i32, %c0_i32_0 : i32, i32, i32
  }
  func.func @transform_3(%arg0: i32, %arg1: i32) -> (i32, i32, i32) {
    %c0_i32 = arith.constant 0 : i32
    %c0_i32_0 = arith.constant 0 : i32
    return %arg0, %arg1, %c0_i32 : i32, i32, i32
  }
}

module attributes {stable_mosaic.version = 11 : i64} {
  func.func @_down_block_kernel(%arg0: i32, %arg1: i32, %arg2: memref<1x30x48xbf16, #tpu.memory_space<vmem>>, %arg3: memref<48x16xbf16, #tpu.memory_space<vmem>>, %arg4: memref<1x1x16xf32, #tpu.memory_space<vmem>>, %arg5: memref<1x30x16xbf16, #tpu.memory_space<vmem>>) attributes {dimension_semantics = [#tpu.dimension_semantics<parallel>, #tpu.dimension_semantics<parallel>], iteration_bounds = array<i64: 2, 1>, scalar_prefetch = 0 : i64, scratch_operands = 0 : i64, tpu.core_type = #tpu.core_type<tc>, window_params = [{transform_indices = @transform_0, window_bounds = array<i64: 1, 30, 48>}, {pipeline_mode = #tpu.pipeline_mode<synchronous>, transform_indices = @transform_1, window_bounds = array<i64: 48, 16>}, {transform_indices = @transform_2, window_bounds = array<i64: 1, 1, 16>}, {transform_indices = @transform_3, window_bounds = array<i64: 1, 30, 16>}]} {
    %c0 = arith.constant 0 : index
    %c0_0 = arith.constant 0 : index
    %c0_1 = arith.constant 0 : index
    %0 = vector.load %arg2[%c0, %c0_0, %c0_1] : memref<1x30x48xbf16, #tpu.memory_space<vmem>>, vector<1x30x48xbf16>
    %1 = vector.shape_cast %0 : vector<1x30x48xbf16> to vector<30x48xbf16>
    %c0_2 = arith.constant 0 : index
    %c0_3 = arith.constant 0 : index
    %2 = vector.load %arg3[%c0_2, %c0_3] : memref<48x16xbf16, #tpu.memory_space<vmem>>, vector<48x16xbf16>
    %cst = arith.constant dense<0.000000e+00> : vector<30x16xf32>
    %3 = tpu.matmul %1, %2, %cst {dimension_numbers = #tpu.dot_dimension_numbers<[1], [0], [0], [1], [0, 0, 1, 1], [], []>} : vector<30x48xbf16>, vector<48x16xbf16>, vector<30x16xf32> -> vector<30x16xf32>
    %c0_4 = arith.constant 0 : index
    %c0_5 = arith.constant 0 : index
    %c0_6 = arith.constant 0 : index
    %4 = vector.load %arg4[%c0_4, %c0_5, %c0_6] : memref<1x1x16xf32, #tpu.memory_space<vmem>>, vector<1x1x16xf32>
    %5 = vector.shape_cast %4 : vector<1x1x16xf32> to vector<1x16xf32>
    %6 = vector.broadcast %5 : vector<1x16xf32> to vector<30x16xf32>
    %7 = arith.addf %3, %6 : vector<30x16xf32>
    %8 = arith.negf %7 : vector<30x16xf32>
    %9 = math.exp %8 : vector<30x16xf32>
    %cst_7 = arith.constant 1.000000e+00 : f32
    %10 = vector.broadcast %cst_7 : f32 to vector<30x16xf32>
    %11 = arith.addf %10, %9 : vector<30x16xf32>
    %12 = arith.divf %10, %11 : vector<30x16xf32>
    %13 = arith.mulf %7, %12 : vector<30x16xf32>
    %14 = arith.truncf %13 : vector<30x16xf32> to vector<30x16xbf16>
    %c0_8 = arith.constant 0 : index
    %c0_9 = arith.constant 0 : index
    %c0_10 = arith.constant 0 : index
    %15 = vector.load %arg5[%c0_8, %c0_9, %c0_10] : memref<1x30x16xbf16, #tpu.memory_space<vmem>>, vector<1x30x16xbf16>
    %16 = vector.shape_cast %15 : vector<1x30x16xbf16> to vector<30x16xbf16>
    %17 = vector.shape_cast %14 : vector<30x16xbf16> to vector<1x30x16xbf16>
    tpu.vector_store %arg5[%c0_8, %c0_9, %c0_10], %17 {strides = array<i32>} : memref<1x30x16xbf16, #tpu.memory_space<vmem>>, vector<1x30x16xbf16>,
    return
  }
  func.func @transform_0(%arg0: i32, %arg1: i32) -> (i32, i32, i32) {
    %c0_i32 = arith.constant 0 : i32
    %c0_i32_0 = arith.constant 0 : i32
    return %arg0, %arg1, %c0_i32 : i32, i32, i32
  }
  func.func @transform_1(%arg0: i32, %arg1: i32) -> (i32, i32) {
    %c0_i32 = arith.constant 0 : i32
    %c0_i32_0 = arith.constant 0 : i32
    %c0_i32_1 = arith.constant 0 : i32
    return %c0_i32, %c0_i32_0 : i32, i32
  }
  func.func @transform_2(%arg0: i32, %arg1: i32) -> (i32, i32, i32) {
    %c0_i32 = arith.constant 0 : i32
    %c0_i32_0 = arith.constant 0 : i32
    %c0_i32_1 = arith.constant 0 : i32
    return %arg0, %c0_i32, %c0_i32_0 : i32, i32, i32
  }
  func.func @transform_3(%arg0: i32, %arg1: i32) -> (i32, i32, i32) {
    %c0_i32 = arith.constant 0 : i32
    %c0_i32_0 = arith.constant 0 : i32
    return %arg0, %arg1, %c0_i32 : i32, i32, i32
  }
}

module attributes {stable_mosaic.version = 11 : i64} {
  func.func @_down_block_kernel(%arg0: i32, %arg1: i32, %arg2: memref<1x10x48xbf16, #tpu.memory_space<vmem>>, %arg3: memref<48x32xbf16, #tpu.memory_space<vmem>>, %arg4: memref<1x1x32xf32, #tpu.memory_space<vmem>>, %arg5: memref<1x10x32xbf16, #tpu.memory_space<vmem>>) attributes {dimension_semantics = [#tpu.dimension_semantics<parallel>, #tpu.dimension_semantics<parallel>], iteration_bounds = array<i64: 2, 1>, scalar_prefetch = 0 : i64, scratch_operands = 0 : i64, tpu.core_type = #tpu.core_type<tc>, window_params = [{transform_indices = @transform_0, window_bounds = array<i64: 1, 10, 48>}, {pipeline_mode = #tpu.pipeline_mode<synchronous>, transform_indices = @transform_1, window_bounds = array<i64: 48, 32>}, {transform_indices = @transform_2, window_bounds = array<i64: 1, 1, 32>}, {transform_indices = @transform_3, window_bounds = array<i64: 1, 10, 32>}]} {
    %c0 = arith.constant 0 : index
    %c0_0 = arith.constant 0 : index
    %c0_1 = arith.constant 0 : index
    %0 = vector.load %arg2[%c0, %c0_0, %c0_1] : memref<1x10x48xbf16, #tpu.memory_space<vmem>>, vector<1x10x48xbf16>
    %1 = vector.shape_cast %0 : vector<1x10x48xbf16> to vector<10x48xbf16>
    %c0_2 = arith.constant 0 : index
    %c0_3 = arith.constant 0 : index
    %2 = vector.load %arg3[%c0_2, %c0_3] : memref<48x32xbf16, #tpu.memory_space<vmem>>, vector<48x32xbf16>
    %cst = arith.constant dense<0.000000e+00> : vector<10x32xf32>
    %3 = tpu.matmul %1, %2, %cst {dimension_numbers = #tpu.dot_dimension_numbers<[1], [0], [0], [1], [0, 0, 1, 1], [], []>} : vector<10x48xbf16>, vector<48x32xbf16>, vector<10x32xf32> -> vector<10x32xf32>
    %c0_4 = arith.constant 0 : index
    %c0_5 = arith.constant 0 : index
    %c0_6 = arith.constant 0 : index
    %4 = vector.load %arg4[%c0_4, %c0_5, %c0_6] : memref<1x1x32xf32, #tpu.memory_space<vmem>>, vector<1x1x32xf32>
    %5 = vector.shape_cast %4 : vector<1x1x32xf32> to vector<1x32xf32>
    %6 = vector.broadcast %5 : vector<1x32xf32> to vector<10x32xf32>
    %7 = arith.addf %3, %6 : vector<10x32xf32>
    %8 = arith.negf %7 : vector<10x32xf32>
    %9 = math.exp %8 : vector<10x32xf32>
    %cst_7 = arith.constant 1.000000e+00 : f32
    %10 = vector.broadcast %cst_7 : f32 to vector<10x32xf32>
    %11 = arith.addf %10, %9 : vector<10x32xf32>
    %12 = arith.divf %10, %11 : vector<10x32xf32>
    %13 = arith.mulf %7, %12 : vector<10x32xf32>
    %14 = arith.truncf %13 : vector<10x32xf32> to vector<10x32xbf16>
    %c0_8 = arith.constant 0 : index
    %c0_9 = arith.constant 0 : index
    %c0_10 = arith.constant 0 : index
    %15 = vector.load %arg5[%c0_8, %c0_9, %c0_10] : memref<1x10x32xbf16, #tpu.memory_space<vmem>>, vector<1x10x32xbf16>
    %16 = vector.shape_cast %15 : vector<1x10x32xbf16> to vector<10x32xbf16>
    %17 = vector.shape_cast %14 : vector<10x32xbf16> to vector<1x10x32xbf16>
    tpu.vector_store %arg5[%c0_8, %c0_9, %c0_10], %17 {strides = array<i32>} : memref<1x10x32xbf16, #tpu.memory_space<vmem>>, vector<1x10x32xbf16>,
    return
  }
  func.func @transform_0(%arg0: i32, %arg1: i32) -> (i32, i32, i32) {
    %c0_i32 = arith.constant 0 : i32
    %c0_i32_0 = arith.constant 0 : i32
    return %arg0, %arg1, %c0_i32 : i32, i32, i32
  }
  func.func @transform_1(%arg0: i32, %arg1: i32) -> (i32, i32) {
    %c0_i32 = arith.constant 0 : i32
    %c0_i32_0 = arith.constant 0 : i32
    %c0_i32_1 = arith.constant 0 : i32
    return %c0_i32, %c0_i32_0 : i32, i32
  }
  func.func @transform_2(%arg0: i32, %arg1: i32) -> (i32, i32, i32) {
    %c0_i32 = arith.constant 0 : i32
    %c0_i32_0 = arith.constant 0 : i32
    %c0_i32_1 = arith.constant 0 : i32
    return %arg0, %c0_i32, %c0_i32_0 : i32, i32, i32
  }
  func.func @transform_3(%arg0: i32, %arg1: i32) -> (i32, i32, i32) {
    %c0_i32 = arith.constant 0 : i32
    %c0_i32_0 = arith.constant 0 : i32
    return %arg0, %arg1, %c0_i32 : i32, i32, i32
  }
}

module attributes {stable_mosaic.version = 11 : i64} {
  func.func @_down_block_kernel(%arg0: i32, %arg1: i32, %arg2: memref<1x2x160xbf16, #tpu.memory_space<vmem>>, %arg3: memref<160x64xbf16, #tpu.memory_space<vmem>>, %arg4: memref<1x1x64xf32, #tpu.memory_space<vmem>>, %arg5: memref<1x2x64xbf16, #tpu.memory_space<vmem>>) attributes {dimension_semantics = [#tpu.dimension_semantics<parallel>, #tpu.dimension_semantics<parallel>], iteration_bounds = array<i64: 2, 1>, scalar_prefetch = 0 : i64, scratch_operands = 0 : i64, tpu.core_type = #tpu.core_type<tc>, window_params = [{transform_indices = @transform_0, window_bounds = array<i64: 1, 2, 160>}, {pipeline_mode = #tpu.pipeline_mode<synchronous>, transform_indices = @transform_1, window_bounds = array<i64: 160, 64>}, {transform_indices = @transform_2, window_bounds = array<i64: 1, 1, 64>}, {transform_indices = @transform_3, window_bounds = array<i64: 1, 2, 64>}]} {
    %c0 = arith.constant 0 : index
    %c0_0 = arith.constant 0 : index
    %c0_1 = arith.constant 0 : index
    %0 = vector.load %arg2[%c0, %c0_0, %c0_1] : memref<1x2x160xbf16, #tpu.memory_space<vmem>>, vector<1x2x160xbf16>
    %1 = vector.shape_cast %0 : vector<1x2x160xbf16> to vector<2x160xbf16>
    %c0_2 = arith.constant 0 : index
    %c0_3 = arith.constant 0 : index
    %2 = vector.load %arg3[%c0_2, %c0_3] : memref<160x64xbf16, #tpu.memory_space<vmem>>, vector<160x64xbf16>
    %cst = arith.constant dense<0.000000e+00> : vector<2x64xf32>
    %3 = tpu.matmul %1, %2, %cst {dimension_numbers = #tpu.dot_dimension_numbers<[1], [0], [0], [1], [0, 0, 1, 1], [], []>} : vector<2x160xbf16>, vector<160x64xbf16>, vector<2x64xf32> -> vector<2x64xf32>
    %c0_4 = arith.constant 0 : index
    %c0_5 = arith.constant 0 : index
    %c0_6 = arith.constant 0 : index
    %4 = vector.load %arg4[%c0_4, %c0_5, %c0_6] : memref<1x1x64xf32, #tpu.memory_space<vmem>>, vector<1x1x64xf32>
    %5 = vector.shape_cast %4 : vector<1x1x64xf32> to vector<1x64xf32>
    %6 = vector.broadcast %5 : vector<1x64xf32> to vector<2x64xf32>
    %7 = arith.addf %3, %6 : vector<2x64xf32>
    %8 = arith.negf %7 : vector<2x64xf32>
    %9 = math.exp %8 : vector<2x64xf32>
    %cst_7 = arith.constant 1.000000e+00 : f32
    %10 = vector.broadcast %cst_7 : f32 to vector<2x64xf32>
    %11 = arith.addf %10, %9 : vector<2x64xf32>
    %12 = arith.divf %10, %11 : vector<2x64xf32>
    %13 = arith.mulf %7, %12 : vector<2x64xf32>
    %14 = arith.truncf %13 : vector<2x64xf32> to vector<2x64xbf16>
    %c0_8 = arith.constant 0 : index
    %c0_9 = arith.constant 0 : index
    %c0_10 = arith.constant 0 : index
    %15 = vector.load %arg5[%c0_8, %c0_9, %c0_10] : memref<1x2x64xbf16, #tpu.memory_space<vmem>>, vector<1x2x64xbf16>
    %16 = vector.shape_cast %15 : vector<1x2x64xbf16> to vector<2x64xbf16>
    %17 = vector.shape_cast %14 : vector<2x64xbf16> to vector<1x2x64xbf16>
    tpu.vector_store %arg5[%c0_8, %c0_9, %c0_10], %17 {strides = array<i32>} : memref<1x2x64xbf16, #tpu.memory_space<vmem>>, vector<1x2x64xbf16>,
    return
  }
  func.func @transform_0(%arg0: i32, %arg1: i32) -> (i32, i32, i32) {
    %c0_i32 = arith.constant 0 : i32
    %c0_i32_0 = arith.constant 0 : i32
    return %arg0, %arg1, %c0_i32 : i32, i32, i32
  }
  func.func @transform_1(%arg0: i32, %arg1: i32) -> (i32, i32) {
    %c0_i32 = arith.constant 0 : i32
    %c0_i32_0 = arith.constant 0 : i32
    %c0_i32_1 = arith.constant 0 : i32
    return %c0_i32, %c0_i32_0 : i32, i32
  }
  func.func @transform_2(%arg0: i32, %arg1: i32) -> (i32, i32, i32) {
    %c0_i32 = arith.constant 0 : i32
    %c0_i32_0 = arith.constant 0 : i32
    %c0_i32_1 = arith.constant 0 : i32
    return %arg0, %c0_i32, %c0_i32_0 : i32, i32, i32
  }
  func.func @transform_3(%arg0: i32, %arg1: i32) -> (i32, i32, i32) {
    %c0_i32 = arith.constant 0 : i32
    %c0_i32_0 = arith.constant 0 : i32
    return %arg0, %arg1, %c0_i32 : i32, i32, i32
  }
}

module attributes {stable_mosaic.version = 11 : i64} {
  func.func @_bigru_kernel(%arg0: memref<4x64xbf16, #tpu.memory_space<vmem>>, %arg1: memref<4x64xbf16, #tpu.memory_space<vmem>>, %arg2: memref<64x96xbf16, #tpu.memory_space<vmem>>, %arg3: memref<64x96xbf16, #tpu.memory_space<vmem>>, %arg4: memref<32x96xbf16, #tpu.memory_space<vmem>>, %arg5: memref<32x96xbf16, #tpu.memory_space<vmem>>, %arg6: memref<1x96xf32, #tpu.memory_space<vmem>>, %arg7: memref<1x96xf32, #tpu.memory_space<vmem>>, %arg8: memref<1x96xf32, #tpu.memory_space<vmem>>, %arg9: memref<1x96xf32, #tpu.memory_space<vmem>>, %arg10: memref<4x32xf32, #tpu.memory_space<vmem>>, %arg11: memref<4x32xf32, #tpu.memory_space<vmem>>, %arg12: memref<4x96xbf16, #tpu.memory_space<vmem>>, %arg13: memref<4x96xbf16, #tpu.memory_space<vmem>>) attributes {dimension_semantics = [], scalar_prefetch = 0 : i64, scratch_operands = 2 : i64, tpu.core_type = #tpu.core_type<tc>} {
    %c0 = arith.constant 0 : index
    %c0_0 = arith.constant 0 : index
    %0 = vector.load %arg0[%c0, %c0_0] : memref<4x64xbf16, #tpu.memory_space<vmem>>, vector<4x64xbf16>
    %c0_1 = arith.constant 0 : index
    %c0_2 = arith.constant 0 : index
    %1 = vector.load %arg2[%c0_1, %c0_2] : memref<64x96xbf16, #tpu.memory_space<vmem>>, vector<64x96xbf16>
    %cst = arith.constant dense<0.000000e+00> : vector<4x96xf32>
    %2 = tpu.matmul %0, %1, %cst {dimension_numbers = #tpu.dot_dimension_numbers<[1], [0], [0], [1], [0, 0, 1, 1], [], []>} : vector<4x64xbf16>, vector<64x96xbf16>, vector<4x96xf32> -> vector<4x96xf32>
    %c0_3 = arith.constant 0 : index
    %c0_4 = arith.constant 0 : index
    %3 = vector.load %arg6[%c0_3, %c0_4] : memref<1x96xf32, #tpu.memory_space<vmem>>, vector<1x96xf32>
    %4 = vector.broadcast %3 : vector<1x96xf32> to vector<4x96xf32>
    %5 = arith.addf %2, %4 : vector<4x96xf32>
    %6 = arith.truncf %5 : vector<4x96xf32> to vector<4x96xbf16>
    %c0_5 = arith.constant 0 : index
    %c0_6 = arith.constant 0 : index
    %7 = vector.load %arg12[%c0_5, %c0_6] : memref<4x96xbf16, #tpu.memory_space<vmem>>, vector<4x96xbf16>
    tpu.vector_store %arg12[%c0_5, %c0_6], %6 {strides = array<i32>} : memref<4x96xbf16, #tpu.memory_space<vmem>>, vector<4x96xbf16>,
    %c0_7 = arith.constant 0 : index
    %c0_8 = arith.constant 0 : index
    %8 = vector.load %arg1[%c0_7, %c0_8] : memref<4x64xbf16, #tpu.memory_space<vmem>>, vector<4x64xbf16>
    %c0_9 = arith.constant 0 : index
    %c0_10 = arith.constant 0 : index
    %9 = vector.load %arg3[%c0_9, %c0_10] : memref<64x96xbf16, #tpu.memory_space<vmem>>, vector<64x96xbf16>
    %cst_11 = arith.constant dense<0.000000e+00> : vector<4x96xf32>
    %10 = tpu.matmul %8, %9, %cst_11 {dimension_numbers = #tpu.dot_dimension_numbers<[1], [0], [0], [1], [0, 0, 1, 1], [], []>} : vector<4x64xbf16>, vector<64x96xbf16>, vector<4x96xf32> -> vector<4x96xf32>
    %c0_12 = arith.constant 0 : index
    %c0_13 = arith.constant 0 : index
    %11 = vector.load %arg7[%c0_12, %c0_13] : memref<1x96xf32, #tpu.memory_space<vmem>>, vector<1x96xf32>
    %12 = vector.broadcast %11 : vector<1x96xf32> to vector<4x96xf32>
    %13 = arith.addf %10, %12 : vector<4x96xf32>
    %14 = arith.truncf %13 : vector<4x96xf32> to vector<4x96xbf16>
    %c0_14 = arith.constant 0 : index
    %c0_15 = arith.constant 0 : index
    %15 = vector.load %arg13[%c0_14, %c0_15] : memref<4x96xbf16, #tpu.memory_space<vmem>>, vector<4x96xbf16>
    tpu.vector_store %arg13[%c0_14, %c0_15], %14 {strides = array<i32>} : memref<4x96xbf16, #tpu.memory_space<vmem>>, vector<4x96xbf16>,
    %c0_16 = arith.constant 0 : index
    %c0_17 = arith.constant 0 : index
    %16 = vector.load %arg4[%c0_16, %c0_17] : memref<32x96xbf16, #tpu.memory_space<vmem>>, vector<32x96xbf16>
    %c0_18 = arith.constant 0 : index
    %c0_19 = arith.constant 0 : index
    %17 = vector.load %arg5[%c0_18, %c0_19] : memref<32x96xbf16, #tpu.memory_space<vmem>>, vector<32x96xbf16>
    %c0_20 = arith.constant 0 : index
    %c0_21 = arith.constant 0 : index
    %18 = vector.load %arg8[%c0_20, %c0_21] : memref<1x96xf32, #tpu.memory_space<vmem>>, vector<1x96xf32>
    %c0_22 = arith.constant 0 : index
    %c0_23 = arith.constant 0 : index
    %19 = vector.load %arg9[%c0_22, %c0_23] : memref<1x96xf32, #tpu.memory_space<vmem>>, vector<1x96xf32>
    %cst_24 = arith.constant 0.000000e+00 : f32
    %20 = vector.broadcast %cst_24 : f32 to vector<2x32xf32>
    %c0_i32 = arith.constant 0 : i32
    %c2_i32 = arith.constant 2 : i32
    %21 = arith.muli %c0_i32, %c2_i32 : i32
    %22 = arith.index_cast %21 : i32 to index
    %c0_25 = arith.constant 0 : index
    %23 = vector.load %arg12[%22, %c0_25] : memref<4x96xbf16, #tpu.memory_space<vmem>>, vector<2x96xbf16>
    %24 = arith.extf %23 : vector<2x96xbf16> to vector<2x96xf32>
    %c2_i32_26 = arith.constant 2 : i32
    %25 = arith.muli %c0_i32, %c2_i32_26 : i32
    %26 = arith.index_cast %25 : i32 to index
    %c0_27 = arith.constant 0 : index
    %27 = vector.load %arg13[%26, %c0_27] : memref<4x96xbf16, #tpu.memory_space<vmem>>, vector<2x96xbf16>
    %28 = arith.extf %27 : vector<2x96xbf16> to vector<2x96xf32>
    %29 = arith.truncf %20 : vector<2x32xf32> to vector<2x32xbf16>
    %cst_28 = arith.constant dense<0.000000e+00> : vector<2x96xf32>
    %30 = tpu.matmul %29, %16, %cst_28 {dimension_numbers = #tpu.dot_dimension_numbers<[1], [0], [0], [1], [0, 0, 1, 1], [], []>} : vector<2x32xbf16>, vector<32x96xbf16>, vector<2x96xf32> -> vector<2x96xf32>
    %31 = vector.broadcast %18 : vector<1x96xf32> to vector<2x96xf32>
    %32 = arith.addf %30, %31 : vector<2x96xf32>
    %33 = arith.truncf %20 : vector<2x32xf32> to vector<2x32xbf16>
    %cst_29 = arith.constant dense<0.000000e+00> : vector<2x96xf32>
    %34 = tpu.matmul %33, %17, %cst_29 {dimension_numbers = #tpu.dot_dimension_numbers<[1], [0], [0], [1], [0, 0, 1, 1], [], []>} : vector<2x32xbf16>, vector<32x96xbf16>, vector<2x96xf32> -> vector<2x96xf32>
    %35 = vector.broadcast %19 : vector<1x96xf32> to vector<2x96xf32>
    %36 = arith.addf %34, %35 : vector<2x96xf32>
    %37 = vector.extract_strided_slice %24 {offsets = [0, 0], sizes = [2, 32], strides = [1, 1]} : vector<2x96xf32> to vector<2x32xf32>
    %38 = vector.extract_strided_slice %32 {offsets = [0, 0], sizes = [2, 32], strides = [1, 1]} : vector<2x96xf32> to vector<2x32xf32>
    %39 = arith.addf %37, %38 : vector<2x32xf32>
    %40 = arith.negf %39 : vector<2x32xf32>
    %41 = math.exp %40 : vector<2x32xf32>
    %cst_30 = arith.constant 1.000000e+00 : f32
    %42 = vector.broadcast %cst_30 : f32 to vector<2x32xf32>
    %43 = arith.addf %42, %41 : vector<2x32xf32>
    %44 = arith.divf %42, %43 : vector<2x32xf32>
    %45 = vector.extract_strided_slice %24 {offsets = [0, 32], sizes = [2, 32], strides = [1, 1]} : vector<2x96xf32> to vector<2x32xf32>
    %46 = vector.extract_strided_slice %32 {offsets = [0, 32], sizes = [2, 32], strides = [1, 1]} : vector<2x96xf32> to vector<2x32xf32>
    %47 = arith.addf %45, %46 : vector<2x32xf32>
    %48 = arith.negf %47 : vector<2x32xf32>
    %49 = math.exp %48 : vector<2x32xf32>
    %cst_31 = arith.constant 1.000000e+00 : f32
    %50 = vector.broadcast %cst_31 : f32 to vector<2x32xf32>
    %51 = arith.addf %50, %49 : vector<2x32xf32>
    %52 = arith.divf %50, %51 : vector<2x32xf32>
    %53 = vector.extract_strided_slice %24 {offsets = [0, 64], sizes = [2, 32], strides = [1, 1]} : vector<2x96xf32> to vector<2x32xf32>
    %54 = vector.extract_strided_slice %32 {offsets = [0, 64], sizes = [2, 32], strides = [1, 1]} : vector<2x96xf32> to vector<2x32xf32>
    %55 = arith.mulf %44, %54 : vector<2x32xf32>
    %56 = arith.addf %53, %55 : vector<2x32xf32>
    %57 = math.tanh %56 : vector<2x32xf32>
    %cst_32 = arith.constant 1.000000e+00 : f32
    %58 = vector.broadcast %cst_32 : f32 to vector<2x32xf32>
    %59 = arith.subf %58, %52 : vector<2x32xf32>
    %60 = arith.mulf %59, %57 : vector<2x32xf32>
    %61 = arith.mulf %52, %20 : vector<2x32xf32>
    %62 = arith.addf %60, %61 : vector<2x32xf32>
    %63 = vector.extract_strided_slice %28 {offsets = [0, 0], sizes = [2, 32], strides = [1, 1]} : vector<2x96xf32> to vector<2x32xf32>
    %64 = vector.extract_strided_slice %36 {offsets = [0, 0], sizes = [2, 32], strides = [1, 1]} : vector<2x96xf32> to vector<2x32xf32>
    %65 = arith.addf %63, %64 : vector<2x32xf32>
    %66 = arith.negf %65 : vector<2x32xf32>
    %67 = math.exp %66 : vector<2x32xf32>
    %cst_33 = arith.constant 1.000000e+00 : f32
    %68 = vector.broadcast %cst_33 : f32 to vector<2x32xf32>
    %69 = arith.addf %68, %67 : vector<2x32xf32>
    %70 = arith.divf %68, %69 : vector<2x32xf32>
    %71 = vector.extract_strided_slice %28 {offsets = [0, 32], sizes = [2, 32], strides = [1, 1]} : vector<2x96xf32> to vector<2x32xf32>
    %72 = vector.extract_strided_slice %36 {offsets = [0, 32], sizes = [2, 32], strides = [1, 1]} : vector<2x96xf32> to vector<2x32xf32>
    %73 = arith.addf %71, %72 : vector<2x32xf32>
    %74 = arith.negf %73 : vector<2x32xf32>
    %75 = math.exp %74 : vector<2x32xf32>
    %cst_34 = arith.constant 1.000000e+00 : f32
    %76 = vector.broadcast %cst_34 : f32 to vector<2x32xf32>
    %77 = arith.addf %76, %75 : vector<2x32xf32>
    %78 = arith.divf %76, %77 : vector<2x32xf32>
    %79 = vector.extract_strided_slice %28 {offsets = [0, 64], sizes = [2, 32], strides = [1, 1]} : vector<2x96xf32> to vector<2x32xf32>
    %80 = vector.extract_strided_slice %36 {offsets = [0, 64], sizes = [2, 32], strides = [1, 1]} : vector<2x96xf32> to vector<2x32xf32>
    %81 = arith.mulf %70, %80 : vector<2x32xf32>
    %82 = arith.addf %79, %81 : vector<2x32xf32>
    %83 = math.tanh %82 : vector<2x32xf32>
    %cst_35 = arith.constant 1.000000e+00 : f32
    %84 = vector.broadcast %cst_35 : f32 to vector<2x32xf32>
    %85 = arith.subf %84, %78 : vector<2x32xf32>
    %86 = arith.mulf %85, %83 : vector<2x32xf32>
    %87 = arith.mulf %78, %20 : vector<2x32xf32>
    %88 = arith.addf %86, %87 : vector<2x32xf32>
    %c2_i32_36 = arith.constant 2 : i32
    %89 = arith.muli %c0_i32, %c2_i32_36 : i32
    %90 = arith.index_cast %89 : i32 to index
    %c0_37 = arith.constant 0 : index
    %91 = vector.load %arg10[%90, %c0_37] : memref<4x32xf32, #tpu.memory_space<vmem>>, vector<2x32xf32>
    tpu.vector_store %arg10[%90, %c0_37], %62 {strides = array<i32>} : memref<4x32xf32, #tpu.memory_space<vmem>>, vector<2x32xf32>,
    %c1_i32 = arith.constant 1 : i32
    %92 = arith.subi %c1_i32, %c0_i32 : i32
    %c2_i32_38 = arith.constant 2 : i32
    %93 = arith.muli %92, %c2_i32_38 : i32
    %94 = arith.index_cast %93 : i32 to index
    %c0_39 = arith.constant 0 : index
    %95 = vector.load %arg11[%94, %c0_39] : memref<4x32xf32, #tpu.memory_space<vmem>>, vector<2x32xf32>
    tpu.vector_store %arg11[%94, %c0_39], %88 {strides = array<i32>} : memref<4x32xf32, #tpu.memory_space<vmem>>, vector<2x32xf32>,
    %c1_i32_40 = arith.constant 1 : i32
    %c2_i32_41 = arith.constant 2 : i32
    %96 = arith.muli %c1_i32_40, %c2_i32_41 : i32
    %97 = arith.index_cast %96 : i32 to index
    %c0_42 = arith.constant 0 : index
    %98 = vector.load %arg12[%97, %c0_42] : memref<4x96xbf16, #tpu.memory_space<vmem>>, vector<2x96xbf16>
    %99 = arith.extf %98 : vector<2x96xbf16> to vector<2x96xf32>
    %c2_i32_43 = arith.constant 2 : i32
    %100 = arith.muli %c1_i32_40, %c2_i32_43 : i32
    %101 = arith.index_cast %100 : i32 to index
    %c0_44 = arith.constant 0 : index
    %102 = vector.load %arg13[%101, %c0_44] : memref<4x96xbf16, #tpu.memory_space<vmem>>, vector<2x96xbf16>
    %103 = arith.extf %102 : vector<2x96xbf16> to vector<2x96xf32>
    %104 = arith.truncf %62 : vector<2x32xf32> to vector<2x32xbf16>
    %cst_45 = arith.constant dense<0.000000e+00> : vector<2x96xf32>
    %105 = tpu.matmul %104, %16, %cst_45 {dimension_numbers = #tpu.dot_dimension_numbers<[1], [0], [0], [1], [0, 0, 1, 1], [], []>} : vector<2x32xbf16>, vector<32x96xbf16>, vector<2x96xf32> -> vector<2x96xf32>
    %106 = vector.broadcast %18 : vector<1x96xf32> to vector<2x96xf32>
    %107 = arith.addf %105, %106 : vector<2x96xf32>
    %108 = arith.truncf %88 : vector<2x32xf32> to vector<2x32xbf16>
    %cst_46 = arith.constant dense<0.000000e+00> : vector<2x96xf32>
    %109 = tpu.matmul %108, %17, %cst_46 {dimension_numbers = #tpu.dot_dimension_numbers<[1], [0], [0], [1], [0, 0, 1, 1], [], []>} : vector<2x32xbf16>, vector<32x96xbf16>, vector<2x96xf32> -> vector<2x96xf32>
    %110 = vector.broadcast %19 : vector<1x96xf32> to vector<2x96xf32>
    %111 = arith.addf %109, %110 : vector<2x96xf32>
    %112 = vector.extract_strided_slice %99 {offsets = [0, 0], sizes = [2, 32], strides = [1, 1]} : vector<2x96xf32> to vector<2x32xf32>
    %113 = vector.extract_strided_slice %107 {offsets = [0, 0], sizes = [2, 32], strides = [1, 1]} : vector<2x96xf32> to vector<2x32xf32>
    %114 = arith.addf %112, %113 : vector<2x32xf32>
    %115 = arith.negf %114 : vector<2x32xf32>
    %116 = math.exp %115 : vector<2x32xf32>
    %cst_47 = arith.constant 1.000000e+00 : f32
    %117 = vector.broadcast %cst_47 : f32 to vector<2x32xf32>
    %118 = arith.addf %117, %116 : vector<2x32xf32>
    %119 = arith.divf %117, %118 : vector<2x32xf32>
    %120 = vector.extract_strided_slice %99 {offsets = [0, 32], sizes = [2, 32], strides = [1, 1]} : vector<2x96xf32> to vector<2x32xf32>
    %121 = vector.extract_strided_slice %107 {offsets = [0, 32], sizes = [2, 32], strides = [1, 1]} : vector<2x96xf32> to vector<2x32xf32>
    %122 = arith.addf %120, %121 : vector<2x32xf32>
    %123 = arith.negf %122 : vector<2x32xf32>
    %124 = math.exp %123 : vector<2x32xf32>
    %cst_48 = arith.constant 1.000000e+00 : f32
    %125 = vector.broadcast %cst_48 : f32 to vector<2x32xf32>
    %126 = arith.addf %125, %124 : vector<2x32xf32>
    %127 = arith.divf %125, %126 : vector<2x32xf32>
    %128 = vector.extract_strided_slice %99 {offsets = [0, 64], sizes = [2, 32], strides = [1, 1]} : vector<2x96xf32> to vector<2x32xf32>
    %129 = vector.extract_strided_slice %107 {offsets = [0, 64], sizes = [2, 32], strides = [1, 1]} : vector<2x96xf32> to vector<2x32xf32>
    %130 = arith.mulf %119, %129 : vector<2x32xf32>
    %131 = arith.addf %128, %130 : vector<2x32xf32>
    %132 = math.tanh %131 : vector<2x32xf32>
    %cst_49 = arith.constant 1.000000e+00 : f32
    %133 = vector.broadcast %cst_49 : f32 to vector<2x32xf32>
    %134 = arith.subf %133, %127 : vector<2x32xf32>
    %135 = arith.mulf %134, %132 : vector<2x32xf32>
    %136 = arith.mulf %127, %62 : vector<2x32xf32>
    %137 = arith.addf %135, %136 : vector<2x32xf32>
    %138 = vector.extract_strided_slice %103 {offsets = [0, 0], sizes = [2, 32], strides = [1, 1]} : vector<2x96xf32> to vector<2x32xf32>
    %139 = vector.extract_strided_slice %111 {offsets = [0, 0], sizes = [2, 32], strides = [1, 1]} : vector<2x96xf32> to vector<2x32xf32>
    %140 = arith.addf %138, %139 : vector<2x32xf32>
    %141 = arith.negf %140 : vector<2x32xf32>
    %142 = math.exp %141 : vector<2x32xf32>
    %cst_50 = arith.constant 1.000000e+00 : f32
    %143 = vector.broadcast %cst_50 : f32 to vector<2x32xf32>
    %144 = arith.addf %143, %142 : vector<2x32xf32>
    %145 = arith.divf %143, %144 : vector<2x32xf32>
    %146 = vector.extract_strided_slice %103 {offsets = [0, 32], sizes = [2, 32], strides = [1, 1]} : vector<2x96xf32> to vector<2x32xf32>
    %147 = vector.extract_strided_slice %111 {offsets = [0, 32], sizes = [2, 32], strides = [1, 1]} : vector<2x96xf32> to vector<2x32xf32>
    %148 = arith.addf %146, %147 : vector<2x32xf32>
    %149 = arith.negf %148 : vector<2x32xf32>
    %150 = math.exp %149 : vector<2x32xf32>
    %cst_51 = arith.constant 1.000000e+00 : f32
    %151 = vector.broadcast %cst_51 : f32 to vector<2x32xf32>
    %152 = arith.addf %151, %150 : vector<2x32xf32>
    %153 = arith.divf %151, %152 : vector<2x32xf32>
    %154 = vector.extract_strided_slice %103 {offsets = [0, 64], sizes = [2, 32], strides = [1, 1]} : vector<2x96xf32> to vector<2x32xf32>
    %155 = vector.extract_strided_slice %111 {offsets = [0, 64], sizes = [2, 32], strides = [1, 1]} : vector<2x96xf32> to vector<2x32xf32>
    %156 = arith.mulf %145, %155 : vector<2x32xf32>
    %157 = arith.addf %154, %156 : vector<2x32xf32>
    %158 = math.tanh %157 : vector<2x32xf32>
    %cst_52 = arith.constant 1.000000e+00 : f32
    %159 = vector.broadcast %cst_52 : f32 to vector<2x32xf32>
    %160 = arith.subf %159, %153 : vector<2x32xf32>
    %161 = arith.mulf %160, %158 : vector<2x32xf32>
    %162 = arith.mulf %153, %88 : vector<2x32xf32>
    %163 = arith.addf %161, %162 : vector<2x32xf32>
    %c2_i32_53 = arith.constant 2 : i32
    %164 = arith.muli %c1_i32_40, %c2_i32_53 : i32
    %165 = arith.index_cast %164 : i32 to index
    %c0_54 = arith.constant 0 : index
    %166 = vector.load %arg10[%165, %c0_54] : memref<4x32xf32, #tpu.memory_space<vmem>>, vector<2x32xf32>
    tpu.vector_store %arg10[%165, %c0_54], %137 {strides = array<i32>} : memref<4x32xf32, #tpu.memory_space<vmem>>, vector<2x32xf32>,
    %c1_i32_55 = arith.constant 1 : i32
    %167 = arith.subi %c1_i32_55, %c1_i32_40 : i32
    %c2_i32_56 = arith.constant 2 : i32
    %168 = arith.muli %167, %c2_i32_56 : i32
    %169 = arith.index_cast %168 : i32 to index
    %c0_57 = arith.constant 0 : index
    %170 = vector.load %arg11[%169, %c0_57] : memref<4x32xf32, #tpu.memory_space<vmem>>, vector<2x32xf32>
    tpu.vector_store %arg11[%169, %c0_57], %163 {strides = array<i32>} : memref<4x32xf32, #tpu.memory_space<vmem>>, vector<2x32xf32>,
    %c2_i32_58 = arith.constant 2 : i32
    return
  }
}

module attributes {stable_mosaic.version = 11 : i64} {
  func.func @_up_block_kernel(%arg0: i32, %arg1: i32, %arg2: memref<1x2x64xbf16, #tpu.memory_space<vmem>>, %arg3: memref<1x2x64xbf16, #tpu.memory_space<vmem>>, %arg4: memref<64x160xbf16, #tpu.memory_space<vmem>>, %arg5: memref<1x1x160xf32, #tpu.memory_space<vmem>>, %arg6: memref<1x2x160xbf16, #tpu.memory_space<vmem>>) attributes {dimension_semantics = [#tpu.dimension_semantics<parallel>, #tpu.dimension_semantics<parallel>], iteration_bounds = array<i64: 2, 1>, scalar_prefetch = 0 : i64, scratch_operands = 0 : i64, tpu.core_type = #tpu.core_type<tc>, window_params = [{transform_indices = @transform_0, window_bounds = array<i64: 1, 2, 64>}, {transform_indices = @transform_1, window_bounds = array<i64: 1, 2, 64>}, {pipeline_mode = #tpu.pipeline_mode<synchronous>, transform_indices = @transform_2, window_bounds = array<i64: 64, 160>}, {transform_indices = @transform_3, window_bounds = array<i64: 1, 1, 160>}, {transform_indices = @transform_4, window_bounds = array<i64: 1, 2, 160>}]} {
    %c0 = arith.constant 0 : index
    %c0_0 = arith.constant 0 : index
    %c0_1 = arith.constant 0 : index
    %0 = vector.load %arg2[%c0, %c0_0, %c0_1] : memref<1x2x64xbf16, #tpu.memory_space<vmem>>, vector<1x2x64xbf16>
    %1 = vector.shape_cast %0 : vector<1x2x64xbf16> to vector<2x64xbf16>
    %c0_2 = arith.constant 0 : index
    %c0_3 = arith.constant 0 : index
    %c0_4 = arith.constant 0 : index
    %2 = vector.load %arg3[%c0_2, %c0_3, %c0_4] : memref<1x2x64xbf16, #tpu.memory_space<vmem>>, vector<1x2x64xbf16>
    %3 = vector.shape_cast %2 : vector<1x2x64xbf16> to vector<2x64xbf16>
    %4 = arith.addf %1, %3 : vector<2x64xbf16>
    %c0_5 = arith.constant 0 : index
    %c0_6 = arith.constant 0 : index
    %5 = vector.load %arg4[%c0_5, %c0_6] : memref<64x160xbf16, #tpu.memory_space<vmem>>, vector<64x160xbf16>
    %cst = arith.constant dense<0.000000e+00> : vector<2x160xf32>
    %6 = tpu.matmul %4, %5, %cst {dimension_numbers = #tpu.dot_dimension_numbers<[1], [0], [0], [1], [0, 0, 1, 1], [], []>} : vector<2x64xbf16>, vector<64x160xbf16>, vector<2x160xf32> -> vector<2x160xf32>
    %c0_7 = arith.constant 0 : index
    %c0_8 = arith.constant 0 : index
    %c0_9 = arith.constant 0 : index
    %7 = vector.load %arg5[%c0_7, %c0_8, %c0_9] : memref<1x1x160xf32, #tpu.memory_space<vmem>>, vector<1x1x160xf32>
    %8 = vector.shape_cast %7 : vector<1x1x160xf32> to vector<1x160xf32>
    %9 = vector.broadcast %8 : vector<1x160xf32> to vector<2x160xf32>
    %10 = arith.addf %6, %9 : vector<2x160xf32>
    %11 = arith.negf %10 : vector<2x160xf32>
    %12 = math.exp %11 : vector<2x160xf32>
    %cst_10 = arith.constant 1.000000e+00 : f32
    %13 = vector.broadcast %cst_10 : f32 to vector<2x160xf32>
    %14 = arith.addf %13, %12 : vector<2x160xf32>
    %15 = arith.divf %13, %14 : vector<2x160xf32>
    %16 = arith.mulf %10, %15 : vector<2x160xf32>
    %17 = arith.truncf %16 : vector<2x160xf32> to vector<2x160xbf16>
    %c0_11 = arith.constant 0 : index
    %c0_12 = arith.constant 0 : index
    %c0_13 = arith.constant 0 : index
    %18 = vector.load %arg6[%c0_11, %c0_12, %c0_13] : memref<1x2x160xbf16, #tpu.memory_space<vmem>>, vector<1x2x160xbf16>
    %19 = vector.shape_cast %18 : vector<1x2x160xbf16> to vector<2x160xbf16>
    %20 = vector.shape_cast %17 : vector<2x160xbf16> to vector<1x2x160xbf16>
    tpu.vector_store %arg6[%c0_11, %c0_12, %c0_13], %20 {strides = array<i32>} : memref<1x2x160xbf16, #tpu.memory_space<vmem>>, vector<1x2x160xbf16>,
    return
  }
  func.func @transform_0(%arg0: i32, %arg1: i32) -> (i32, i32, i32) {
    %c0_i32 = arith.constant 0 : i32
    %c0_i32_0 = arith.constant 0 : i32
    return %arg0, %arg1, %c0_i32 : i32, i32, i32
  }
  func.func @transform_1(%arg0: i32, %arg1: i32) -> (i32, i32, i32) {
    %c0_i32 = arith.constant 0 : i32
    %c0_i32_0 = arith.constant 0 : i32
    return %arg0, %arg1, %c0_i32 : i32, i32, i32
  }
  func.func @transform_2(%arg0: i32, %arg1: i32) -> (i32, i32) {
    %c0_i32 = arith.constant 0 : i32
    %c0_i32_0 = arith.constant 0 : i32
    %c0_i32_1 = arith.constant 0 : i32
    return %c0_i32, %c0_i32_0 : i32, i32
  }
  func.func @transform_3(%arg0: i32, %arg1: i32) -> (i32, i32, i32) {
    %c0_i32 = arith.constant 0 : i32
    %c0_i32_0 = arith.constant 0 : i32
    %c0_i32_1 = arith.constant 0 : i32
    return %arg0, %c0_i32, %c0_i32_0 : i32, i32, i32
  }
  func.func @transform_4(%arg0: i32, %arg1: i32) -> (i32, i32, i32) {
    %c0_i32 = arith.constant 0 : i32
    %c0_i32_0 = arith.constant 0 : i32
    return %arg0, %arg1, %c0_i32 : i32, i32, i32
  }
}

module attributes {stable_mosaic.version = 11 : i64} {
  func.func @_up_block_kernel(%arg0: i32, %arg1: i32, %arg2: memref<1x10x32xbf16, #tpu.memory_space<vmem>>, %arg3: memref<1x10x32xbf16, #tpu.memory_space<vmem>>, %arg4: memref<32x48xbf16, #tpu.memory_space<vmem>>, %arg5: memref<1x1x48xf32, #tpu.memory_space<vmem>>, %arg6: memref<1x10x48xbf16, #tpu.memory_space<vmem>>) attributes {dimension_semantics = [#tpu.dimension_semantics<parallel>, #tpu.dimension_semantics<parallel>], iteration_bounds = array<i64: 2, 1>, scalar_prefetch = 0 : i64, scratch_operands = 0 : i64, tpu.core_type = #tpu.core_type<tc>, window_params = [{transform_indices = @transform_0, window_bounds = array<i64: 1, 10, 32>}, {transform_indices = @transform_1, window_bounds = array<i64: 1, 10, 32>}, {pipeline_mode = #tpu.pipeline_mode<synchronous>, transform_indices = @transform_2, window_bounds = array<i64: 32, 48>}, {transform_indices = @transform_3, window_bounds = array<i64: 1, 1, 48>}, {transform_indices = @transform_4, window_bounds = array<i64: 1, 10, 48>}]} {
    %c0 = arith.constant 0 : index
    %c0_0 = arith.constant 0 : index
    %c0_1 = arith.constant 0 : index
    %0 = vector.load %arg2[%c0, %c0_0, %c0_1] : memref<1x10x32xbf16, #tpu.memory_space<vmem>>, vector<1x10x32xbf16>
    %1 = vector.shape_cast %0 : vector<1x10x32xbf16> to vector<10x32xbf16>
    %c0_2 = arith.constant 0 : index
    %c0_3 = arith.constant 0 : index
    %c0_4 = arith.constant 0 : index
    %2 = vector.load %arg3[%c0_2, %c0_3, %c0_4] : memref<1x10x32xbf16, #tpu.memory_space<vmem>>, vector<1x10x32xbf16>
    %3 = vector.shape_cast %2 : vector<1x10x32xbf16> to vector<10x32xbf16>
    %4 = arith.addf %1, %3 : vector<10x32xbf16>
    %c0_5 = arith.constant 0 : index
    %c0_6 = arith.constant 0 : index
    %5 = vector.load %arg4[%c0_5, %c0_6] : memref<32x48xbf16, #tpu.memory_space<vmem>>, vector<32x48xbf16>
    %cst = arith.constant dense<0.000000e+00> : vector<10x48xf32>
    %6 = tpu.matmul %4, %5, %cst {dimension_numbers = #tpu.dot_dimension_numbers<[1], [0], [0], [1], [0, 0, 1, 1], [], []>} : vector<10x32xbf16>, vector<32x48xbf16>, vector<10x48xf32> -> vector<10x48xf32>
    %c0_7 = arith.constant 0 : index
    %c0_8 = arith.constant 0 : index
    %c0_9 = arith.constant 0 : index
    %7 = vector.load %arg5[%c0_7, %c0_8, %c0_9] : memref<1x1x48xf32, #tpu.memory_space<vmem>>, vector<1x1x48xf32>
    %8 = vector.shape_cast %7 : vector<1x1x48xf32> to vector<1x48xf32>
    %9 = vector.broadcast %8 : vector<1x48xf32> to vector<10x48xf32>
    %10 = arith.addf %6, %9 : vector<10x48xf32>
    %11 = arith.negf %10 : vector<10x48xf32>
    %12 = math.exp %11 : vector<10x48xf32>
    %cst_10 = arith.constant 1.000000e+00 : f32
    %13 = vector.broadcast %cst_10 : f32 to vector<10x48xf32>
    %14 = arith.addf %13, %12 : vector<10x48xf32>
    %15 = arith.divf %13, %14 : vector<10x48xf32>
    %16 = arith.mulf %10, %15 : vector<10x48xf32>
    %17 = arith.truncf %16 : vector<10x48xf32> to vector<10x48xbf16>
    %c0_11 = arith.constant 0 : index
    %c0_12 = arith.constant 0 : index
    %c0_13 = arith.constant 0 : index
    %18 = vector.load %arg6[%c0_11, %c0_12, %c0_13] : memref<1x10x48xbf16, #tpu.memory_space<vmem>>, vector<1x10x48xbf16>
    %19 = vector.shape_cast %18 : vector<1x10x48xbf16> to vector<10x48xbf16>
    %20 = vector.shape_cast %17 : vector<10x48xbf16> to vector<1x10x48xbf16>
    tpu.vector_store %arg6[%c0_11, %c0_12, %c0_13], %20 {strides = array<i32>} : memref<1x10x48xbf16, #tpu.memory_space<vmem>>, vector<1x10x48xbf16>,
    return
  }
  func.func @transform_0(%arg0: i32, %arg1: i32) -> (i32, i32, i32) {
    %c0_i32 = arith.constant 0 : i32
    %c0_i32_0 = arith.constant 0 : i32
    return %arg0, %arg1, %c0_i32 : i32, i32, i32
  }
  func.func @transform_1(%arg0: i32, %arg1: i32) -> (i32, i32, i32) {
    %c0_i32 = arith.constant 0 : i32
    %c0_i32_0 = arith.constant 0 : i32
    return %arg0, %arg1, %c0_i32 : i32, i32, i32
  }
  func.func @transform_2(%arg0: i32, %arg1: i32) -> (i32, i32) {
    %c0_i32 = arith.constant 0 : i32
    %c0_i32_0 = arith.constant 0 : i32
    %c0_i32_1 = arith.constant 0 : i32
    return %c0_i32, %c0_i32_0 : i32, i32
  }
  func.func @transform_3(%arg0: i32, %arg1: i32) -> (i32, i32, i32) {
    %c0_i32 = arith.constant 0 : i32
    %c0_i32_0 = arith.constant 0 : i32
    %c0_i32_1 = arith.constant 0 : i32
    return %arg0, %c0_i32, %c0_i32_0 : i32, i32, i32
  }
  func.func @transform_4(%arg0: i32, %arg1: i32) -> (i32, i32, i32) {
    %c0_i32 = arith.constant 0 : i32
    %c0_i32_0 = arith.constant 0 : i32
    return %arg0, %arg1, %c0_i32 : i32, i32, i32
  }
}

module attributes {stable_mosaic.version = 11 : i64} {
  func.func @_up_block_kernel(%arg0: i32, %arg1: i32, %arg2: memref<1x30x16xbf16, #tpu.memory_space<vmem>>, %arg3: memref<1x30x16xbf16, #tpu.memory_space<vmem>>, %arg4: memref<16x48xbf16, #tpu.memory_space<vmem>>, %arg5: memref<1x1x48xf32, #tpu.memory_space<vmem>>, %arg6: memref<1x30x48xbf16, #tpu.memory_space<vmem>>) attributes {dimension_semantics = [#tpu.dimension_semantics<parallel>, #tpu.dimension_semantics<parallel>], iteration_bounds = array<i64: 2, 1>, scalar_prefetch = 0 : i64, scratch_operands = 0 : i64, tpu.core_type = #tpu.core_type<tc>, window_params = [{transform_indices = @transform_0, window_bounds = array<i64: 1, 30, 16>}, {transform_indices = @transform_1, window_bounds = array<i64: 1, 30, 16>}, {pipeline_mode = #tpu.pipeline_mode<synchronous>, transform_indices = @transform_2, window_bounds = array<i64: 16, 48>}, {transform_indices = @transform_3, window_bounds = array<i64: 1, 1, 48>}, {transform_indices = @transform_4, window_bounds = array<i64: 1, 30, 48>}]} {
    %c0 = arith.constant 0 : index
    %c0_0 = arith.constant 0 : index
    %c0_1 = arith.constant 0 : index
    %0 = vector.load %arg2[%c0, %c0_0, %c0_1] : memref<1x30x16xbf16, #tpu.memory_space<vmem>>, vector<1x30x16xbf16>
    %1 = vector.shape_cast %0 : vector<1x30x16xbf16> to vector<30x16xbf16>
    %c0_2 = arith.constant 0 : index
    %c0_3 = arith.constant 0 : index
    %c0_4 = arith.constant 0 : index
    %2 = vector.load %arg3[%c0_2, %c0_3, %c0_4] : memref<1x30x16xbf16, #tpu.memory_space<vmem>>, vector<1x30x16xbf16>
    %3 = vector.shape_cast %2 : vector<1x30x16xbf16> to vector<30x16xbf16>
    %4 = arith.addf %1, %3 : vector<30x16xbf16>
    %c0_5 = arith.constant 0 : index
    %c0_6 = arith.constant 0 : index
    %5 = vector.load %arg4[%c0_5, %c0_6] : memref<16x48xbf16, #tpu.memory_space<vmem>>, vector<16x48xbf16>
    %cst = arith.constant dense<0.000000e+00> : vector<30x48xf32>
    %6 = tpu.matmul %4, %5, %cst {dimension_numbers = #tpu.dot_dimension_numbers<[1], [0], [0], [1], [0, 0, 1, 1], [], []>} : vector<30x16xbf16>, vector<16x48xbf16>, vector<30x48xf32> -> vector<30x48xf32>
    %c0_7 = arith.constant 0 : index
    %c0_8 = arith.constant 0 : index
    %c0_9 = arith.constant 0 : index
    %7 = vector.load %arg5[%c0_7, %c0_8, %c0_9] : memref<1x1x48xf32, #tpu.memory_space<vmem>>, vector<1x1x48xf32>
    %8 = vector.shape_cast %7 : vector<1x1x48xf32> to vector<1x48xf32>
    %9 = vector.broadcast %8 : vector<1x48xf32> to vector<30x48xf32>
    %10 = arith.addf %6, %9 : vector<30x48xf32>
    %11 = arith.negf %10 : vector<30x48xf32>
    %12 = math.exp %11 : vector<30x48xf32>
    %cst_10 = arith.constant 1.000000e+00 : f32
    %13 = vector.broadcast %cst_10 : f32 to vector<30x48xf32>
    %14 = arith.addf %13, %12 : vector<30x48xf32>
    %15 = arith.divf %13, %14 : vector<30x48xf32>
    %16 = arith.mulf %10, %15 : vector<30x48xf32>
    %17 = arith.truncf %16 : vector<30x48xf32> to vector<30x48xbf16>
    %c0_11 = arith.constant 0 : index
    %c0_12 = arith.constant 0 : index
    %c0_13 = arith.constant 0 : index
    %18 = vector.load %arg6[%c0_11, %c0_12, %c0_13] : memref<1x30x48xbf16, #tpu.memory_space<vmem>>, vector<1x30x48xbf16>
    %19 = vector.shape_cast %18 : vector<1x30x48xbf16> to vector<30x48xbf16>
    %20 = vector.shape_cast %17 : vector<30x48xbf16> to vector<1x30x48xbf16>
    tpu.vector_store %arg6[%c0_11, %c0_12, %c0_13], %20 {strides = array<i32>} : memref<1x30x48xbf16, #tpu.memory_space<vmem>>, vector<1x30x48xbf16>,
    return
  }
  func.func @transform_0(%arg0: i32, %arg1: i32) -> (i32, i32, i32) {
    %c0_i32 = arith.constant 0 : i32
    %c0_i32_0 = arith.constant 0 : i32
    return %arg0, %arg1, %c0_i32 : i32, i32, i32
  }
  func.func @transform_1(%arg0: i32, %arg1: i32) -> (i32, i32, i32) {
    %c0_i32 = arith.constant 0 : i32
    %c0_i32_0 = arith.constant 0 : i32
    return %arg0, %arg1, %c0_i32 : i32, i32, i32
  }
  func.func @transform_2(%arg0: i32, %arg1: i32) -> (i32, i32) {
    %c0_i32 = arith.constant 0 : i32
    %c0_i32_0 = arith.constant 0 : i32
    %c0_i32_1 = arith.constant 0 : i32
    return %c0_i32, %c0_i32_0 : i32, i32
  }
  func.func @transform_3(%arg0: i32, %arg1: i32) -> (i32, i32, i32) {
    %c0_i32 = arith.constant 0 : i32
    %c0_i32_0 = arith.constant 0 : i32
    %c0_i32_1 = arith.constant 0 : i32
    return %arg0, %c0_i32, %c0_i32_0 : i32, i32, i32
  }
  func.func @transform_4(%arg0: i32, %arg1: i32) -> (i32, i32, i32) {
    %c0_i32 = arith.constant 0 : i32
    %c0_i32_0 = arith.constant 0 : i32
    return %arg0, %arg1, %c0_i32 : i32, i32, i32
  }
}

module attributes {stable_mosaic.version = 11 : i64} {
  func.func @_up_block_kernel(%arg0: i32, %arg1: i32, %arg2: memref<1x90x16xbf16, #tpu.memory_space<vmem>>, %arg3: memref<1x90x16xbf16, #tpu.memory_space<vmem>>, %arg4: memref<16x16xbf16, #tpu.memory_space<vmem>>, %arg5: memref<1x1x16xf32, #tpu.memory_space<vmem>>, %arg6: memref<1x90x16xbf16, #tpu.memory_space<vmem>>) attributes {dimension_semantics = [#tpu.dimension_semantics<parallel>, #tpu.dimension_semantics<parallel>], iteration_bounds = array<i64: 2, 1>, scalar_prefetch = 0 : i64, scratch_operands = 0 : i64, tpu.core_type = #tpu.core_type<tc>, window_params = [{transform_indices = @transform_0, window_bounds = array<i64: 1, 90, 16>}, {transform_indices = @transform_1, window_bounds = array<i64: 1, 90, 16>}, {pipeline_mode = #tpu.pipeline_mode<synchronous>, transform_indices = @transform_2, window_bounds = array<i64: 16, 16>}, {transform_indices = @transform_3, window_bounds = array<i64: 1, 1, 16>}, {transform_indices = @transform_4, window_bounds = array<i64: 1, 90, 16>}]} {
    %c0 = arith.constant 0 : index
    %c0_0 = arith.constant 0 : index
    %c0_1 = arith.constant 0 : index
    %0 = vector.load %arg2[%c0, %c0_0, %c0_1] : memref<1x90x16xbf16, #tpu.memory_space<vmem>>, vector<1x90x16xbf16>
    %1 = vector.shape_cast %0 : vector<1x90x16xbf16> to vector<90x16xbf16>
    %c0_2 = arith.constant 0 : index
    %c0_3 = arith.constant 0 : index
    %c0_4 = arith.constant 0 : index
    %2 = vector.load %arg3[%c0_2, %c0_3, %c0_4] : memref<1x90x16xbf16, #tpu.memory_space<vmem>>, vector<1x90x16xbf16>
    %3 = vector.shape_cast %2 : vector<1x90x16xbf16> to vector<90x16xbf16>
    %4 = arith.addf %1, %3 : vector<90x16xbf16>
    %c0_5 = arith.constant 0 : index
    %c0_6 = arith.constant 0 : index
    %5 = vector.load %arg4[%c0_5, %c0_6] : memref<16x16xbf16, #tpu.memory_space<vmem>>, vector<16x16xbf16>
    %cst = arith.constant dense<0.000000e+00> : vector<90x16xf32>
    %6 = tpu.matmul %4, %5, %cst {dimension_numbers = #tpu.dot_dimension_numbers<[1], [0], [0], [1], [0, 0, 1, 1], [], []>} : vector<90x16xbf16>, vector<16x16xbf16>, vector<90x16xf32> -> vector<90x16xf32>
    %c0_7 = arith.constant 0 : index
    %c0_8 = arith.constant 0 : index
    %c0_9 = arith.constant 0 : index
    %7 = vector.load %arg5[%c0_7, %c0_8, %c0_9] : memref<1x1x16xf32, #tpu.memory_space<vmem>>, vector<1x1x16xf32>
    %8 = vector.shape_cast %7 : vector<1x1x16xf32> to vector<1x16xf32>
    %9 = vector.broadcast %8 : vector<1x16xf32> to vector<90x16xf32>
    %10 = arith.addf %6, %9 : vector<90x16xf32>
    %11 = arith.negf %10 : vector<90x16xf32>
    %12 = math.exp %11 : vector<90x16xf32>
    %cst_10 = arith.constant 1.000000e+00 : f32
    %13 = vector.broadcast %cst_10 : f32 to vector<90x16xf32>
    %14 = arith.addf %13, %12 : vector<90x16xf32>
    %15 = arith.divf %13, %14 : vector<90x16xf32>
    %16 = arith.mulf %10, %15 : vector<90x16xf32>
    %17 = arith.truncf %16 : vector<90x16xf32> to vector<90x16xbf16>
    %c0_11 = arith.constant 0 : index
    %c0_12 = arith.constant 0 : index
    %c0_13 = arith.constant 0 : index
    %18 = vector.load %arg6[%c0_11, %c0_12, %c0_13] : memref<1x90x16xbf16, #tpu.memory_space<vmem>>, vector<1x90x16xbf16>
    %19 = vector.shape_cast %18 : vector<1x90x16xbf16> to vector<90x16xbf16>
    %20 = vector.shape_cast %17 : vector<90x16xbf16> to vector<1x90x16xbf16>
    tpu.vector_store %arg6[%c0_11, %c0_12, %c0_13], %20 {strides = array<i32>} : memref<1x90x16xbf16, #tpu.memory_space<vmem>>, vector<1x90x16xbf16>,
    return
  }
  func.func @transform_0(%arg0: i32, %arg1: i32) -> (i32, i32, i32) {
    %c0_i32 = arith.constant 0 : i32
    %c0_i32_0 = arith.constant 0 : i32
    return %arg0, %arg1, %c0_i32 : i32, i32, i32
  }
  func.func @transform_1(%arg0: i32, %arg1: i32) -> (i32, i32, i32) {
    %c0_i32 = arith.constant 0 : i32
    %c0_i32_0 = arith.constant 0 : i32
    return %arg0, %arg1, %c0_i32 : i32, i32, i32
  }
  func.func @transform_2(%arg0: i32, %arg1: i32) -> (i32, i32) {
    %c0_i32 = arith.constant 0 : i32
    %c0_i32_0 = arith.constant 0 : i32
    %c0_i32_1 = arith.constant 0 : i32
    return %c0_i32, %c0_i32_0 : i32, i32
  }
  func.func @transform_3(%arg0: i32, %arg1: i32) -> (i32, i32, i32) {
    %c0_i32 = arith.constant 0 : i32
    %c0_i32_0 = arith.constant 0 : i32
    %c0_i32_1 = arith.constant 0 : i32
    return %arg0, %c0_i32, %c0_i32_0 : i32, i32, i32
  }
  func.func @transform_4(%arg0: i32, %arg1: i32) -> (i32, i32, i32) {
    %c0_i32 = arith.constant 0 : i32
    %c0_i32_0 = arith.constant 0 : i32
    return %arg0, %arg1, %c0_i32 : i32, i32, i32
  }
}

module attributes {stable_mosaic.version = 11 : i64} {
  func.func @_up_block_kernel(%arg0: i32, %arg1: i32, %arg2: memref<1x180x8xbf16, #tpu.memory_space<vmem>>, %arg3: memref<1x180x8xbf16, #tpu.memory_space<vmem>>, %arg4: memref<8x2xbf16, #tpu.memory_space<vmem>>, %arg5: memref<1x1x2xf32, #tpu.memory_space<vmem>>, %arg6: memref<1x180x2xf32, #tpu.memory_space<vmem>>) attributes {dimension_semantics = [#tpu.dimension_semantics<parallel>, #tpu.dimension_semantics<parallel>], iteration_bounds = array<i64: 2, 1>, scalar_prefetch = 0 : i64, scratch_operands = 0 : i64, tpu.core_type = #tpu.core_type<tc>, window_params = [{transform_indices = @transform_0, window_bounds = array<i64: 1, 180, 8>}, {transform_indices = @transform_1, window_bounds = array<i64: 1, 180, 8>}, {pipeline_mode = #tpu.pipeline_mode<synchronous>, transform_indices = @transform_2, window_bounds = array<i64: 8, 2>}, {transform_indices = @transform_3, window_bounds = array<i64: 1, 1, 2>}, {transform_indices = @transform_4, window_bounds = array<i64: 1, 180, 2>}]} {
    %c0 = arith.constant 0 : index
    %c0_0 = arith.constant 0 : index
    %c0_1 = arith.constant 0 : index
    %0 = vector.load %arg2[%c0, %c0_0, %c0_1] : memref<1x180x8xbf16, #tpu.memory_space<vmem>>, vector<1x180x8xbf16>
    %1 = vector.shape_cast %0 : vector<1x180x8xbf16> to vector<180x8xbf16>
    %c0_2 = arith.constant 0 : index
    %c0_3 = arith.constant 0 : index
    %c0_4 = arith.constant 0 : index
    %2 = vector.load %arg3[%c0_2, %c0_3, %c0_4] : memref<1x180x8xbf16, #tpu.memory_space<vmem>>, vector<1x180x8xbf16>
    %3 = vector.shape_cast %2 : vector<1x180x8xbf16> to vector<180x8xbf16>
    %4 = arith.addf %1, %3 : vector<180x8xbf16>
    %c0_5 = arith.constant 0 : index
    %c0_6 = arith.constant 0 : index
    %5 = vector.load %arg4[%c0_5, %c0_6] : memref<8x2xbf16, #tpu.memory_space<vmem>>, vector<8x2xbf16>
    %cst = arith.constant dense<0.000000e+00> : vector<180x2xf32>
    %6 = tpu.matmul %4, %5, %cst {dimension_numbers = #tpu.dot_dimension_numbers<[1], [0], [0], [1], [0, 0, 1, 1], [], []>} : vector<180x8xbf16>, vector<8x2xbf16>, vector<180x2xf32> -> vector<180x2xf32>
    %c0_7 = arith.constant 0 : index
    %c0_8 = arith.constant 0 : index
    %c0_9 = arith.constant 0 : index
    %7 = vector.load %arg5[%c0_7, %c0_8, %c0_9] : memref<1x1x2xf32, #tpu.memory_space<vmem>>, vector<1x1x2xf32>
    %8 = vector.shape_cast %7 : vector<1x1x2xf32> to vector<1x2xf32>
    %9 = vector.broadcast %8 : vector<1x2xf32> to vector<180x2xf32>
    %10 = arith.addf %6, %9 : vector<180x2xf32>
    %11 = arith.negf %10 : vector<180x2xf32>
    %12 = math.exp %11 : vector<180x2xf32>
    %cst_10 = arith.constant 1.000000e+00 : f32
    %13 = vector.broadcast %cst_10 : f32 to vector<180x2xf32>
    %14 = arith.addf %13, %12 : vector<180x2xf32>
    %15 = arith.divf %13, %14 : vector<180x2xf32>
    %16 = arith.mulf %10, %15 : vector<180x2xf32>
    %c0_11 = arith.constant 0 : index
    %c0_12 = arith.constant 0 : index
    %c0_13 = arith.constant 0 : index
    %17 = vector.load %arg6[%c0_11, %c0_12, %c0_13] : memref<1x180x2xf32, #tpu.memory_space<vmem>>, vector<1x180x2xf32>
    %18 = vector.shape_cast %17 : vector<1x180x2xf32> to vector<180x2xf32>
    %19 = vector.shape_cast %16 : vector<180x2xf32> to vector<1x180x2xf32>
    tpu.vector_store %arg6[%c0_11, %c0_12, %c0_13], %19 {strides = array<i32>} : memref<1x180x2xf32, #tpu.memory_space<vmem>>, vector<1x180x2xf32>,
    return
  }
  func.func @transform_0(%arg0: i32, %arg1: i32) -> (i32, i32, i32) {
    %c0_i32 = arith.constant 0 : i32
    %c0_i32_0 = arith.constant 0 : i32
    return %arg0, %arg1, %c0_i32 : i32, i32, i32
  }
  func.func @transform_1(%arg0: i32, %arg1: i32) -> (i32, i32, i32) {
    %c0_i32 = arith.constant 0 : i32
    %c0_i32_0 = arith.constant 0 : i32
    return %arg0, %arg1, %c0_i32 : i32, i32, i32
  }
  func.func @transform_2(%arg0: i32, %arg1: i32) -> (i32, i32) {
    %c0_i32 = arith.constant 0 : i32
    %c0_i32_0 = arith.constant 0 : i32
    %c0_i32_1 = arith.constant 0 : i32
    return %c0_i32, %c0_i32_0 : i32, i32
  }
  func.func @transform_3(%arg0: i32, %arg1: i32) -> (i32, i32, i32) {
    %c0_i32 = arith.constant 0 : i32
    %c0_i32_0 = arith.constant 0 : i32
    %c0_i32_1 = arith.constant 0 : i32
    return %arg0, %c0_i32, %c0_i32_0 : i32, i32, i32
  }
  func.func @transform_4(%arg0: i32, %arg1: i32) -> (i32, i32, i32) {
    %c0_i32 = arith.constant 0 : i32
    %c0_i32_0 = arith.constant 0 : i32
    return %arg0, %arg1, %c0_i32 : i32, i32, i32
  }
}

</mosaic_0001>

<bundles_post_ra>
// kernel: dag_forward.12
= control target key start
LH: loop header
LB: loop body
LE: loop exit
PB: predicated region body
PF: predicated region fallthrough
CT: control target
= control target key end

     0   :  { %s830_s12 = smov 0   ;;  %s832_s13 = smov 0   ;;  %s950_s0 = inlined_call_operand.vmem [shape: bf16[2,90,16], index: 0, kind: input, shape index: {}]   ;;  %s951_s1 = inlined_call_operand.vmem [shape: bf16[16,16], index: 1, kind: input, shape index: {}]   ;;  %s952_s2 = inlined_call_operand.vmem [shape: f32[2,1,16], index: 2, kind: input, shape index: {}]   ;;  %s953_s3 = inlined_call_operand.vmem [shape: bf16[2,90,16], index: 3, kind: output, shape index: {}]  }
   0x1   :  { %s834_s14 = smov 0  }
   0x2 LB: > { %s25_s15 = sadd.s32 1, %s804_s13  ;;  %p628_p0 = scmp.ge.s32.totalorder %s808_s14, 1  ;;  %s808_s14 = sphi %s834_s14, %s13_s14   ;;  %s804_s13 = sphi %s832_s13, %s955_s13   ;;  %s800_s12 = sphi %s830_s12, %s954_s12  }
   0x3   : > { %p27_p1 = scmp.ge.s32.totalorder %s25_s15, 2  ;;  %p166_p2 = scmp.lt.s32.totalorder %s808_s14, 3 }
   0x5   : > { %s957_s15 = smov (%p27_p1, %s25_s15), 0  ;;  %p167_p3 = pnand %p628_p0, %p166_p2 }
   0x6   : > { %v731_v0 = vld [vmem:[%s951_s1] sm:$0xff] (!%p167_p3)   ;;  %p202_p4 = scmp.lt.s32.totalorder (!%p167_p3), %s800_s12, 1  ;;  %vm282_vm0 = vcmask (!%p167_p3), 130048   ;;  %vm514_vm1 = vcmask (!%p167_p3), 125952   ;;  %vm526_vm2 = vcmask (!%p167_p3), 122880  }
   0x7   : > { %170 = sbr.rel (%p167_p3) target bundleno = 276 (0x114), region = 32  ;;  %690 = vmatprep.subr.bf16.mxu0 (!%p167_p3), %v731_v0  ;;  %704 = vmatprep.subr.bf16.mxu1 (!%p167_p3), %v731_v0 }
   0x8   : > { %691 = vmatpush3.bf16.msra.mxu0 (!%p167_p3), %v731_v0  ;;  %705 = vmatpush3.bf16.msra.mxu1 (!%p167_p3), %v731_v0 }
   0xe   : > { %s959_s12 = smov (!%p202_p4, %s800_s12), 1 }
   0xf   : > { %s706_s18 = smul.u32 48, %s959_s12  ;;  %s213_s24 = scalar_lea.vmem %s952_s2, %s959_s12 }
  0x10   : > { %v631_v7 = vld [vmem:[%s213_s24] ss:$0 sm:$0xff] }
  0x11   : > { %s209_s21 = scalar_lea.vmem %s950_s0, %s706_s18  ;;  %s905_s27 = scalar_lea.vmem %s953_s3, %s706_s18 }
  0x12   : > { %v732_v1 = vld [vmem:[%s209_s21] sm:$0xff]   ;;  %v733_v2 = vld [vmem:[%s209_s21 + $0x10] sm:$0xff]   ;;  %v734_v3 = vld [vmem:[%s209_s21 + $0x8] sm:$0xff]  }
  0x13   : > { %692 = vmatprep.mubr.msk.bf16.mxu0 %vm282_vm0, %v732_v1  ;;  %696 = vmatprep.mubr.msk.bf16.mxu1 %vm282_vm0, %v733_v2  ;;  %v735_v4 = vld [vmem:[%s209_s21 + $0x18] sm:$0xff]   ;;  %v736_v5 = vld [vmem:[%s209_s21 + $0x20] sm:$0xff]   ;;  %v737_v6 = vld [vmem:[%s209_s21 + $0x28] sm:$0x1f]  }
  0x14   : > { %693 = vmatmul.mubr.msk.bf16.vlgmr.msra.gmra.mrb[0].mxu0 %vm282_vm0, %v734_v3  ;;  %697 = vmatmul.mubr.msk.bf16.vlgmr.msra.gmra.mrb[0].mxu1 %vm282_vm0, %v735_v4 }
  0x15   : > { %700 = vmatprep.mubr.msk.bf16.mxu1 %vm282_vm0, %v736_v5 }
  0x1c   : > { %701 = vmatmul.mubr.msk.bf16.gmra.mrb[4].mxu1 %vm282_vm0, %v737_v6 }
  0xe7   : > { %v694_v8 = vpop.f32.mrb[0].mxu0  ;;  %v698_v10 = vpop.f32.mrb[0].mxu1 }
  0xe8   : > { %v863_v9 = vadd.f32 %v694_v8, %v631_v7  ;;  %v335_v11 = vpop.f32.mrb[1].mxu0  ;;  %v865_v12 = vadd.f32 %v698_v10, %v631_v7  ;;  %v351_v14 = vpop.f32.mrb[1].mxu1 }
  0xe9   : > { %v867_v13 = vadd.f32 %v631_v7, %v335_v11  ;;  %v695_v15 = vpop.f32.mrb[2].mxu0  ;;  %v870_v17 = vadd.f32 %v631_v7, %v351_v14  ;;  %v699_v19 = vpop.f32.mrb[2].mxu1 }
  0xea   : > { %v647_v16 = vmul.f32 -1.442695, %v863_v9  ;;  %v872_v18 = vadd.f32 %v695_v15, %v631_v7  ;;  %v338_v20 = vpop.f32.mrb[3].mxu0  ;;  %v651_v21 = vmul.f32 -1.442695, %v865_v12  ;;  %v876_v23 = vadd.f32 %v699_v19, %v631_v7  ;;  %v354_v25 = vpop.f32.mrb[3].mxu1 }
  0xeb   : > { %v645_v22 = vmul.f32 -1.442695, %v867_v13  ;;  %v878_v24 = vadd.f32 %v631_v7, %v338_v20  ;;  %v649_v26 = vmul.f32 -1.442695, %v870_v17  ;;  %v882_v28 = vadd.f32 %v631_v7, %v354_v25 }
  0xec   : > { %738 = vpow2.f32 %v647_v16  ;;  %v648_v27 = vmul.f32 -1.442695, %v872_v18  ;;  %v652_v29 = vmul.f32 -1.442695, %v876_v23 }
  0xed   : > { %740 = vpow2.f32 %v651_v21  ;;  %v646_v30 = vmul.f32 -1.442695, %v878_v24  ;;  %v650_v31 = vmul.f32 -1.442695, %v882_v28 }
  0xee   : > { %742 = vpow2.f32 %v645_v22 }
  0xef   : > { %744 = vpow2.f32 %v649_v26  ;;  %v702_v32 = vpop.f32.mrb[4].mxu1 }
  0xf0   : > { %746 = vpow2.f32 %v648_v27  ;;  %v887_v33 = vadd.f32 %v702_v32, %v631_v7  ;;  %v367_v34 = vpop.f32.mrb[5].mxu1 }
  0xf1   : > { %748 = vpow2.f32 %v652_v29  ;;  %v889_v35 = vadd.f32 %v631_v7, %v367_v34  ;;  %v703_v36 = vpop.f32.mrb[6].mxu1 }
  0xf2   : > { %750 = vpow2.f32 %v646_v30  ;;  %v655_v37 = vmul.f32 -1.442695, %v887_v33  ;;  %v892_v38 = vadd.f32 %v703_v36, %v631_v7  ;;  %v370_v39 = vpop.f32.mrb[7].mxu1 }
  0xf3   : > { %752 = vpow2.f32 %v650_v31  ;;  %v653_v40 = vmul.f32 -1.442695, %v889_v35  ;;  %v895_v41 = vadd.f32 %v631_v7, %v370_v39 }
  0xf4   : > { %754 = vpow2.f32 %v655_v37  ;;  %v656_v42 = vmul.f32 -1.442695, %v892_v38 }
  0xf5   : > { %756 = vpow2.f32 %v653_v40  ;;  %v654_v44 = vmul.f32 -1.442695, %v895_v41 }
  0xf6   : > { %v739_v43 = vpop.eup %738  ;;  %758 = vpow2.f32 %v656_v42 }
  0xf7   : > { %v741_v45 = vpop.eup %740  ;;  %v420_v46 = vadd.f32 1.0, %v739_v43  ;;  %760 = vpow2.f32 %v654_v44 }
  0xf8   : > { %v743_v47 = vpop.eup %742  ;;  %v424_v48 = vadd.f32 1.0, %v741_v45 }
  0xf9   : > { %v745_v49 = vpop.eup %744  ;;  %762 = vrcp.f32 %v420_v46  ;;  %v418_v50 = vadd.f32 1.0, %v743_v47 }
  0xfa   : > { %v747_v51 = vpop.eup %746  ;;  %764 = vrcp.f32 %v424_v48  ;;  %v422_v52 = vadd.f32 1.0, %v745_v49 }
  0xfb   : > { %v749_v53 = vpop.eup %748  ;;  %766 = vrcp.f32 %v418_v50  ;;  %v421_v54 = vadd.f32 1.0, %v747_v51 }
  0xfc   : > { %v751_v55 = vpop.eup %750  ;;  %768 = vrcp.f32 %v422_v52  ;;  %v425_v56 = vadd.f32 1.0, %v749_v53 }
  0xfd   : > { %v753_v57 = vpop.eup %752  ;;  %770 = vrcp.f32 %v421_v54  ;;  %v419_v58 = vadd.f32 1.0, %v751_v55 }
  0xfe   : > { %772 = vrcp.f32 %v425_v56  ;;  %v423_v59 = vadd.f32 1.0, %v753_v57  ;;  %v755_v60 = vpop.eup %754 }
  0xff   : > { %774 = vrcp.f32 %v419_v58  ;;  %v757_v61 = vpop.eup %756  ;;  %v428_v62 = vadd.f32 1.0, %v755_v60 }
 0x100   : > { %776 = vrcp.f32 %v423_v59  ;;  %v759_v63 = vpop.eup %758  ;;  %v426_v0 = vadd.f32 1.0, %v757_v61 }
 0x101   : > { %v761_v1 = vpop.eup %760  ;;  %778 = vrcp.f32 %v428_v62  ;;  %v429_v2 = vadd.f32 1.0, %v759_v63 }
 0x102   : > { %780 = vrcp.f32 %v426_v0  ;;  %v427_v4 = vadd.f32 1.0, %v761_v1 }
 0x103   : > { %v763_v3 = vpop.eup %762  ;;  %782 = vrcp.f32 %v429_v2 }
 0x104   : > { %v765_v5 = vpop.eup %764  ;;  %v456_v6 = vmul.f32 %v763_v3, %v863_v9  ;;  %784 = vrcp.f32 %v427_v4 }
 0x105   : > { %v767_v7 = vpop.eup %766  ;;  %v460_v8 = vmul.f32 %v765_v5, %v865_v12 }
 0x106   : > { %v769_v10 = vpop.eup %768  ;;  %v673_v11 = vpack.c.bf16 %v456_v6, %v456_v6  ;;  %v454_v14 = vmul.f32 %v767_v7, %v867_v13 }
 0x107   : > { %v771_v9 = vpop.eup %770  ;;  %v677_v15 = vpack.c.bf16 %v460_v8, %v460_v8  ;;  %v458_v16 = vmul.f32 %v769_v10, %v870_v17 }
 0x108   : > { %v773_v19 = vpop.eup %772  ;;  %517 = vst.msk [vmem:[%s905_s27 + $0x8] sm:$0xf] %vm514_vm1, %v673_v11  ;;  %v671_v20 = vpack.c.bf16 %v454_v14, %v454_v14  ;;  %v457_v21 = vmul.f32 %v771_v9, %v872_v18 }
 0x109   : > { %v775_v12 = vpop.eup %774  ;;  %521 = vst.msk [vmem:[%s905_s27 + $0x18] sm:$0xf] %vm514_vm1, %v677_v15  ;;  %v675_v22 = vpack.c.bf16 %v458_v16, %v458_v16  ;;  %v461_v25 = vmul.f32 %v773_v19, %v876_v23 }
 0x10a   : > { %v777_v13 = vpop.eup %776  ;;  %515 = vst.msk [vmem:[%s905_s27] sm:$0xf] %vm514_vm1, %v671_v20  ;;  %v674_v26 = vpack.c.bf16 %v457_v21, %v457_v21  ;;  %v455_v17 = vmul.f32 %v775_v12, %v878_v24 }
 0x10b   : > { %519 = vst.msk [vmem:[%s905_s27 + $0x10] sm:$0xf] %vm514_vm1, %v675_v22  ;;  %v678_v27 = vpack.c.bf16 %v461_v25, %v461_v25  ;;  %v459_v18 = vmul.f32 %v777_v13, %v882_v28  ;;  %v779_v29 = vpop.eup %778 }
 0x10c   : > { %518 = vst.msk [vmem:[%s905_s27 + $0xc] sm:$0xf] %vm514_vm1, %v674_v26  ;;  %v672_v30 = vpack.c.bf16 %v455_v17, %v455_v17  ;;  %v781_v31 = vpop.eup %780  ;;  %v464_v32 = vmul.f32 %v779_v29, %v887_v33 }
 0x10d   : > { %522 = vst.msk [vmem:[%s905_s27 + $0x1c] sm:$0xf] %vm514_vm1, %v678_v27  ;;  %v676_v23 = vpack.c.bf16 %v459_v18, %v459_v18  ;;  %v783_v24 = vpop.eup %782  ;;  %v462_v34 = vmul.f32 %v781_v31, %v889_v35 }
 0x10e   : > { %516 = vst.msk [vmem:[%s905_s27 + $0x4] sm:$0xf] %vm514_vm1, %v672_v30  ;;  %v785_v28 = vpop.eup %784  ;;  %v681_v36 = vpack.c.bf16 %v464_v32, %v464_v32  ;;  %v465_v37 = vmul.f32 %v783_v24, %v892_v38 }
 0x10f   : > { %520 = vst.msk [vmem:[%s905_s27 + $0x14] sm:$0xf] %vm514_vm1, %v676_v23  ;;  %v679_v39 = vpack.c.bf16 %v462_v34, %v462_v34  ;;  %v463_v40 = vmul.f32 %v785_v28, %v895_v41 }
 0x110   : > { %525 = vst.msk [vmem:[%s905_s27 + $0x28] sm:$0xf] %vm514_vm1, %v681_v36  ;;  %v682_v42 = vpack.c.bf16 %v465_v37, %v465_v37 }
 0x111   : > { %523 = vst.msk [vmem:[%s905_s27 + $0x20] sm:$0xf] %vm514_vm1, %v679_v39  ;;  %v680_v33 = vpack.c.bf16 %v463_v40, %v463_v40 }
 0x112   : > { %527 = vst.msk [vmem:[%s905_s27 + $0x2c] sm:$0x1] %vm526_vm2, %v682_v42 }
 0x113   : > { %524 = vst.msk [vmem:[%s905_s27 + $0x24] sm:$0xf] %vm514_vm1, %v680_v33 }
 0x114 PF: > { %s13_s14 = sadd.s32 1, %s808_s14   ;;  %s954_s12 = smov %s804_s13 }
 0x115   : > { %p10_p5 = scmp.ge.s32.totalorder %s13_s14, 4   ;;  %s955_s13 = smov %s957_s15 }
 0x117   :  { %12 = sbr.rel (!%p10_p5) target bundleno = 2 (0x2), region = 65 }

// kernel: dag_forward.13
= control target key start
LH: loop header
LB: loop body
LE: loop exit
PB: predicated region body
PF: predicated region fallthrough
CT: control target
= control target key end

     0   :  { %s609_s12 = smov 0   ;;  %s611_s13 = smov 0   ;;  %s662_s0 = inlined_call_operand.vmem [shape: bf16[2,30,48], index: 0, kind: input, shape index: {}]   ;;  %s663_s1 = inlined_call_operand.vmem [shape: bf16[48,16], index: 1, kind: input, shape index: {}]   ;;  %s664_s2 = inlined_call_operand.vmem [shape: f32[2,1,16], index: 2, kind: input, shape index: {}]   ;;  %s665_s3 = inlined_call_operand.vmem [shape: bf16[2,30,16], index: 3, kind: output, shape index: {}]  }
   0x1   :  { %s613_s14 = smov 0  }
   0x2 LB: > { %s25_s15 = sadd.s32 1, %s583_s13  ;;  %p476_p0 = scmp.ge.s32.totalorder %s587_s14, 1  ;;  %s587_s14 = sphi %s613_s14, %s13_s14   ;;  %s583_s13 = sphi %s611_s13, %s667_s13   ;;  %s579_s12 = sphi %s609_s12, %s666_s12  }
   0x3   : > { %p27_p1 = scmp.ge.s32.totalorder %s25_s15, 2  ;;  %p166_p2 = scmp.lt.s32.totalorder %s587_s14, 3 }
   0x5   : > { %s669_s15 = smov (%p27_p1, %s25_s15), 0  ;;  %p167_p3 = pnand %p476_p0, %p166_p2 }
   0x6   : > { %v544_v0 = vld [vmem:[%s663_s1] sm:$0xff] (!%p167_p3)   ;;  %p202_p4 = scmp.lt.s32.totalorder (!%p167_p3), %s579_s12, 1  ;;  %v545_v1 = vld [vmem:[%s663_s1 + $0x8] sm:$0xff] (!%p167_p3)   ;;  %v546_v2 = vld [vmem:[%s663_s1 + $0x10] sm:$0xff] (!%p167_p3)   ;;  %vm270_vm0 = vcmask (!%p167_p3), 392192   ;;  %vm370_vm1 = vcmask (!%p167_p3), 125952  }
   0x7   : > { %170 = sbr.rel (%p167_p3) target bundleno = 267 (0x10b), region = 32  ;;  %510 = vmatprep.subr.bf16.mxu0 (!%p167_p3), %v544_v0  ;;  %vm374_vm2 = vcmask (!%p167_p3), 124928  }
   0x8   : > { %511 = vmatpush3.bf16.msra.mxu0 (!%p167_p3), %v544_v0 }
   0x9   : > { %512 = vmatprep.subr.bf16.mxu0 (!%p167_p3), %v545_v1 }
   0xc   : > { %513 = vmatpush3.bf16.msra.mxu0 (!%p167_p3), %v545_v1 }
   0xd   : > { %514 = vmatprep.subr.bf16.mxu0 (!%p167_p3), %v546_v2 }
   0xe   : > { %s671_s12 = smov (!%p202_p4, %s579_s12), 1 }
   0xf   : > { %s499_s22 = sshll.u32 %s671_s12, 4  ;;  %s213_s28 = scalar_lea.vmem %s664_s2, %s671_s12 }
  0x10   : > { %s209_s25 = scalar_lea.vmem %s662_s0, %s499_s22  ;;  %515 = vmatpush3.bf16.msra.mxu0 %v546_v2  ;;  %v481_v5 = vld [vmem:[%s213_s28] ss:$0 sm:$0xff]  ;;  %s222_s4 = scalar_lea.vmem %s665_s3, %s499_s22 }
  0x11   : > { %v547_v3 = vld [vmem:[%s209_s25] sm:$0xff]   ;;  %v548_v4 = vld [vmem:[%s209_s25 + $0x8] sm:$0x7f]  }
  0x12   : > { %516 = vmatprep.mubr.msk.bf16.mxu0 %vm270_vm0, %v547_v3 }
  0x13   : > { %517 = vmatmul.mubr.msk.bf16.vlgmr.msra.gmra.mrb[0].mxu0 %vm270_vm0, %v548_v4 }
  0xe6   : > { %v518_v6 = vpop.f32.mrb[0].mxu0 }
  0xe7   : > { %v320_v7 = vadd.f32 %v518_v6, %v481_v5  ;;  %v311_v8 = vpop.f32.mrb[1].mxu0 }
  0xe8   : > { %v312_v9 = vadd.f32 %v481_v5, %v311_v8  ;;  %v519_v10 = vpop.f32.mrb[2].mxu0 }
  0xe9   : > { %v491_v11 = vmul.f32 -1.442695, %v320_v7  ;;  %v323_v12 = vadd.f32 %v519_v10, %v481_v5  ;;  %v314_v13 = vpop.f32.mrb[3].mxu0 }
  0xea   : > { %v489_v14 = vmul.f32 -1.442695, %v312_v9  ;;  %v315_v15 = vadd.f32 %v481_v5, %v314_v13 }
  0xeb   : > { %549 = vpow2.f32 %v491_v11  ;;  %v492_v16 = vmul.f32 -1.442695, %v323_v12 }
  0xec   : > { %551 = vpow2.f32 %v489_v14  ;;  %v490_v17 = vmul.f32 -1.442695, %v315_v15 }
  0xed   : > { %553 = vpow2.f32 %v492_v16 }
  0xee   : > { %555 = vpow2.f32 %v490_v17 }
  0xf5   : > { %v550_v18 = vpop.eup %549 }
  0xf6   : > { %v552_v19 = vpop.eup %551  ;;  %v340_v20 = vadd.f32 1.0, %v550_v18 }
  0xf7   : > { %v554_v21 = vpop.eup %553  ;;  %v338_v22 = vadd.f32 1.0, %v552_v19 }
  0xf8   : > { %v556_v23 = vpop.eup %555  ;;  %557 = vrcp.f32 %v340_v20  ;;  %v341_v24 = vadd.f32 1.0, %v554_v21 }
  0xf9   : > { %559 = vrcp.f32 %v338_v22  ;;  %v339_v25 = vadd.f32 1.0, %v556_v23 }
  0xfa   : > { %561 = vrcp.f32 %v341_v24 }
  0xfb   : > { %563 = vrcp.f32 %v339_v25 }
 0x102   : > { %v558_v26 = vpop.eup %557 }
 0x103   : > { %v560_v27 = vpop.eup %559  ;;  %v352_v28 = vmul.f32 %v558_v26, %v320_v7 }
 0x104   : > { %v562_v29 = vpop.eup %561  ;;  %v350_v30 = vmul.f32 %v560_v27, %v312_v9 }
 0x105   : > { %v564_v31 = vpop.eup %563  ;;  %v503_v32 = vpack.c.bf16 %v352_v28, %v352_v28  ;;  %v353_v33 = vmul.f32 %v562_v29, %v323_v12 }
 0x106   : > { %v501_v34 = vpack.c.bf16 %v350_v30, %v350_v30  ;;  %v351_v35 = vmul.f32 %v564_v31, %v315_v15 }
 0x107   : > { %373 = vst.msk [vmem:[%s222_s4 + $0x8] sm:$0xf] %vm370_vm1, %v503_v32  ;;  %v504_v36 = vpack.c.bf16 %v353_v33, %v353_v33 }
 0x108   : > { %371 = vst.msk [vmem:[%s222_s4] sm:$0xf] %vm370_vm1, %v501_v34  ;;  %v502_v37 = vpack.c.bf16 %v351_v35, %v351_v35 }
 0x109   : > { %375 = vst.msk [vmem:[%s222_s4 + $0xc] sm:$0x7] %vm374_vm2, %v504_v36 }
 0x10a   : > { %372 = vst.msk [vmem:[%s222_s4 + $0x4] sm:$0xf] %vm370_vm1, %v502_v37 }
 0x10b PF: > { %s13_s14 = sadd.s32 1, %s587_s14   ;;  %s666_s12 = smov %s583_s13 }
 0x10c   : > { %p10_p5 = scmp.ge.s32.totalorder %s13_s14, 4   ;;  %s667_s13 = smov %s669_s15 }
 0x10e   :  { %12 = sbr.rel (!%p10_p5) target bundleno = 2 (0x2), region = 65 }

// kernel: dag_forward.11
= control target key start
LH: loop header
LB: loop body
LE: loop exit
PB: predicated region body
PF: predicated region fallthrough
CT: control target
= control target key end

     0   :  { %s1177_s12 = smov 0   ;;  %s1179_s13 = smov 0   ;;  %s1400_s0 = inlined_call_operand.vmem [shape: bf16[2,180,2], index: 0, kind: input, shape index: {}]   ;;  %s1401_s1 = inlined_call_operand.vmem [shape: bf16[2,8], index: 1, kind: input, shape index: {}]   ;;  %s1402_s2 = inlined_call_operand.vmem [shape: f32[2,1,8], index: 2, kind: input, shape index: {}]   ;;  %s1403_s3 = inlined_call_operand.vmem [shape: bf16[2,180,8], index: 3, kind: output, shape index: {}]  }
   0x1   :  { %s1181_s14 = smov 0  }
   0x2 LB: > { %s25_s15 = sadd.s32 1, %s1151_s13  ;;  %p862_p0 = scmp.ge.s32.totalorder %s1155_s14, 1  ;;  %s1155_s14 = sphi %s1181_s14, %s13_s14   ;;  %s1151_s13 = sphi %s1179_s13, %s1405_s13   ;;  %s1147_s12 = sphi %s1177_s12, %s1404_s12  }
   0x3   : > { %p27_p1 = scmp.ge.s32.totalorder %s25_s15, 2  ;;  %p166_p2 = scmp.lt.s32.totalorder %s1155_s14, 3 }
   0x5   : > { %s1407_s15 = smov (%p27_p1, %s25_s15), 0  ;;  %p167_p3 = pnand %p862_p0, %p166_p2 }
   0x6   : > { %v248_v0 = vld [vmem:[%s1401_s1] sm:$0x1] (!%p167_p3)  ;;  %vm351_vm0 = vcmask (!%p167_p3), 1040384   ;;  %p202_p4 = scmp.lt.s32.totalorder (!%p167_p3), %s1147_s12, 1  ;;  %vm314_vm1 = vcmask (!%p167_p3), 15360   ;;  %vm737_vm2 = vcmask (!%p167_p3), 60416  }
   0x7   : > { %170 = sbr.rel (%p167_p3) target bundleno = 301 (0x12d), region = 32  ;;  %1002 = vmatprep.subr.msk.bf16.mxu0 (!%p167_p3), %vm351_vm0, %v248_v0  ;;  %1003 = vmatprep.subr.msk.bf16.mxu1 (!%p167_p3), %vm351_vm0, %v248_v0  ;;  %v353_v1 = vsel (!%p167_p3), %vm351_vm0, %v248_v0, 0  ;;  %vm760_vm3 = vcmask (!%p167_p3), 58368  }
   0x8   : > { %975 = vmatpush3.bf16.msra.mxu0 (!%p167_p3), %v353_v1  ;;  %1001 = vmatpush3.bf16.msra.mxu1 (!%p167_p3), %v353_v1 }
   0xe   : > { %s1409_s12 = smov (!%p202_p4, %s1147_s12), 1 }
   0xf   : > { %s1004_s18 = smul.u32 92, %s1409_s12  ;;  %s213_s24 = scalar_lea.vmem %s1402_s2, %s1409_s12 }
  0x10   : > { %v1222_v14 = vld [vmem:[%s213_s24] ss:$0 sm:$0xff] }
  0x11   : > { %s209_s21 = scalar_lea.vmem %s1400_s0, %s1004_s18  ;;  %s1315_s27 = scalar_lea.vmem %s1403_s3, %s1004_s18 }
  0x12   : > { %v1029_v2 = vld [vmem:[%s209_s21] sm:$0xff]   ;;  %v1030_v3 = vld [vmem:[%s209_s21 + $0x30] sm:$0xff]   ;;  %v1031_v4 = vld [vmem:[%s209_s21 + $0x8] sm:$0xff]  }
  0x13   : > { %976 = vmatprep.mubr.msk.bf16.mxu0 %vm314_vm1, %v1029_v2  ;;  %988 = vmatprep.mubr.msk.bf16.mxu1 %vm314_vm1, %v1030_v3  ;;  %v1032_v5 = vld [vmem:[%s209_s21 + $0x38] sm:$0xff]   ;;  %v1033_v6 = vld [vmem:[%s209_s21 + $0x10] sm:$0xff]   ;;  %v1034_v7 = vld [vmem:[%s209_s21 + $0x40] sm:$0xff]  }
  0x14   : > { %977 = vmatmul.mubr.msk.bf16.vlgmr.msra.gmra.mrb[0].mxu0 %vm314_vm1, %v1031_v4  ;;  %989 = vmatmul.mubr.msk.bf16.vlgmr.msra.gmra.mrb[0].mxu1 %vm314_vm1, %v1032_v5  ;;  %v1035_v8 = vld [vmem:[%s209_s21 + $0x18] sm:$0xff]   ;;  %v1036_v9 = vld [vmem:[%s209_s21 + $0x48] sm:$0xff]   ;;  %v1037_v10 = vld [vmem:[%s209_s21 + $0x20] sm:$0xff]  }
  0x15   : > { %980 = vmatprep.mubr.msk.bf16.mxu0 %vm314_vm1, %v1033_v6  ;;  %992 = vmatprep.mubr.msk.bf16.mxu1 %vm314_vm1, %v1034_v7  ;;  %v1038_v11 = vld [vmem:[%s209_s21 + $0x50] sm:$0xff]   ;;  %v1039_v12 = vld [vmem:[%s209_s21 + $0x28] sm:$0xff]   ;;  %v1040_v13 = vld [vmem:[%s209_s21 + $0x58] ss:$0 sps:$4 sm:$0x33]  }
  0x1c   : > { %981 = vmatmul.mubr.msk.bf16.gmra.mrb[4].mxu0 %vm314_vm1, %v1035_v8  ;;  %993 = vmatmul.mubr.msk.bf16.gmra.mrb[4].mxu1 %vm314_vm1, %v1036_v9 }
  0x1d   : > { %984 = vmatprep.mubr.msk.bf16.mxu0 %vm314_vm1, %v1037_v10  ;;  %996 = vmatprep.mubr.msk.bf16.mxu1 %vm314_vm1, %v1038_v11 }
  0x24   : > { %985 = vmatmul.mubr.msk.bf16.gmra.mrb[8].mxu0 %vm314_vm1, %v1039_v12  ;;  %997 = vmatmul.mubr.msk.bf16.gmra.mrb[8].mxu1 %vm314_vm1, %v1040_v13 }
  0xe7   : > { %v978_v15 = vpop.f32.mrb[0].mxu0  ;;  %v990_v17 = vpop.f32.mrb[0].mxu1 }
  0xe8   : > { %v1225_v16 = vadd.f32 %v978_v15, %v1222_v14  ;;  %v389_v18 = vpop.f32.mrb[1].mxu0  ;;  %v1228_v19 = vadd.f32 %v990_v17, %v1222_v14  ;;  %v437_v21 = vpop.f32.mrb[1].mxu1 }
  0xe9   : > { %v1231_v20 = vadd.f32 %v1222_v14, %v389_v18  ;;  %v979_v22 = vpop.f32.mrb[2].mxu0  ;;  %v1235_v24 = vadd.f32 %v1222_v14, %v437_v21  ;;  %v991_v26 = vpop.f32.mrb[2].mxu1 }
  0xea   : > { %v892_v23 = vmul.f32 -1.442695, %v1225_v16  ;;  %v1238_v25 = vadd.f32 %v979_v22, %v1222_v14  ;;  %v392_v27 = vpop.f32.mrb[3].mxu0  ;;  %v904_v28 = vmul.f32 -1.442695, %v1228_v19  ;;  %v1243_v30 = vadd.f32 %v991_v26, %v1222_v14  ;;  %v440_v32 = vpop.f32.mrb[3].mxu1 }
  0xeb   : > { %v890_v29 = vmul.f32 -1.442695, %v1231_v20  ;;  %v1246_v31 = vadd.f32 %v1222_v14, %v392_v27  ;;  %v902_v33 = vmul.f32 -1.442695, %v1235_v24  ;;  %v1251_v35 = vadd.f32 %v1222_v14, %v440_v32 }
  0xec   : > { %1041 = vpow2.f32 %v892_v23  ;;  %v893_v34 = vmul.f32 -1.442695, %v1238_v25  ;;  %v905_v36 = vmul.f32 -1.442695, %v1243_v30 }
  0xed   : > { %1043 = vpow2.f32 %v904_v28  ;;  %v891_v37 = vmul.f32 -1.442695, %v1246_v31  ;;  %v903_v38 = vmul.f32 -1.442695, %v1251_v35 }
  0xee   : > { %1045 = vpow2.f32 %v890_v29 }
  0xef   : > { %1047 = vpow2.f32 %v902_v33  ;;  %v982_v39 = vpop.f32.mrb[4].mxu0  ;;  %v994_v41 = vpop.f32.mrb[4].mxu1 }
  0xf0   : > { %1049 = vpow2.f32 %v893_v34  ;;  %v1257_v40 = vadd.f32 %v982_v39, %v1222_v14  ;;  %v405_v42 = vpop.f32.mrb[5].mxu0  ;;  %v1260_v43 = vadd.f32 %v994_v41, %v1222_v14  ;;  %v453_v45 = vpop.f32.mrb[5].mxu1 }
  0xf1   : > { %1051 = vpow2.f32 %v905_v36  ;;  %v1263_v44 = vadd.f32 %v1222_v14, %v405_v42  ;;  %v983_v46 = vpop.f32.mrb[6].mxu0  ;;  %v1267_v48 = vadd.f32 %v1222_v14, %v453_v45  ;;  %v995_v50 = vpop.f32.mrb[6].mxu1 }
  0xf2   : > { %1053 = vpow2.f32 %v891_v37  ;;  %v896_v47 = vmul.f32 -1.442695, %v1257_v40  ;;  %v1270_v49 = vadd.f32 %v983_v46, %v1222_v14  ;;  %v408_v51 = vpop.f32.mrb[7].mxu0  ;;  %v908_v52 = vmul.f32 -1.442695, %v1260_v43  ;;  %v456_v55 = vpop.f32.mrb[7].mxu1 }
  0xf3   : > { %1055 = vpow2.f32 %v903_v38  ;;  %v894_v53 = vmul.f32 -1.442695, %v1263_v44  ;;  %v1275_v54 = vadd.f32 %v995_v50, %v1222_v14  ;;  %v906_v56 = vmul.f32 -1.442695, %v1267_v48 }
  0xf4   : > { %1057 = vpow2.f32 %v896_v47  ;;  %v897_v57 = vmul.f32 -1.442695, %v1270_v49  ;;  %v1280_v58 = vadd.f32 %v1222_v14, %v408_v51  ;;  %v1283_v59 = vadd.f32 %v1222_v14, %v456_v55 }
  0xf5   : > { %1059 = vpow2.f32 %v908_v52  ;;  %v909_v50 = vmul.f32 -1.442695, %v1275_v54 }
  0xf6   : > { %v1042_v60 = vpop.eup %1041  ;;  %1061 = vpow2.f32 %v894_v53  ;;  %v895_v52 = vmul.f32 -1.442695, %v1280_v58 }
  0xf7   : > { %v1044_v61 = vpop.eup %1043  ;;  %v554_v62 = vadd.f32 1.0, %v1042_v60  ;;  %1063 = vpow2.f32 %v906_v56  ;;  %v986_v63 = vpop.f32.mrb[8].mxu0  ;;  %v907_v56 = vmul.f32 -1.442695, %v1283_v59 }
  0xf8   : > { %v1046_v0 = vpop.eup %1045  ;;  %v566_v1 = vadd.f32 1.0, %v1044_v61  ;;  %1065 = vpow2.f32 %v897_v57  ;;  %v1286_v2 = vadd.f32 %v986_v63, %v1222_v14  ;;  %v998_v3 = vpop.f32.mrb[8].mxu1 }
  0xf9   : > { %v421_v4 = vpop.f32.mrb[9].mxu0  ;;  %v1048_v5 = vpop.eup %1047  ;;  %1067 = vrcp.f32 %v554_v62  ;;  %v552_v6 = vadd.f32 1.0, %v1046_v0  ;;  %v1289_v7 = vadd.f32 %v998_v3, %v1222_v14 }
  0xfa   : > { %v1292_v8 = vadd.f32 %v1222_v14, %v421_v4  ;;  %v469_v9 = vpop.f32.mrb[9].mxu1  ;;  %v987_v10 = vpop.f32.mrb[10].mxu0  ;;  %1069 = vrcp.f32 %v566_v1  ;;  %v564_v12 = vadd.f32 1.0, %v1048_v5  ;;  %v900_v61 = vmul.f32 -1.442695, %v1286_v2 }
  0xfb   : > { %v1050_v11 = vpop.eup %1049  ;;  %v1295_v13 = vadd.f32 %v1222_v14, %v469_v9  ;;  %v999_v15 = vpop.f32.mrb[10].mxu1  ;;  %1071 = vrcp.f32 %v552_v6  ;;  %v1298_v27 = vadd.f32 %v987_v10, %v1222_v14  ;;  %v912_v0 = vmul.f32 -1.442695, %v1289_v7 }
  0xfc   : > { %v424_v17 = vpop.f32.mrb[11].mxu0  ;;  %v1052_v18 = vpop.eup %1051  ;;  %v555_v21 = vadd.f32 1.0, %v1050_v11  ;;  %1073 = vrcp.f32 %v564_v12  ;;  %v898_v5 = vmul.f32 -1.442695, %v1292_v8 }
  0xfd   : > { %v472_v22 = vpop.f32.mrb[11].mxu1  ;;  %v1054_v23 = vpop.eup %1053  ;;  %v567_v26 = vadd.f32 1.0, %v1052_v18  ;;  %v1301_v32 = vadd.f32 %v1222_v14, %v424_v17  ;;  %v901_v12 = vmul.f32 -1.442695, %v1298_v27 }
  0xfe   : > { %v1056_v28 = vpop.eup %1055  ;;  %1075 = vrcp.f32 %v555_v21  ;;  %v553_v29 = vadd.f32 1.0, %v1054_v23  ;;  %v1304_v33 = vadd.f32 %v1222_v14, %v472_v22 }
  0xff   : > { %v1058_v34 = vpop.eup %1057  ;;  %1077 = vrcp.f32 %v567_v26  ;;  %v565_v36 = vadd.f32 1.0, %v1056_v28  ;;  %v899_v18 = vmul.f32 -1.442695, %v1301_v32 }
 0x100   : > { %v1060_v37 = vpop.eup %1059  ;;  %1079 = vrcp.f32 %v553_v29  ;;  %v558_v38 = vadd.f32 1.0, %v1058_v34  ;;  %v911_v23 = vmul.f32 -1.442695, %v1304_v33 }
 0x101   : > { %v1062_v39 = vpop.eup %1061  ;;  %1081 = vrcp.f32 %v565_v36  ;;  %v570_v41 = vadd.f32 1.0, %v1060_v37 }
 0x102   : > { %v1064_v42 = vpop.eup %1063  ;;  %1083 = vrcp.f32 %v558_v38  ;;  %v556_v45 = vadd.f32 1.0, %v1062_v39 }
 0x103   : > { %v1066_v46 = vpop.eup %1065  ;;  %1085 = vrcp.f32 %v570_v41  ;;  %v568_v47 = vadd.f32 1.0, %v1064_v42 }
 0x104   : > { %v1068_v14 = vpop.eup %1067  ;;  %1087 = vrcp.f32 %v556_v45  ;;  %v559_v51 = vadd.f32 1.0, %v1066_v46 }
 0x105   : > { %v1070_v53 = vpop.eup %1069  ;;  %v623_v55 = vmul.f32 %v1068_v14, %v1225_v16  ;;  %1089 = vrcp.f32 %v568_v47 }
 0x106   : > { %v1072_v57 = vpop.eup %1071  ;;  %v635_v60 = vmul.f32 %v1070_v53, %v1228_v19  ;;  %1091 = vrcp.f32 %v559_v51 }
 0x107   : > { %v1074_v62 = vpop.eup %1073  ;;  %v940_v63 = vpack.c.bf16 %v623_v55, %v623_v55  ;;  %v621_v16 = vmul.f32 %v1072_v57, %v1231_v20  ;;  %1093 = vpow2.f32 %v909_v50  ;;  %v910_v20 = vmul.f32 -1.442695, %v1295_v13 }
 0x108   : > { %v1076_v1 = vpop.eup %1075  ;;  %v952_v3 = vpack.c.bf16 %v635_v60, %v635_v60  ;;  %v633_v4 = vmul.f32 %v1074_v62, %v1235_v24  ;;  %1095 = vpow2.f32 %v895_v52 }
 0x109   : > { %v1078_v19 = vpop.eup %1077  ;;  %740 = vst.msk [vmem:[%s1315_s27 + $0x8] sm:$0xf] %vm737_vm2, %v940_v63  ;;  %v938_v6 = vpack.c.bf16 %v621_v16, %v621_v16  ;;  %v624_v9 = vmul.f32 %v1076_v1, %v1238_v25  ;;  %1097 = vpow2.f32 %v907_v56 }
 0x10a   : > { %v1080_v10 = vpop.eup %1079  ;;  %752 = vst.msk [vmem:[%s1315_s27 + $0x38] sm:$0xf] %vm737_vm2, %v952_v3  ;;  %v950_v11 = vpack.c.bf16 %v633_v4, %v633_v4  ;;  %v636_v24 = vmul.f32 %v1078_v19, %v1243_v30  ;;  %1099 = vpow2.f32 %v900_v61 }
 0x10b   : > { %v1082_v15 = vpop.eup %1081  ;;  %738 = vst.msk [vmem:[%s1315_s27] sm:$0xf] %vm737_vm2, %v938_v6  ;;  %v941_v17 = vpack.c.bf16 %v624_v9, %v624_v9  ;;  %v622_v25 = vmul.f32 %v1080_v10, %v1246_v31  ;;  %1101 = vpow2.f32 %v912_v0 }
 0x10c   : > { %v1084_v21 = vpop.eup %1083  ;;  %750 = vst.msk [vmem:[%s1315_s27 + $0x30] sm:$0xf] %vm737_vm2, %v950_v11  ;;  %v953_v22 = vpack.c.bf16 %v636_v24, %v636_v24  ;;  %v634_v30 = vmul.f32 %v1082_v15, %v1251_v35  ;;  %1103 = vpow2.f32 %v898_v5 }
 0x10d   : > { %v1086_v26 = vpop.eup %1085  ;;  %741 = vst.msk [vmem:[%s1315_s27 + $0xc] sm:$0xf] %vm737_vm2, %v941_v17  ;;  %v939_v28 = vpack.c.bf16 %v622_v25, %v622_v25  ;;  %v627_v31 = vmul.f32 %v1084_v21, %v1257_v40  ;;  %1105 = vpow2.f32 %v910_v20 }
 0x10e   : > { %v1088_v29 = vpop.eup %1087  ;;  %753 = vst.msk [vmem:[%s1315_s27 + $0x3c] sm:$0xf] %vm737_vm2, %v953_v22  ;;  %v951_v34 = vpack.c.bf16 %v634_v30, %v634_v30  ;;  %v639_v36 = vmul.f32 %v1086_v26, %v1260_v43  ;;  %1107 = vpow2.f32 %v901_v12 }
 0x10f   : > { %v1090_v35 = vpop.eup %1089  ;;  %739 = vst.msk [vmem:[%s1315_s27 + $0x4] sm:$0xf] %vm737_vm2, %v939_v28  ;;  %v944_v37 = vpack.c.bf16 %v627_v31, %v627_v31  ;;  %v625_v38 = vmul.f32 %v1088_v29, %v1263_v44  ;;  %1109 = vpow2.f32 %v899_v18 }
 0x110   : > { %v1092_v39 = vpop.eup %1091  ;;  %751 = vst.msk [vmem:[%s1315_s27 + $0x34] sm:$0xf] %vm737_vm2, %v951_v34  ;;  %v956_v40 = vpack.c.bf16 %v639_v36, %v639_v36  ;;  %v637_v41 = vmul.f32 %v1090_v35, %v1267_v48  ;;  %1111 = vpow2.f32 %v911_v23 }
 0x111   : > { %v1094_v42 = vpop.eup %1093  ;;  %744 = vst.msk [vmem:[%s1315_s27 + $0x18] sm:$0xf] %vm737_vm2, %v944_v37  ;;  %v942_v43 = vpack.c.bf16 %v625_v38, %v625_v38  ;;  %v628_v45 = vmul.f32 %v1092_v39, %v1270_v49 }
 0x112   : > { %v1096_v46 = vpop.eup %1095  ;;  %756 = vst.msk [vmem:[%s1315_s27 + $0x48] sm:$0xf] %vm737_vm2, %v956_v40  ;;  %v954_v44 = vpack.c.bf16 %v637_v41, %v637_v41  ;;  %v571_v47 = vadd.f32 1.0, %v1094_v42 }
 0x113   : > { %v1098_v50 = vpop.eup %1097  ;;  %742 = vst.msk [vmem:[%s1315_s27 + $0x10] sm:$0xf] %vm737_vm2, %v942_v43  ;;  %v945_v14 = vpack.c.bf16 %v628_v45, %v628_v45  ;;  %v557_v51 = vadd.f32 1.0, %v1096_v46 }
 0x114   : > { %v1100_v52 = vpop.eup %1099  ;;  %754 = vst.msk [vmem:[%s1315_s27 + $0x40] sm:$0xf] %vm737_vm2, %v954_v44  ;;  %1113 = vrcp.f32 %v571_v47  ;;  %v569_v48 = vadd.f32 1.0, %v1098_v50 }
 0x115   : > { %v1102_v53 = vpop.eup %1101  ;;  %745 = vst.msk [vmem:[%s1315_s27 + $0x1c] sm:$0xf] %vm737_vm2, %v945_v14  ;;  %1115 = vrcp.f32 %v557_v51  ;;  %v562_v49 = vadd.f32 1.0, %v1100_v52 }
 0x116   : > { %v1104_v55 = vpop.eup %1103  ;;  %1117 = vrcp.f32 %v569_v48  ;;  %v574_v56 = vadd.f32 1.0, %v1102_v53 }
 0x117   : > { %v1106_v57 = vpop.eup %1105  ;;  %1119 = vrcp.f32 %v562_v49  ;;  %v560_v60 = vadd.f32 1.0, %v1104_v55 }
 0x118   : > { %v1108_v61 = vpop.eup %1107  ;;  %1121 = vrcp.f32 %v574_v56  ;;  %v572_v62 = vadd.f32 1.0, %v1106_v57 }
 0x119   : > { %v1110_v63 = vpop.eup %1109  ;;  %1123 = vrcp.f32 %v560_v60  ;;  %v563_v16 = vadd.f32 1.0, %v1108_v61 }
 0x11a   : > { %v1112_v0 = vpop.eup %1111  ;;  %1125 = vrcp.f32 %v572_v62  ;;  %v561_v1 = vadd.f32 1.0, %v1110_v63 }
 0x11b   : > { %1127 = vrcp.f32 %v563_v16  ;;  %v573_v3 = vadd.f32 1.0, %v1112_v0 }
 0x11c   : > { %1129 = vrcp.f32 %v561_v1 }
 0x11d   : > { %1131 = vrcp.f32 %v573_v3 }
 0x11e   : > { %v1114_v4 = vpop.eup %1113 }
 0x11f   : > { %v1116_v5 = vpop.eup %1115  ;;  %v640_v19 = vmul.f32 %v1114_v4, %v1275_v54 }
 0x120   : > { %v1118_v6 = vpop.eup %1117  ;;  %v626_v9 = vmul.f32 %v1116_v5, %v1280_v58 }
 0x121   : > { %v1120_v20 = vpop.eup %1119  ;;  %v957_v10 = vpack.c.bf16 %v640_v19, %v640_v19  ;;  %v638_v11 = vmul.f32 %v1118_v6, %v1283_v59 }
 0x122   : > { %v1122_v24 = vpop.eup %1121  ;;  %v943_v12 = vpack.c.bf16 %v626_v9, %v626_v9  ;;  %v631_v15 = vmul.f32 %v1120_v20, %v1286_v2 }
 0x123   : > { %v1124_v17 = vpop.eup %1123  ;;  %757 = vst.msk [vmem:[%s1315_s27 + $0x4c] sm:$0xf] %vm737_vm2, %v957_v10  ;;  %v955_v25 = vpack.c.bf16 %v638_v11, %v638_v11  ;;  %v643_v54 = vmul.f32 %v1122_v24, %v1289_v7 }
 0x124   : > { %v1126_v18 = vpop.eup %1125  ;;  %743 = vst.msk [vmem:[%s1315_s27 + $0x14] sm:$0xf] %vm737_vm2, %v943_v12  ;;  %v948_v58 = vpack.c.bf16 %v631_v15, %v631_v15  ;;  %v629_v59 = vmul.f32 %v1124_v17, %v1292_v8 }
 0x125   : > { %v1128_v21 = vpop.eup %1127  ;;  %755 = vst.msk [vmem:[%s1315_s27 + $0x44] sm:$0xf] %vm737_vm2, %v955_v25  ;;  %v960_v2 = vpack.c.bf16 %v643_v54, %v643_v54  ;;  %v641_v22 = vmul.f32 %v1126_v18, %v1295_v13 }
 0x126   : > { %v1130_v30 = vpop.eup %1129  ;;  %748 = vst.msk [vmem:[%s1315_s27 + $0x28] sm:$0xf] %vm737_vm2, %v948_v58  ;;  %v946_v7 = vpack.c.bf16 %v629_v59, %v629_v59  ;;  %v632_v23 = vmul.f32 %v1128_v21, %v1298_v27 }
 0x127   : > { %v1132_v26 = vpop.eup %1131  ;;  %761 = vst.msk [vmem:[%s1315_s27 + $0x58] sm:$0x3] %vm760_vm3, %v960_v2  ;;  %v958_v28 = vpack.c.bf16 %v641_v22, %v641_v22  ;;  %v630_v8 = vmul.f32 %v1130_v30, %v1301_v32 }
 0x128   : > { %746 = vst.msk [vmem:[%s1315_s27 + $0x20] sm:$0xf] %vm737_vm2, %v946_v7  ;;  %v949_v31 = vpack.c.bf16 %v632_v23, %v632_v23  ;;  %v642_v29 = vmul.f32 %v1132_v26, %v1304_v33 }
 0x129   : > { %758 = vst.msk [vmem:[%s1315_s27 + $0x50] sm:$0xf] %vm737_vm2, %v958_v28  ;;  %v947_v13 = vpack.c.bf16 %v630_v8, %v630_v8 }
 0x12a   : > { %749 = vst.msk [vmem:[%s1315_s27 + $0x2c] sm:$0xf] %vm737_vm2, %v949_v31  ;;  %v959_v34 = vpack.c.bf16 %v642_v29, %v642_v29 }
 0x12b   : > { %747 = vst.msk [vmem:[%s1315_s27 + $0x24] sm:$0xf] %vm737_vm2, %v947_v13 }
 0x12c   : > { %759 = vst.msk [vmem:[%s1315_s27 + $0x54] sm:$0xf] %vm737_vm2, %v959_v34 }
 0x12d PF: > { %s13_s14 = sadd.s32 1, %s1155_s14   ;;  %s1404_s12 = smov %s1151_s13 }
 0x12e   : > { %p10_p5 = scmp.ge.s32.totalorder %s13_s14, 4   ;;  %s1405_s13 = smov %s1407_s15 }
 0x130   :  { %12 = sbr.rel (!%p10_p5) target bundleno = 2 (0x2), region = 65 }

// kernel: dag_forward.14
= control target key start
LH: loop header
LB: loop body
LE: loop exit
PB: predicated region body
PF: predicated region fallthrough
CT: control target
= control target key end

     0   :  { %s553_s12 = smov 0   ;;  %s555_s13 = smov 0   ;;  %s602_s0 = inlined_call_operand.vmem [shape: bf16[2,10,48], index: 0, kind: input, shape index: {}]   ;;  %s603_s1 = inlined_call_operand.vmem [shape: bf16[48,32], index: 1, kind: input, shape index: {}]   ;;  %s604_s2 = inlined_call_operand.vmem [shape: f32[2,1,32], index: 2, kind: input, shape index: {}]   ;;  %s605_s3 = inlined_call_operand.vmem [shape: bf16[2,10,32], index: 3, kind: output, shape index: {}]  }
   0x1   :  { %s557_s14 = smov 0  }
   0x2 LB: > { %s25_s15 = sadd.s32 1, %s525_s13  ;;  %p434_p0 = scmp.ge.s32.totalorder %s529_s14, 1  ;;  %s529_s14 = sphi %s557_s14, %s13_s14   ;;  %s525_s13 = sphi %s555_s13, %s607_s13   ;;  %s521_s12 = sphi %s553_s12, %s606_s12  }
   0x3   : > { %p27_p1 = scmp.ge.s32.totalorder %s25_s15, 2  ;;  %p166_p2 = scmp.lt.s32.totalorder %s529_s14, 3 }
   0x5   : > { %s609_s15 = smov (%p27_p1, %s25_s15), 0  ;;  %p167_p3 = pnand %p434_p0, %p166_p2 }
   0x6   : > { %v495_v0 = vld [vmem:[%s603_s1] sm:$0xff] (!%p167_p3)   ;;  %v531_v1 = vmov (!%p167_p3), 0.0   ;;  %v496_v2 = vld [vmem:[%s603_s1 + $0x8] sm:$0xff] (!%p167_p3)   ;;  %vm532_vm0 = vmmov (!%p167_p3), 0   ;;  %p202_p4 = scmp.lt.s32.totalorder (!%p167_p3), %s521_s12, 1  ;;  %v497_v3 = vld [vmem:[%s603_s1 + $0x10] sm:$0xff] (!%p167_p3)  }
   0x7   : > { %170 = sbr.rel (%p167_p3) target bundleno = 266 (0x10a), region = 32  ;;  %459 = vmatprep.subr.bf16.mxu0 (!%p167_p3), %v531_v1  ;;  %465 = vmatprep.mubr.msk.bf16.mxu0 (!%p167_p3), %vm532_vm0, %v531_v1  ;;  %vm263_vm1 = vcmask (!%p167_p3), 392192   ;;  %vm330_vm2 = vcmask (!%p167_p3), 257024   ;;  %vm332_vm3 = vcmask (!%p167_p3), 253952  }
   0x8   : > { %460 = vmatpush3.bf16.msra.mxu0 (!%p167_p3), %v495_v0 }
   0x9   : > { %461 = vmatprep.subr.bf16.mxu0 (!%p167_p3), %v531_v1 }
   0xc   : > { %462 = vmatpush3.bf16.msra.mxu0 (!%p167_p3), %v496_v2 }
   0xd   : > { %463 = vmatprep.subr.bf16.mxu0 (!%p167_p3), %v531_v1 }
   0xe   : > { %s611_s12 = smov (!%p202_p4, %s521_s12), 1 }
   0xf   : > { %s451_s22 = sshll.u32 %s611_s12, 3  ;;  %s213_s28 = scalar_lea.vmem %s604_s2, %s611_s12 }
  0x10   : > { %s209_s25 = scalar_lea.vmem %s602_s0, %s451_s22  ;;  %464 = vmatpush3.bf16.msra.mxu0 %v497_v3  ;;  %v439_v5 = vld [vmem:[%s213_s28] ss:$0 sm:$0xff]  ;;  %s222_s4 = scalar_lea.vmem %s605_s3, %s451_s22 }
  0x11   : > { %v498_v4 = vld [vmem:[%s209_s25] sm:$0x1f]  }
  0x13   : > { %466 = vmatmul.mubr.msk.bf16.vlgmr.msra.gmra.mrb[0].mxu0 %vm263_vm1, %v498_v4 }
  0xe6   : > { %v301_v6 = vpop.f32.mrb[0].mxu0 }
  0xe7   : > { %v302_v7 = vadd.f32 %v439_v5, %v301_v6  ;;  %v467_v8 = vpop.f32.mrb[1].mxu0 }
  0xe8   : > { %v304_v9 = vpop.f32.mrb[2].mxu0 }
  0xe9   : > { %v445_v10 = vmul.f32 -1.442695, %v302_v7  ;;  %v305_v11 = vadd.f32 %v439_v5, %v304_v9  ;;  %v468_v12 = vpop.f32.mrb[3].mxu0 }
  0xeb   : > { %499 = vpow2.f32 %v445_v10  ;;  %v446_v13 = vmul.f32 -1.442695, %v305_v11 }
  0xed   : > { %501 = vpow2.f32 %v446_v13 }
  0xf5   : > { %v500_v14 = vpop.eup %499 }
  0xf6   : > { %v314_v15 = vadd.f32 1.0, %v500_v14 }
  0xf7   : > { %v502_v16 = vpop.eup %501 }
  0xf8   : > { %503 = vrcp.f32 %v314_v15  ;;  %v315_v17 = vadd.f32 1.0, %v502_v16 }
  0xfa   : > { %505 = vrcp.f32 %v315_v17 }
 0x102   : > { %v504_v18 = vpop.eup %503 }
 0x103   : > { %v320_v19 = vmul.f32 %v504_v18, %v302_v7 }
 0x104   : > { %v506_v20 = vpop.eup %505 }
 0x105   : > { %v453_v21 = vpack.c.bf16 %v320_v19, %v320_v19  ;;  %v321_v22 = vmul.f32 %v506_v20, %v305_v11 }
 0x107   : > { %331 = vst.msk [vmem:[%s222_s4] sm:$0xf] %vm330_vm2, %v453_v21  ;;  %v454_v23 = vpack.c.bf16 %v321_v22, %v321_v22 }
 0x109   : > { %333 = vst.msk [vmem:[%s222_s4 + $0x4] sm:$0x1] %vm332_vm3, %v454_v23 }
 0x10a PF: > { %s13_s14 = sadd.s32 1, %s529_s14   ;;  %s606_s12 = smov %s525_s13 }
 0x10b   : > { %p10_p5 = scmp.ge.s32.totalorder %s13_s14, 4   ;;  %s607_s13 = smov %s609_s15 }
 0x10d   :  { %12 = sbr.rel (!%p10_p5) target bundleno = 2 (0x2), region = 65 }

// kernel: dag_forward.15
= control target key start
LH: loop header
LB: loop body
LE: loop exit
PB: predicated region body
PF: predicated region fallthrough
CT: control target
= control target key end

     0   :  { %s567_s12 = smov 0   ;;  %s569_s13 = smov 0   ;;  %s638_s0 = inlined_call_operand.vmem [shape: bf16[2,2,160], index: 0, kind: input, shape index: {}]   ;;  %s639_s1 = inlined_call_operand.vmem [shape: bf16[160,64], index: 1, kind: input, shape index: {}]   ;;  %s640_s2 = inlined_call_operand.vmem [shape: f32[2,1,64], index: 2, kind: input, shape index: {}]   ;;  %s641_s3 = inlined_call_operand.vmem [shape: bf16[2,2,64], index: 3, kind: output, shape index: {}]  }
   0x1   :  { %s571_s14 = smov 0  }
   0x2 LB: > { %s25_s15 = sadd.s32 1, %s539_s13  ;;  %p463_p0 = scmp.ge.s32.totalorder %s543_s14, 1  ;;  %s543_s14 = sphi %s571_s14, %s13_s14   ;;  %s539_s13 = sphi %s569_s13, %s643_s13   ;;  %s535_s12 = sphi %s567_s12, %s642_s12  }
   0x3   : > { %p27_p1 = scmp.ge.s32.totalorder %s25_s15, 2  ;;  %p164_p2 = scmp.lt.s32.totalorder %s543_s14, 3 }
   0x5   : > { %s645_s15 = smov (%p27_p1, %s25_s15), 0  ;;  %p165_p3 = pnand %p463_p0, %p164_p2 }
   0x6   : > { %v507_v0 = vld [vmem:[%s639_s1] sm:$0xff] (!%p165_p3)   ;;  %v545_v1 = vmov (!%p165_p3), 0   ;;  %p195_p4 = scmp.lt.s32.totalorder (!%p165_p3), %s535_s12, 1  ;;  %v508_v2 = vld [vmem:[%s639_s1 + $0x8] sm:$0xff] (!%p165_p3)   ;;  %v509_v3 = vld [vmem:[%s639_s1 + $0x10] sm:$0xff] (!%p165_p3)   ;;  %v253_v4 = vlaneseq (!%p165_p3)  ;;  %vm325_vm0 = vcmask (!%p165_p3), 261120  }
   0x7   : > { %168 = sbr.rel (%p165_p3) target bundleno = 292 (0x124), region = 32  ;;  %329 = vmatprep.subr.bf16.mxu0 (!%p165_p3), %v545_v1  ;;  %v510_v5 = vld [vmem:[%s639_s1 + $0x18] sm:$0xff] (!%p165_p3)   ;;  %v546_v7 = vmov (!%p165_p3), 1966171168   ;;  %v511_v12 = vld [vmem:[%s639_s1 + $0x20] sm:$0xff] (!%p165_p3)   ;;  %v512_v15 = vld [vmem:[%s639_s1 + $0x28] sm:$0xff] (!%p165_p3)  }
   0x8   : > { %330 = vmatpush1.bf16.msra.mxu0 (!%p165_p3), %v507_v0  ;;  %v251_v8 = vunpack.c.l.s4 (!%p165_p3), %v546_v7  ;;  %v254_v9 = vshrl.u32 (!%p165_p3), %v253_v4, 7  ;;  %v513_v16 = vld [vmem:[%s639_s1 + $0x30] sm:$0xff] (!%p165_p3)   ;;  %v514_v17 = vld [vmem:[%s639_s1 + $0x38] sm:$0xff] (!%p165_p3)   ;;  %v515_v18 = vld [vmem:[%s639_s1 + $0x40] sm:$0xff] (!%p165_p3)   ;;  %vm377_vm1 = vcmask (!%p165_p3), 516096  }
   0x9   : > { %331 = vmatprep.subr.bf16.mxu0 (!%p165_p3), %v545_v1  ;;  %v516_v19 = vld [vmem:[%s639_s1 + $0x48] sm:$0xff] (!%p165_p3)  }
   0xa   : > { %v252_v11 = vunpack.c.0.s8 (!%p165_p3), %v251_v8 }
   0xc   : > { %332 = vmatpush1.bf16.msra.mxu0 (!%p165_p3), %v508_v2  ;;  %v255_v13 = vsub.s32 (!%p165_p3), %v252_v11, %v254_v9 }
   0xd   : > { %333 = vmatprep.subr.bf16.mxu0 (!%p165_p3), %v545_v1 }
   0xe   : > { %s647_s12 = smov (!%p195_p4, %s535_s12), 1 }
   0xf   : > { %s464_s20 = sshll.u32 %s647_s12, 1  ;;  %s205_s19 = scalar_lea.vmem %s640_s2, %s647_s12 }
  0x10   : > { %s202_s25 = scalar_lea.vmem %s638_s0, %s464_s20  ;;  %334 = vmatpush1.bf16.msra.mxu0 %v509_v3  ;;  %v465_v21 = vld [vmem:[%s205_s19] ss:$0 sm:$0xff]  ;;  %s211_s22 = scalar_lea.vmem %s641_s3, %s647_s12 }
  0x11   : > { %v466_v6 = vld.sshfl [vmem:[%s202_s25] sm:$0x11 pattern:$0x75316420]  ;;  %335 = vmatprep.subr.bf16.mxu0 %v545_v1 }
  0x12   : > { %v249_v10 = vcombine.high %v466_v6, %v466_v6  ;;  %v256_v20 = vrot.slane %v466_v6, %v255_v13 }
  0x14   : > { %336 = vmatpush1.bf16.msra.mxu0 %v510_v5  ;;  %v263_v14 = vrot.slane %v249_v10, %v255_v13 }
  0x15   : > { %337 = vmatprep.subr.bf16.mxu0 %v545_v1 }
  0x16   : > { %477 = vmatprep.mubr.msk.bf16.mxu0 %vm325_vm0, %v263_v14 }
  0x18   : > { %338 = vmatpush1.bf16.msra.mxu0 %v511_v12 }
  0x19   : > { %339 = vmatprep.subr.bf16.mxu0 %v545_v1 }
  0x1c   : > { %340 = vmatpush1.bf16.msra.mxu0 %v512_v15 }
  0x1d   : > { %341 = vmatprep.subr.bf16.mxu0 %v545_v1 }
  0x20   : > { %342 = vmatpush1.bf16.msra.mxu0 %v513_v16 }
  0x21   : > { %343 = vmatprep.subr.bf16.mxu0 %v545_v1 }
  0x24   : > { %344 = vmatpush1.bf16.msra.mxu0 %v514_v17 }
  0x25   : > { %345 = vmatprep.subr.bf16.mxu0 %v545_v1 }
  0x28   : > { %346 = vmatpush1.bf16.msra.mxu0 %v515_v18 }
  0x29   : > { %347 = vmatprep.subr.bf16.mxu0 %v545_v1 }
  0x2c   : > { %348 = vmatpush1.bf16.msra.mxu0 %v516_v19 }
  0x2f   : > { %362 = vmatmul.mubr.bf16.vlgmr.msra.gmra.mrb[0].mxu0 %v256_v20 }
 0x102   : > { %v363_v22 = vpop.f32.mrb[0].mxu0 }
 0x103   : > { %v364_v23 = vadd.f32 %v465_v21, %v363_v22  ;;  %v365_v24 = vpop.f32.mrb[1].mxu0 }
 0x104   : > { %v366_v25 = vpop.f32.mrb[2].mxu0 }
 0x105   : > { %v478_v26 = vmul.f32 -1.442695, %v364_v23  ;;  %v367_v27 = vpop.f32.mrb[3].mxu0 }
 0x107   : > { %517 = vpow2.f32 %v478_v26 }
 0x111   : > { %v518_v28 = vpop.eup %517 }
 0x112   : > { %v372_v29 = vadd.f32 1.0, %v518_v28 }
 0x114   : > { %519 = vrcp.f32 %v372_v29 }
 0x11e   : > { %v520_v30 = vpop.eup %519 }
 0x11f   : > { %v375_v31 = vmul.f32 %v520_v30, %v364_v23 }
 0x121   : > { %v376_v32 = vpack.c.bf16 %v375_v31, %v375_v31 }
 0x123   : > { %378 = vst.msk [vmem:[%s211_s22] sm:$0x1] %vm377_vm1, %v376_v32 }
 0x124 PF: > { %s13_s14 = sadd.s32 1, %s543_s14   ;;  %s642_s12 = smov %s539_s13 }
 0x125   : > { %p10_p5 = scmp.ge.s32.totalorder %s13_s14, 4   ;;  %s643_s13 = smov %s645_s15 }
 0x127   :  { %12 = sbr.rel (!%p10_p5) target bundleno = 2 (0x2), region = 65 }

// kernel: dag_forward.16
= control target key start
LH: loop header
LB: loop body
LE: loop exit
PB: predicated region body
PF: predicated region fallthrough
CT: control target
= control target key end

     0   :  { %v727_v0 = vmov 0.0   ;;  %vm728_vm0 = vmmov 0   ;;  %vm78_vm1 = vcmask 523264   ;;  %v729_v15 = vmov 0   ;;  %s730_s26 = smov 64   ;;  %s902_s2 = inlined_call_operand.vmem [shape: bf16[64,96], index: 2, kind: input, shape index: {}]   ;;  %s903_s3 = inlined_call_operand.vmem [shape: bf16[64,96], index: 3, kind: input, shape index: {}]   ;;  %s904_s4 = inlined_call_operand.vmem [shape: bf16[32,96], index: 4, kind: input, shape index: {}]   ;;  %s905_s5 = inlined_call_operand.vmem [shape: bf16[32,96], index: 5, kind: input, shape index: {}]   ;;  %s906_s0 = inlined_call_operand.vmem [shape: bf16[4,64], index: 0, kind: input, shape index: {}]   ;;  %s907_s1 = inlined_call_operand.vmem [shape: bf16[4,64], index: 1, kind: input, shape index: {}]   ;;  %s908_s6 = inlined_call_operand.vmem [shape: f32[1,96], index: 6, kind: input, shape index: {}]   ;;  %s909_s7 = inlined_call_operand.vmem [shape: f32[1,96], index: 7, kind: input, shape index: {}]   ;;  %s910_s8 = inlined_call_operand.vmem [shape: f32[1,96], index: 8, kind: input, shape index: {}]   ;;  %s911_s9 = inlined_call_operand.vmem [shape: f32[1,96], index: 9, kind: input, shape index: {}]   ;;  %s912_s10 = inlined_call_operand.vmem [shape: f32[4,32], index: 10, kind: output, shape index: {0}]   ;;  %s913_s11 = inlined_call_operand.vmem [shape: f32[4,32], index: 11, kind: output, shape index: {1}]  }
   0x1   :  { %630 = vmatprep.subr.bf16.mxu0 %v727_v0  ;;  %v691_v1 = vld [vmem:[%s902_s2] sm:$0xff]   ;;  %642 = vmatprep.subr.bf16.mxu1 %v727_v0  ;;  %v693_v3 = vld [vmem:[%s902_s2 + $0x8] sm:$0xff]   ;;  %v695_v5 = vld [vmem:[%s902_s2 + $0x10] sm:$0xff]   ;;  %vm123_vm2 = vcmask 779264   ;;  %vm242_vm3 = vcmask 261120   ;;  %vm400_vm4 = vcmask 254976  }
   0x2   :  { %v692_v2 = vld [vmem:[%s903_s3] sm:$0xff]   ;;  %638 = vmatprep.mubr.msk.bf16.mxu0 %vm728_vm0, %v727_v0  ;;  %650 = vmatprep.mubr.msk.bf16.mxu1 %vm728_vm0, %v727_v0  ;;  %v694_v4 = vld [vmem:[%s903_s3 + $0x8] sm:$0xff]   ;;  %v696_v6 = vld [vmem:[%s903_s3 + $0x10] sm:$0xff]   ;;  %vm569_vm5 = vcmask 257026  }
   0x3   :  { %631 = vmatpush3.bf16.msra.mxu0 %v691_v1  ;;  %643 = vmatpush3.bf16.msra.mxu1 %v692_v2  ;;  %v697_v7 = vld [vmem:[%s902_s2 + $0x18] sm:$0xff]   ;;  %v38_v9 = vld [vmem:[%s906_s0] sm:$0x3]  ;;  %v701_v13 = vld [vmem:[%s904_s4 + $0x8] sm:$0xff]  }
   0x4   :  { %632 = vmatprep.subr.bf16.mxu0 %v727_v0  ;;  %644 = vmatprep.subr.bf16.mxu1 %v727_v0  ;;  %v698_v8 = vld [vmem:[%s903_s3 + $0x18] sm:$0xff]   ;;  %v699_v10 = vld [vmem:[%s904_s4] sm:$0xff]   ;;  %v702_v14 = vld [vmem:[%s905_s5 + $0x8] sm:$0xff]  }
   0x5   :  { %v125_v11 = vld [vmem:[%s907_s1] sm:$0x3] }
   0x6   :  { %v700_v12 = vld [vmem:[%s905_s5] sm:$0xff]  }
   0x7   :  { %633 = vmatpush3.bf16.msra.mxu0 %v693_v3  ;;  %645 = vmatpush3.bf16.msra.mxu1 %v694_v4  ;;  %v584_v16 = vld [vmem:[%s908_s6] ss:$0 sm:$0xff] }
   0x8   :  { %634 = vmatprep.subr.bf16.mxu0 %v727_v0  ;;  %646 = vmatprep.subr.bf16.mxu1 %v727_v0  ;;  %v590_v17 = vld [vmem:[%s909_s7] ss:$0 sm:$0xff] }
   0x9   :  { %v849_v30 = vld [vmem:[%s910_s8] ss:$0 sm:$0xff]  ;;  %s731_s8 = smov 96  }
   0xa   :  { %v854_v32 = vld [vmem:[%s911_s9] ss:$0 sm:$0xff] }
   0xb   :  { %635 = vmatpush3.bf16.msra.mxu0 %v695_v5  ;;  %647 = vmatpush3.bf16.msra.mxu1 %v696_v6 }
   0xc   :  { %636 = vmatprep.subr.bf16.mxu0 %v727_v0  ;;  %648 = vmatprep.subr.bf16.mxu1 %v727_v0 }
   0xf   :  { %637 = vmatpush3.bf16.msra.mxu0 %v697_v7  ;;  %649 = vmatpush3.bf16.msra.mxu1 %v698_v8 }
  0x10   :  { %654 = vmatprep.subr.bf16.mxu0 %v727_v0  ;;  %662 = vmatprep.subr.bf16.mxu1 %v727_v0 }
  0x12   :  { %639 = vmatmul.mubr.msk.bf16.vlgmr.msra.gmra.mrb[0].mxu0 %vm78_vm1, %v38_v9  ;;  %651 = vmatmul.mubr.msk.bf16.vlgmr.msra.gmra.mrb[0].mxu1 %vm78_vm1, %v125_v11 }
  0x13   :  { %655 = vmatpush3.bf16.msra.mxu0 %v699_v10  ;;  %663 = vmatpush3.bf16.msra.mxu1 %v700_v12 }
  0x14   :  { %656 = vmatprep.subr.bf16.mxu0 %v727_v0  ;;  %664 = vmatprep.subr.bf16.mxu1 %v727_v0 }
  0x15   :  { %658 = vmatprep.mubr.msk.bf16.mxu0 %vm728_vm0, %v727_v0  ;;  %666 = vmatprep.mubr.msk.bf16.mxu1 %vm728_vm0, %v727_v0 }
  0x17   :  { %657 = vmatpush3.bf16.msra.mxu0 %v701_v13  ;;  %665 = vmatpush3.bf16.msra.mxu1 %v702_v14 }
  0x18   :  { %670 = vmatprep.subr.bf16.mxu0 %v727_v0  ;;  %678 = vmatprep.subr.bf16.mxu1 %v727_v0 }
  0x1a   :  { %659 = vmatmul.mubr.bf16.vlgmr.msra.gmra.mrb[4].mxu0 %v729_v15  ;;  %667 = vmatmul.mubr.bf16.vlgmr.msra.gmra.mrb[4].mxu1 %v729_v15 }
  0x1b   :  { %671 = vmatpush3.bf16.msra.mxu0 %v699_v10  ;;  %679 = vmatpush3.bf16.msra.mxu1 %v700_v12 }
  0x1c   :  { %672 = vmatprep.subr.bf16.mxu0 %v727_v0  ;;  %674 = vmatprep.mubr.msk.bf16.mxu0 %vm728_vm0, %v727_v0 }
  0x1d   :  { %680 = vmatprep.subr.bf16.mxu1 %v727_v0  ;;  %682 = vmatprep.mubr.msk.bf16.mxu1 %vm728_vm0, %v727_v0 }
  0x1f   :  { %673 = vmatpush3.bf16.msra.mxu0 %v701_v13  ;;  %681 = vmatpush3.bf16.msra.mxu1 %v702_v14 }
  0xe5   :  { %v116_v18 = vpop.f32.mrb[0].mxu0  ;;  %v202_v21 = vpop.f32.mrb[0].mxu1 }
  0xe6   :  { %v117_v19 = vadd.f32 %v584_v16, %v116_v18  ;;  %v640_v20 = vpop.f32.mrb[1].mxu0  ;;  %v203_v22 = vadd.f32 %v590_v17, %v202_v21  ;;  %v652_v24 = vpop.f32.mrb[1].mxu1 }
  0xe7   :  { %v119_v23 = vpop.f32.mrb[2].mxu0  ;;  %v205_v27 = vpop.f32.mrb[2].mxu1 }
  0xe8   :  { %v122_v25 = vpack.c.bf16 %v117_v19, %v117_v19  ;;  %v641_v26 = vpop.f32.mrb[3].mxu0  ;;  %v208_v28 = vpack.c.bf16 %v203_v22, %v203_v22  ;;  %v653_v29 = vpop.f32.mrb[3].mxu1 }
  0xea   :  { %124 = vst.msk [vmem:[#allocation2] sm:$0x3] %vm123_vm2, %v122_v25  ;;  %209 = vst.msk [vmem:[#allocation3] sm:$0x3] %vm123_vm2, %v208_v28 }
  0xed   :  { %v280_v31 = vpop.f32.mrb[4].mxu0  ;;  %v338_v35 = vpop.f32.mrb[4].mxu1 }
  0xee   :  { %v281_v33 = vadd.f32 %v849_v30, %v280_v31  ;;  %v660_v34 = vpop.f32.mrb[5].mxu0  ;;  %v668_v37 = vpop.f32.mrb[5].mxu1  ;;  %v339_v38 = vadd.f32 %v854_v32, %v338_v35 }
  0xef   :  { %v283_v36 = vpop.f32.mrb[6].mxu0  ;;  %v341_v40 = vpop.f32.mrb[6].mxu1 }
  0xf0   :  { %352 = vrot.lane.b32.xlu0 %v281_v33, %s730_s26  ;;  %v661_v39 = vpop.f32.mrb[7].mxu0  ;;  %v669_v41 = vpop.f32.mrb[7].mxu1 }
  0xf1   :  { %v220_v42 = vld [vmem:[#allocation2] sm:$0x1]  ;;  %v222_v44 = vld [vmem:[#allocation3] sm:$0x1]  ;;  %v407_v28 = vld [vmem:[#allocation2] sm:$0x2] }
  0xf2   :  { %v221_v43 = vunpack.c.l.bf16 %v220_v42  ;;  %v223_v46 = vunpack.c.l.bf16 %v222_v44  ;;  %v408_v29 = vunpack.c.l.bf16 %v407_v28  ;;  %v409_v31 = vld [vmem:[#allocation3] sm:$0x2] }
  0xf4   :  { %378 = vrot.lane.b32.xlu0 %v339_v38, %s730_s26  ;;  %v344_v45 = vadd.f32 %v281_v33, %v221_v43  ;;  %v370_v48 = vadd.f32 %v339_v38, %v223_v46 }
  0xf6   :  { %v602_v47 = vmul.f32 -1.442695, %v344_v45  ;;  %v603_v49 = vmul.f32 -1.442695, %v370_v48 }
  0xf8   :  { %703 = vpow2.f32 %v602_v47 }
  0xf9   :  { %705 = vpow2.f32 %v603_v49 }
 0x102   :  { %v704_v50 = vpop.eup %703 }
 0x103   :  { %v348_v51 = vadd.f32 1.0, %v704_v50  ;;  %v706_v52 = vpop.eup %705 }
 0x104   :  { %v374_v53 = vadd.f32 1.0, %v706_v52 }
 0x105   :  { %707 = vrcp.f32 %v348_v51 }
 0x106   :  { %709 = vrcp.f32 %v374_v53 }
 0x10f   :  { %v708_v54 = vpop.eup %707 }
 0x110   :  { %v710_v57 = vpop.eup %709  ;;  %v362_v2 = vsub.f32 1.0, %v708_v54  ;;  %v368_v4 = vmul.f32 0.0, %v708_v54 }
 0x111   :  { %v388_v7 = vsub.f32 1.0, %v710_v57  ;;  %v394_v9 = vmul.f32 0.0, %v710_v57 }
 0x162   :  { %v353_v55 = vpop.permute.xlu0 %352 }
 0x163   :  { %v355_v56 = vmul.f32 %v708_v54, %v353_v55 }
 0x165   :  { %357 = vrot.lane.b32.xlu1 %v355_v56, %s730_s26 }
 0x166   :  { %v379_v58 = vpop.permute.xlu0 %378 }
 0x167   :  { %v381_v59 = vmul.f32 %v710_v57, %v379_v58 }
 0x169   :  { %383 = vrot.lane.b32.xlu1 %v381_v59, %s730_s26 }
 0x1d7   :  { %v358_v60 = vpop.permute.xlu1 %357 }
 0x1d8   :  { %v360_v61 = vadd.f32 %v358_v60, %v221_v43 }
 0x1da   :  { %711 = vtanh.f32 %v360_v61 }
 0x1db   :  { %v384_v62 = vpop.permute.xlu1 %383 }
 0x1dc   :  { %v386_v63 = vadd.f32 %v384_v62, %v223_v46 }
 0x1de   :  { %713 = vtanh.f32 %v386_v63 }
 0x1e4   :  { %v712_v0 = vpop.eup %711 }
 0x1e5   :  { %364 = vrot.lane.b32.xlu0 %v712_v0, %s731_s8 }
 0x1e8   :  { %v714_v1 = vpop.eup %713 }
 0x1e9   :  { %390 = vrot.lane.b32.xlu1 %v714_v1, %s731_s8 }
 0x257   :  { %v365_v3 = vpop.permute.xlu0 %364 }
 0x258   :  { %v367_v5 = vmul.f32 %v365_v3, %v362_v2 }
 0x25a   :  { %v864_v6 = vadd.f32 %v368_v4, %v367_v5 }
 0x25b   :  { %v391_v8 = vpop.permute.xlu1 %390 }
 0x25c   :  { %v393_v10 = vmul.f32 %v391_v8, %v388_v7  ;;  %v411_v11 = vpack.c.bf16 %v864_v6, %v864_v6  ;;  %v531_v53 = vrot.slane %v864_v6, 6 }
 0x25e   :  { %v868_v12 = vadd.f32 %v394_v9, %v393_v10  ;;  %413 = vrot.lane.b32.xlu0 %v411_v11, %s731_s8 }
 0x260   :  { %v458_v13 = vpack.c.bf16 %v868_v12, %v868_v12  ;;  %v561_v59 = vrot.slane %v868_v12, 6 }
 0x262   :  { %460 = vrot.lane.b32.xlu1 %v458_v13, %s731_s8 }
 0x2d0   :  { %v414_v14 = vpop.permute.xlu0 %413 }
 0x2d1   :  { %675 = vmatmul.mubr.msk.bf16.vlgmr.msra.gmra.mrb[8].mxu0 %vm242_vm3, %v414_v14 }
 0x2d4   :  { %v461_v15 = vpop.permute.xlu1 %460 }
 0x2d5   :  { %683 = vmatmul.mubr.msk.bf16.vlgmr.msra.gmra.mrb[8].mxu1 %vm242_vm3, %v461_v15 }
 0x3a4   :  { %v452_v16 = vpop.f32.mrb[8].mxu0 }
 0x3a5   :  { %v453_v17 = vadd.f32 %v849_v30, %v452_v16  ;;  %v676_v18 = vpop.f32.mrb[9].mxu0  ;;  %v410_v30 = vunpack.c.l.bf16 %v409_v31 }
 0x3a6   :  { %v455_v19 = vpop.f32.mrb[10].mxu0 }
 0x3a7   :  { %v506_v20 = vrot.slane %v453_v17, 6  ;;  %v677_v21 = vpop.f32.mrb[11].mxu0 }
 0x3a8   :  { %v499_v22 = vpop.f32.mrb[8].mxu1 }
 0x3a9   :  { %v500_v23 = vadd.f32 %v854_v32, %v499_v22  ;;  %v684_v24 = vpop.f32.mrb[9].mxu1  ;;  %515 = vrot.lane.b32.xlu0 %v506_v20, %s730_s26  ;;  %v508_v33 = vadd.f32 %v506_v20, %v408_v29 }
 0x3aa   :  { %v502_v25 = vpop.f32.mrb[10].mxu1 }
 0x3ab   :  { %v536_v26 = vrot.slane %v500_v23, 6  ;;  %v685_v27 = vpop.f32.mrb[11].mxu1  ;;  %v606_v34 = vmul.f32 -1.442695, %v508_v33 }
 0x3ad   :  { %545 = vrot.lane.b32.xlu1 %v536_v26, %s730_s26  ;;  %v538_v35 = vadd.f32 %v536_v26, %v410_v30  ;;  %715 = vpow2.f32 %v606_v34 }
 0x3af   :  { %v607_v36 = vmul.f32 -1.442695, %v538_v35 }
 0x3b1   :  { %717 = vpow2.f32 %v607_v36 }
 0x3b7   :  { %v716_v37 = vpop.eup %715 }
 0x3b8   :  { %v512_v32 = vadd.f32 1.0, %v716_v37 }
 0x3ba   :  { %719 = vrcp.f32 %v512_v32 }
 0x3bb   :  { %v718_v38 = vpop.eup %717 }
 0x3bc   :  { %v542_v39 = vadd.f32 1.0, %v718_v38 }
 0x3be   :  { %721 = vrcp.f32 %v542_v39 }
 0x3c4   :  { %v720_v40 = vpop.eup %719 }
 0x3c5   :  { %v525_v52 = vsub.f32 1.0, %v720_v40  ;;  %v533_v55 = vmul.f32 %v720_v40, %v531_v53 }
 0x3c8   :  { %v722_v43 = vpop.eup %721 }
 0x3c9   :  { %v555_v58 = vsub.f32 1.0, %v722_v43  ;;  %v563_v62 = vmul.f32 %v722_v43, %v561_v59 }
 0x41b   :  { %v516_v41 = vpop.permute.xlu0 %515 }
 0x41c   :  { %v518_v42 = vmul.f32 %v720_v40, %v516_v41 }
 0x41e   :  { %520 = vrot.lane.b32.xlu0 %v518_v42, %s730_s26 }
 0x41f   :  { %v546_v44 = vpop.permute.xlu1 %545 }
 0x420   :  { %v548_v45 = vmul.f32 %v722_v43, %v546_v44 }
 0x422   :  { %550 = vrot.lane.b32.xlu1 %v548_v45, %s730_s26 }
 0x490   :  { %v521_v46 = vpop.permute.xlu0 %520 }
 0x491   :  { %v523_v47 = vadd.f32 %v521_v46, %v408_v29 }
 0x493   :  { %723 = vtanh.f32 %v523_v47 }
 0x494   :  { %v551_v48 = vpop.permute.xlu1 %550 }
 0x495   :  { %v553_v49 = vadd.f32 %v551_v48, %v410_v30 }
 0x497   :  { %725 = vtanh.f32 %v553_v49 }
 0x49d   :  { %v724_v50 = vpop.eup %723 }
 0x49e   :  { %527 = vrot.lane.b32.xlu0 %v724_v50, %s731_s8 }
 0x4a1   :  { %v726_v51 = vpop.eup %725 }
 0x4a2   :  { %557 = vrot.lane.b32.xlu1 %v726_v51, %s731_s8  ;;  %397 = vrot.lane.b32.xlu0 %v864_v6, %s731_s8 }
 0x4a6   :  { %403 = vrot.lane.b32.xlu1 %v868_v12, %s731_s8 }
 0x510   :  { %v528_v54 = vpop.permute.xlu0 %527 }
 0x511   :  { %v530_v56 = vmul.f32 %v528_v54, %v525_v52 }
 0x513   :  { %v534_v57 = vadd.f32 %v533_v55, %v530_v56 }
 0x514   :  { %v558_v60 = vpop.permute.xlu1 %557  ;;  %v398_v61 = vpop.permute.xlu0 %397 }
 0x515   :  { %v560_v63 = vmul.f32 %v558_v60, %v555_v58  ;;  %401 = vst.msk [vmem:[%s912_s10] sm:$0x3] %vm400_vm4, %v398_v61  ;;  %566 = vrot.lane.b32.xlu0 %v534_v57, %s731_s8 }
 0x517   :  { %v564_v0 = vadd.f32 %v563_v62, %v560_v63 }
 0x518   :  { %v404_v1 = vpop.permute.xlu1 %403 }
 0x519   :  { %406 = vst.msk [vmem:[%s913_s11 + $0x2] sm:$0x3] %vm400_vm4, %v404_v1  ;;  %572 = vrot.lane.b32.xlu1 %v564_v0, %s731_s8 }
 0x587   :  { %v567_v2 = vpop.permute.xlu0 %566 }
 0x588   :  { %570 = vst.msk [vmem:[%s912_s10] sm:$0xc] %vm569_vm5, %v567_v2 }
 0x58b   :  { %v573_v3 = vpop.permute.xlu1 %572 }
 0x58c   :  { %575 = vst.msk [vmem:[%s913_s11 - $0x2] sm:$0xc] %vm569_vm5, %v573_v3 }

// kernel: dag_forward.18
= control target key start
LH: loop header
LB: loop body
LE: loop exit
PB: predicated region body
PF: predicated region fallthrough
CT: control target
= control target key end

     0   :  { %s632_s15 = smov 0   ;;  %s634_s16 = smov 0   ;;  %s682_s0 = inlined_call_operand.vmem [shape: bf16[2,10,32], index: 0, kind: input, shape index: {}]   ;;  %s683_s1 = inlined_call_operand.vmem [shape: bf16[2,10,32], index: 1, kind: input, shape index: {}]   ;;  %s684_s2 = inlined_call_operand.vmem [shape: bf16[32,48], index: 2, kind: input, shape index: {}]   ;;  %s685_s3 = inlined_call_operand.vmem [shape: f32[2,1,48], index: 3, kind: input, shape index: {}]   ;;  %s686_s4 = inlined_call_operand.vmem [shape: bf16[2,10,48], index: 4, kind: output, shape index: {}]  }
   0x1   :  { %s636_s17 = smov 0  }
   0x2 LB: > { %s26_s18 = sadd.s32 1, %s599_s16  ;;  %p511_p0 = scmp.ge.s32.totalorder %s603_s17, 1  ;;  %s603_s17 = sphi %s636_s17, %s14_s17   ;;  %s599_s16 = sphi %s634_s16, %s688_s16   ;;  %s595_s15 = sphi %s632_s15, %s687_s15  }
   0x3   : > { %p28_p1 = scmp.ge.s32.totalorder %s26_s18, 2  ;;  %p208_p2 = scmp.lt.s32.totalorder %s603_s17, 3 }
   0x5   : > { %s690_s18 = smov (%p28_p1, %s26_s18), 0  ;;  %p209_p3 = pnand %p511_p0, %p208_p2 }
   0x6   : > { %v571_v0 = vld [vmem:[%s684_s2] sm:$0xff] (!%p209_p3)   ;;  %v605_v1 = vmov (!%p209_p3), 0.0   ;;  %v572_v2 = vld [vmem:[%s684_s2 + $0x8] sm:$0xff] (!%p209_p3)   ;;  %vm606_vm0 = vmmov (!%p209_p3), 0   ;;  %p255_p4 = scmp.lt.s32.totalorder (!%p209_p3), %s595_s15, 1  ;;  %vm322_vm1 = vcmask (!%p209_p3), 261120  }
   0x7   : > { %212 = sbr.rel (%p209_p3) target bundleno = 270 (0x10e), region = 36  ;;  %537 = vmatprep.subr.bf16.mxu0 (!%p209_p3), %v605_v1  ;;  %541 = vmatprep.mubr.msk.bf16.mxu0 (!%p209_p3), %vm606_vm0, %v605_v1  ;;  %vm389_vm2 = vcmask (!%p209_p3), 388096   ;;  %vm391_vm3 = vcmask (!%p209_p3), 385024  }
   0x8   : > { %538 = vmatpush3.bf16.msra.mxu0 (!%p209_p3), %v571_v0 }
   0x9   : > { %539 = vmatprep.subr.bf16.mxu0 (!%p209_p3), %v605_v1 }
   0xc   : > { %540 = vmatpush3.bf16.msra.mxu0 (!%p209_p3), %v572_v2 }
   0xe   : > { %s692_s15 = smov (!%p255_p4, %s595_s15), 1 }
   0xf   : > { %s656_s23 = sshll.u32 %s692_s15, 3  ;;  %s276_s6 = scalar_lea.vmem %s685_s3, %s692_s15 }
  0x10   : > { %s262_s26 = scalar_lea.vmem %s682_s0, %s656_s23  ;;  %s272_s29 = scalar_lea.vmem %s683_s1, %s656_s23  ;;  %v518_v10 = vld [vmem:[%s276_s6] ss:$0 sm:$0xff] }
  0x11   : > { %v288_v3 = vld [vmem:[%s262_s26] sm:$0xf]  ;;  %v289_v4 = vld [vmem:[%s262_s26 + $0x4] sm:$0x1]  ;;  %s285_s9 = scalar_lea.vmem %s686_s4, %s656_s23 }
  0x12   : > { %v290_v5 = vld [vmem:[%s272_s29] sm:$0xf]  ;;  %v291_v6 = vld [vmem:[%s272_s29 + $0x4] sm:$0x1] }
  0x13   : > { %v292_v7 = vadd.bf16 %v290_v5, %v288_v3  ;;  %v293_v8 = vadd.bf16 %v291_v6, %v289_v4 }
  0x15   : > { %v519_v9 = vcombine.low %v292_v7, %v293_v8 }
  0x17   : > { %542 = vmatmul.mubr.msk.bf16.vlgmr.msra.gmra.mrb[0].mxu0 %vm322_vm1, %v519_v9 }
  0xea   : > { %v360_v11 = vpop.f32.mrb[0].mxu0 }
  0xeb   : > { %v361_v12 = vadd.f32 %v518_v10, %v360_v11  ;;  %v543_v13 = vpop.f32.mrb[1].mxu0 }
  0xec   : > { %v363_v14 = vpop.f32.mrb[2].mxu0 }
  0xed   : > { %v523_v15 = vmul.f32 -1.442695, %v361_v12  ;;  %v364_v16 = vadd.f32 %v518_v10, %v363_v14  ;;  %v544_v17 = vpop.f32.mrb[3].mxu0 }
  0xef   : > { %573 = vpow2.f32 %v523_v15  ;;  %v524_v18 = vmul.f32 -1.442695, %v364_v16 }
  0xf1   : > { %575 = vpow2.f32 %v524_v18 }
  0xf9   : > { %v574_v19 = vpop.eup %573 }
  0xfa   : > { %v373_v20 = vadd.f32 1.0, %v574_v19 }
  0xfb   : > { %v576_v21 = vpop.eup %575 }
  0xfc   : > { %577 = vrcp.f32 %v373_v20  ;;  %v374_v22 = vadd.f32 1.0, %v576_v21 }
  0xfe   : > { %579 = vrcp.f32 %v374_v22 }
 0x106   : > { %v578_v23 = vpop.eup %577 }
 0x107   : > { %v379_v24 = vmul.f32 %v578_v23, %v361_v12 }
 0x108   : > { %v580_v25 = vpop.eup %579 }
 0x109   : > { %v532_v26 = vpack.c.bf16 %v379_v24, %v379_v24  ;;  %v380_v27 = vmul.f32 %v580_v25, %v364_v16 }
 0x10b   : > { %390 = vst.msk [vmem:[%s285_s9] sm:$0xf] %vm389_vm2, %v532_v26  ;;  %v533_v28 = vpack.c.bf16 %v380_v27, %v380_v27 }
 0x10d   : > { %392 = vst.msk [vmem:[%s285_s9 + $0x4] sm:$0x1] %vm391_vm3, %v533_v28 }
 0x10e PF: > { %s14_s17 = sadd.s32 1, %s603_s17   ;;  %s687_s15 = smov %s599_s16 }
 0x10f   : > { %p11_p5 = scmp.ge.s32.totalorder %s14_s17, 4   ;;  %s688_s16 = smov %s690_s18 }
 0x111   :  { %13 = sbr.rel (!%p11_p5) target bundleno = 2 (0x2), region = 72 }

// kernel: dag_forward.17
= control target key start
LH: loop header
LB: loop body
LE: loop exit
PB: predicated region body
PF: predicated region fallthrough
CT: control target
= control target key end

     0   :  { %s631_s15 = smov 0   ;;  %s633_s16 = smov 0   ;;  %s703_s0 = inlined_call_operand.vmem [shape: bf16[2,2,64], index: 0, kind: input, shape index: {}]   ;;  %s704_s1 = inlined_call_operand.vmem [shape: bf16[2,2,64], index: 1, kind: input, shape index: {}]   ;;  %s705_s2 = inlined_call_operand.vmem [shape: bf16[64,160], index: 2, kind: input, shape index: {}]   ;;  %s706_s3 = inlined_call_operand.vmem [shape: f32[2,1,160], index: 3, kind: input, shape index: {}]   ;;  %s707_s4 = inlined_call_operand.vmem [shape: bf16[2,2,160], index: 4, kind: output, shape index: {}]  }
   0x1   :  { %s635_s17 = smov 0  }
   0x2 LB: > { %s26_s18 = sadd.s32 1, %s598_s16  ;;  %p517_p0 = scmp.ge.s32.totalorder %s602_s17, 1  ;;  %s602_s17 = sphi %s635_s17, %s14_s17   ;;  %s598_s16 = sphi %s633_s16, %s709_s16   ;;  %s594_s15 = sphi %s631_s15, %s708_s15  }
   0x3   : > { %p28_p1 = scmp.ge.s32.totalorder %s26_s18, 2  ;;  %p201_p2 = scmp.lt.s32.totalorder %s602_s17, 3 }
   0x5   : > { %s711_s18 = smov (%p28_p1, %s26_s18), 0  ;;  %p202_p3 = pnand %p517_p0, %p201_p2 }
   0x6   : > { %v560_v0 = vld [vmem:[%s705_s2 + $0x4] ss:$8 sps:$4 sm:$0xff] (!%p202_p3)   ;;  %p241_p4 = scmp.lt.s32.totalorder (!%p202_p3), %s594_s15, 1  ;;  %v562_v1 = vld [vmem:[%s705_s2] ss:$8 sps:$4 sm:$0xff] (!%p202_p3)   ;;  %v604_v2 = vmov (!%p202_p3), 0   ;;  %v279_v12 = vlaneseq (!%p202_p3) }
   0x7   : > { %205 = sbr.rel (%p202_p3) target bundleno = 273 (0x111), region = 36  ;;  %365 = vmatprep.mubr.bf16.mxu0 (!%p202_p3), %v604_v2  ;;  %333 = vmatprep.subr.bf16.mxu0 (!%p202_p3), %v560_v0  ;;  %v563_v3 = vld [vmem:[%s705_s2 + $0x14] ss:$8 sps:$4 sm:$0xff] (!%p202_p3)   ;;  %v565_v4 = vld [vmem:[%s705_s2 + $0x10] ss:$8 sps:$4 sm:$0xff] (!%p202_p3)   ;;  %vm329_vm0 = vcmask (!%p202_p3), 523264  }
   0x8   : > { %334 = vmatpush1.bf16.msra.mxu0 (!%p202_p3), %v562_v1  ;;  %v566_v5 = vld [vmem:[%s705_s2 + $0x24] ss:$8 sps:$4 sm:$0xff] (!%p202_p3)   ;;  %v568_v6 = vld [vmem:[%s705_s2 + $0x20] ss:$8 sps:$4 sm:$0xff] (!%p202_p3)   ;;  %v569_v7 = vld [vmem:[%s705_s2 + $0x34] ss:$8 sps:$4 sm:$0xff] (!%p202_p3)  }
   0x9   : > { %335 = vmatprep.subr.bf16.mxu0 (!%p202_p3), %v563_v3  ;;  %v571_v8 = vld [vmem:[%s705_s2 + $0x30] ss:$8 sps:$4 sm:$0xff] (!%p202_p3)   ;;  %v280_v13 = vshrl.u32 (!%p202_p3), %v279_v12, 7  ;;  %v605_v31 = vmov (!%p202_p3), 1966171168   ;;  %vm408_vm1 = vcmask (!%p202_p3), 1040384  }
   0xa   : > { %v394_v32 = vunpack.c.l.s4 (!%p202_p3), %v605_v31  ;;  %vm409_vm2 = vcmask (!%p202_p3), 254977  }
   0xb   : > { %v281_v14 = vsub.s32 (!%p202_p3), 0, %v280_v13  ;;  %v285_v16 = vsub.s32 (!%p202_p3), 1, %v280_v13  ;;  %vm410_vm3 = vmor (!%p202_p3), %vm409_vm2, %vm408_vm1 }
   0xc   : > { %336 = vmatpush1.bf16.msra.mxu0 (!%p202_p3), %v565_v4  ;;  %v395_v33 = vunpack.c.0.s8 (!%p202_p3), %v394_v32 }
   0xd   : > { %337 = vmatprep.subr.bf16.mxu0 (!%p202_p3), %v566_v5 }
   0xe   : > { %s713_s15 = smov (!%p241_p4, %s594_s15), 1  ;;  %v398_v38 = vsub.s32 %v395_v33, %v280_v13 }
   0xf   : > { %s246_s9 = scalar_lea.vmem %s703_s0, %s713_s15  ;;  %s252_s12 = scalar_lea.vmem %s704_s1, %s713_s15 }
  0x10   : > { %338 = vmatpush1.bf16.msra.mxu0 %v568_v6  ;;  %v266_v9 = vld [vmem:[%s246_s9] sm:$0x1]  ;;  %s518_s19 = sshll.u32 %s713_s15, 1 }
  0x11   : > { %v267_v10 = vld [vmem:[%s252_s12] sm:$0x1]  ;;  %339 = vmatprep.subr.bf16.mxu0 %v569_v7  ;;  %s256_s22 = scalar_lea.vmem %s706_s3, %s518_s19  ;;  %s264_s25 = scalar_lea.vmem %s707_s4, %s518_s19 }
  0x12   : > { %v268_v11 = vadd.bf16 %v267_v10, %v266_v9  ;;  %v277_v15 = vld [vmem:[%s256_s22] sm:$0x3] }
  0x13   : > { %v282_v17 = vrot.slane %v277_v15, %v281_v14  ;;  %v286_v18 = vrot.slane %v277_v15, %v285_v16 }
  0x14   : > { %340 = vmatpush1.bf16.msra.mxu0 %v571_v8 }
  0x17   : > { %528 = vmatmul.mubr.msk.bf16.vlgmr.msra.gmra.mrb[0].mxu0 %vm329_vm0, %v268_v11 }
  0xea   : > { %v367_v19 = vpop.f32.mrb[0].mxu0 }
  0xeb   : > { %v368_v20 = vadd.f32 %v367_v19, %v282_v17  ;;  %v369_v21 = vpop.f32.mrb[1].mxu0 }
  0xec   : > { %v370_v22 = vadd.f32 %v369_v21, %v286_v18  ;;  %v371_v23 = vpop.f32.mrb[2].mxu0 }
  0xed   : > { %v529_v24 = vmul.f32 -1.442695, %v368_v20  ;;  %v372_v25 = vpop.f32.mrb[3].mxu0 }
  0xee   : > { %v530_v26 = vmul.f32 -1.442695, %v370_v22 }
  0xef   : > { %572 = vpow2.f32 %v529_v24 }
  0xf0   : > { %574 = vpow2.f32 %v530_v26 }
  0xf9   : > { %v573_v27 = vpop.eup %572 }
  0xfa   : > { %v575_v28 = vpop.eup %574  ;;  %v380_v29 = vadd.f32 1.0, %v573_v27 }
  0xfb   : > { %v381_v30 = vadd.f32 1.0, %v575_v28 }
  0xfc   : > { %576 = vrcp.f32 %v380_v29 }
  0xfd   : > { %578 = vrcp.f32 %v381_v30 }
 0x106   : > { %v577_v34 = vpop.eup %576 }
 0x107   : > { %v579_v35 = vpop.eup %578  ;;  %v386_v36 = vmul.f32 %v577_v34, %v368_v20 }
 0x108   : > { %v387_v37 = vmul.f32 %v579_v35, %v370_v22 }
 0x10a   : > { %v531_v39 = vpack.c.bf16 %v387_v37, %v386_v36 }
 0x10c   : > { %v399_v40 = vrot.slane %v531_v39, %v398_v38 }
 0x10e   : > { %v406_v41 = vrot.slane %v399_v40, %v398_v38 }
 0x110   : > { %411 = vst.msk [vmem:[%s264_s25] sm:$0x3] %vm410_vm3, %v406_v41 }
 0x111 PF: > { %s14_s17 = sadd.s32 1, %s602_s17   ;;  %s708_s15 = smov %s598_s16 }
 0x112   : > { %p11_p5 = scmp.ge.s32.totalorder %s14_s17, 4   ;;  %s709_s16 = smov %s711_s18 }
 0x114   :  { %13 = sbr.rel (!%p11_p5) target bundleno = 2 (0x2), region = 72 }

// kernel: dag_forward.19
= control target key start
LH: loop header
LB: loop body
LE: loop exit
PB: predicated region body
PF: predicated region fallthrough
CT: control target
= control target key end

     0   :  { %s678_s15 = smov 0   ;;  %s680_s16 = smov 0   ;;  %s725_s0 = inlined_call_operand.vmem [shape: bf16[2,30,16], index: 0, kind: input, shape index: {}]   ;;  %s726_s1 = inlined_call_operand.vmem [shape: bf16[2,30,16], index: 1, kind: input, shape index: {}]   ;;  %s727_s2 = inlined_call_operand.vmem [shape: bf16[16,48], index: 2, kind: input, shape index: {}]   ;;  %s728_s3 = inlined_call_operand.vmem [shape: f32[2,1,48], index: 3, kind: input, shape index: {}]   ;;  %s729_s4 = inlined_call_operand.vmem [shape: bf16[2,30,48], index: 4, kind: output, shape index: {}]  }
   0x1   :  { %s682_s17 = smov 0  }
   0x2 LB: > { %s26_s18 = sadd.s32 1, %s647_s16  ;;  %p549_p0 = scmp.ge.s32.totalorder %s651_s17, 1  ;;  %s651_s17 = sphi %s682_s17, %s14_s17   ;;  %s647_s16 = sphi %s680_s16, %s731_s16   ;;  %s643_s15 = sphi %s678_s15, %s730_s15  }
   0x3   : > { %p28_p1 = scmp.ge.s32.totalorder %s26_s18, 2  ;;  %p208_p2 = scmp.lt.s32.totalorder %s651_s17, 3 }
   0x5   : > { %s733_s18 = smov (%p28_p1, %s26_s18), 0  ;;  %p209_p3 = pnand %p549_p0, %p208_p2 }
   0x6   : > { %v612_v0 = vld [vmem:[%s727_s2] sm:$0xff] (!%p209_p3)   ;;  %p255_p4 = scmp.lt.s32.totalorder (!%p209_p3), %s643_s15, 1  ;;  %vm325_vm0 = vcmask (!%p209_p3), 130048   ;;  %vm425_vm1 = vcmask (!%p209_p3), 388096   ;;  %vm429_vm2 = vcmask (!%p209_p3), 387072  }
   0x7   : > { %212 = sbr.rel (%p209_p3) target bundleno = 272 (0x110), region = 36  ;;  %582 = vmatprep.subr.bf16.mxu0 (!%p209_p3), %v612_v0 }
   0x8   : > { %583 = vmatpush3.bf16.msra.mxu0 (!%p209_p3), %v612_v0 }
   0xe   : > { %s735_s15 = smov (!%p255_p4, %s643_s15), 1 }
   0xf   : > { %s699_s21 = sshll.u32 %s735_s15, 4  ;;  %s276_s30 = scalar_lea.vmem %s728_s3, %s735_s15 }
  0x10   : > { %s262_s24 = scalar_lea.vmem %s725_s0, %s699_s21  ;;  %s272_s27 = scalar_lea.vmem %s726_s1, %s699_s21  ;;  %v556_v15 = vld [vmem:[%s276_s30] ss:$0 sm:$0xff] }
  0x11   : > { %v288_v1 = vld [vmem:[%s262_s24] sm:$0xf]  ;;  %v289_v2 = vld [vmem:[%s262_s24 + $0x4] sm:$0xf]  ;;  %v290_v6 = vld [vmem:[%s262_s24 + $0x8] sm:$0xf]  ;;  %s285_s7 = scalar_lea.vmem %s729_s4, %s699_s21 }
  0x12   : > { %v292_v3 = vld [vmem:[%s272_s27] sm:$0xf]  ;;  %v293_v4 = vld [vmem:[%s272_s27 + $0x4] sm:$0xf]  ;;  %v291_v7 = vld [vmem:[%s262_s24 + $0xc] sm:$0x7] }
  0x13   : > { %v296_v5 = vadd.bf16 %v292_v3, %v288_v1  ;;  %v297_v8 = vadd.bf16 %v293_v4, %v289_v2  ;;  %v294_v9 = vld [vmem:[%s272_s27 + $0x8] sm:$0xf]  ;;  %v295_v10 = vld [vmem:[%s272_s27 + $0xc] sm:$0x7] }
  0x14   : > { %v298_v11 = vadd.bf16 %v294_v9, %v290_v6  ;;  %v299_v12 = vadd.bf16 %v295_v10, %v291_v7 }
  0x15   : > { %v557_v13 = vcombine.low %v296_v5, %v297_v8 }
  0x16   : > { %v558_v14 = vcombine.low %v298_v11, %v299_v12 }
  0x17   : > { %584 = vmatprep.mubr.msk.bf16.mxu0 %vm325_vm0, %v557_v13 }
  0x18   : > { %585 = vmatmul.mubr.msk.bf16.vlgmr.msra.gmra.mrb[0].mxu0 %vm325_vm0, %v558_v14 }
  0xeb   : > { %v586_v16 = vpop.f32.mrb[0].mxu0 }
  0xec   : > { %v375_v17 = vadd.f32 %v586_v16, %v556_v15  ;;  %v366_v18 = vpop.f32.mrb[1].mxu0 }
  0xed   : > { %v367_v19 = vadd.f32 %v556_v15, %v366_v18  ;;  %v587_v20 = vpop.f32.mrb[2].mxu0 }
  0xee   : > { %v564_v21 = vmul.f32 -1.442695, %v375_v17  ;;  %v378_v22 = vadd.f32 %v587_v20, %v556_v15  ;;  %v369_v23 = vpop.f32.mrb[3].mxu0 }
  0xef   : > { %v562_v24 = vmul.f32 -1.442695, %v367_v19  ;;  %v370_v25 = vadd.f32 %v556_v15, %v369_v23 }
  0xf0   : > { %613 = vpow2.f32 %v564_v21  ;;  %v565_v26 = vmul.f32 -1.442695, %v378_v22 }
  0xf1   : > { %615 = vpow2.f32 %v562_v24  ;;  %v563_v27 = vmul.f32 -1.442695, %v370_v25 }
  0xf2   : > { %617 = vpow2.f32 %v565_v26 }
  0xf3   : > { %619 = vpow2.f32 %v563_v27 }
  0xfa   : > { %v614_v28 = vpop.eup %613 }
  0xfb   : > { %v616_v29 = vpop.eup %615  ;;  %v395_v30 = vadd.f32 1.0, %v614_v28 }
  0xfc   : > { %v618_v31 = vpop.eup %617  ;;  %v393_v32 = vadd.f32 1.0, %v616_v29 }
  0xfd   : > { %v620_v33 = vpop.eup %619  ;;  %621 = vrcp.f32 %v395_v30  ;;  %v396_v34 = vadd.f32 1.0, %v618_v31 }
  0xfe   : > { %623 = vrcp.f32 %v393_v32  ;;  %v394_v35 = vadd.f32 1.0, %v620_v33 }
  0xff   : > { %625 = vrcp.f32 %v396_v34 }
 0x100   : > { %627 = vrcp.f32 %v394_v35 }
 0x107   : > { %v622_v36 = vpop.eup %621 }
 0x108   : > { %v624_v37 = vpop.eup %623  ;;  %v407_v38 = vmul.f32 %v622_v36, %v375_v17 }
 0x109   : > { %v626_v39 = vpop.eup %625  ;;  %v405_v40 = vmul.f32 %v624_v37, %v367_v19 }
 0x10a   : > { %v628_v41 = vpop.eup %627  ;;  %v577_v42 = vpack.c.bf16 %v407_v38, %v407_v38  ;;  %v408_v43 = vmul.f32 %v626_v39, %v378_v22 }
 0x10b   : > { %v575_v44 = vpack.c.bf16 %v405_v40, %v405_v40  ;;  %v406_v45 = vmul.f32 %v628_v41, %v370_v25 }
 0x10c   : > { %428 = vst.msk [vmem:[%s285_s7 + $0x8] sm:$0xf] %vm425_vm1, %v577_v42  ;;  %v578_v46 = vpack.c.bf16 %v408_v43, %v408_v43 }
 0x10d   : > { %426 = vst.msk [vmem:[%s285_s7] sm:$0xf] %vm425_vm1, %v575_v44  ;;  %v576_v47 = vpack.c.bf16 %v406_v45, %v406_v45 }
 0x10e   : > { %430 = vst.msk [vmem:[%s285_s7 + $0xc] sm:$0x7] %vm429_vm2, %v578_v46 }
 0x10f   : > { %427 = vst.msk [vmem:[%s285_s7 + $0x4] sm:$0xf] %vm425_vm1, %v576_v47 }
 0x110 PF: > { %s14_s17 = sadd.s32 1, %s651_s17   ;;  %s730_s15 = smov %s647_s16 }
 0x111   : > { %p11_p5 = scmp.ge.s32.totalorder %s14_s17, 4   ;;  %s731_s16 = smov %s733_s18 }
 0x113   :  { %13 = sbr.rel (!%p11_p5) target bundleno = 2 (0x2), region = 72 }

// kernel: dag_forward.20
= control target key start
LH: loop header
LB: loop body
LE: loop exit
PB: predicated region body
PF: predicated region fallthrough
CT: control target
= control target key end

     0   :  { %s935_s15 = smov 0   ;;  %s937_s16 = smov 0   ;;  %s1093_s0 = inlined_call_operand.vmem [shape: bf16[2,90,16], index: 0, kind: input, shape index: {}]   ;;  %s1094_s1 = inlined_call_operand.vmem [shape: bf16[2,90,16], index: 1, kind: input, shape index: {}]   ;;  %s1095_s2 = inlined_call_operand.vmem [shape: bf16[16,16], index: 2, kind: input, shape index: {}]   ;;  %s1096_s3 = inlined_call_operand.vmem [shape: f32[2,1,16], index: 3, kind: input, shape index: {}]   ;;  %s1097_s4 = inlined_call_operand.vmem [shape: bf16[2,90,16], index: 4, kind: output, shape index: {}]  }
   0x1   :  { %s939_s17 = smov 0  }
   0x2 LB: > { %s26_s18 = sadd.s32 1, %s904_s16  ;;  %p733_p0 = scmp.ge.s32.totalorder %s908_s17, 1  ;;  %s908_s17 = sphi %s939_s17, %s14_s17   ;;  %s904_s16 = sphi %s937_s16, %s1099_s16   ;;  %s900_s15 = sphi %s935_s15, %s1098_s15  }
   0x3   : > { %p28_p1 = scmp.ge.s32.totalorder %s26_s18, 2  ;;  %p208_p2 = scmp.lt.s32.totalorder %s908_s17, 3 }
   0x5   : > { %s1101_s18 = smov (%p28_p1, %s26_s18), 0  ;;  %p209_p3 = pnand %p733_p0, %p208_p2 }
   0x6   : > { %v837_v0 = vld [vmem:[%s1095_s2] sm:$0xff] (!%p209_p3)   ;;  %p255_p4 = scmp.lt.s32.totalorder (!%p209_p3), %s900_s15, 1  ;;  %vm369_vm0 = vcmask (!%p209_p3), 130048   ;;  %vm601_vm1 = vcmask (!%p209_p3), 125952   ;;  %vm613_vm2 = vcmask (!%p209_p3), 122880  }
   0x7   : > { %212 = sbr.rel (%p209_p3) target bundleno = 293 (0x125), region = 36  ;;  %796 = vmatprep.subr.bf16.mxu0 (!%p209_p3), %v837_v0  ;;  %810 = vmatprep.subr.bf16.mxu1 (!%p209_p3), %v837_v0 }
   0x8   : > { %797 = vmatpush3.bf16.msra.mxu0 (!%p209_p3), %v837_v0  ;;  %811 = vmatpush3.bf16.msra.mxu1 (!%p209_p3), %v837_v0 }
   0xe   : > { %s1103_s15 = smov (!%p255_p4, %s900_s15), 1 }
   0xf   : > { %s959_s21 = smul.u32 48, %s1103_s15  ;;  %s276_s30 = scalar_lea.vmem %s1096_s3, %s1103_s15 }
  0x10   : > { %v737_v43 = vld [vmem:[%s276_s30] ss:$0 sm:$0xff] }
  0x11   : > { %s965_s24 = scalar_lea.vmem %s1093_s0, %s959_s21  ;;  %s971_s27 = scalar_lea.vmem %s1094_s1, %s959_s21 }
  0x12   : > { %v288_v1 = vld [vmem:[%s965_s24] sm:$0xf]  ;;  %v289_v2 = vld [vmem:[%s965_s24 + $0x4] sm:$0xf]  ;;  %v292_v6 = vld [vmem:[%s965_s24 + $0x10] sm:$0xf]  ;;  %s1048_s7 = scalar_lea.vmem %s1097_s4, %s959_s21 }
  0x13   : > { %v300_v3 = vld [vmem:[%s971_s27] sm:$0xf]  ;;  %v301_v4 = vld [vmem:[%s971_s27 + $0x4] sm:$0xf]  ;;  %v293_v7 = vld [vmem:[%s965_s24 + $0x14] sm:$0xf] }
  0x14   : > { %v312_v5 = vadd.bf16 %v300_v3, %v288_v1  ;;  %v313_v8 = vadd.bf16 %v301_v4, %v289_v2  ;;  %v304_v9 = vld [vmem:[%s971_s27 + $0x10] sm:$0xf]  ;;  %v305_v10 = vld [vmem:[%s971_s27 + $0x14] sm:$0xf]  ;;  %v290_v11 = vld [vmem:[%s965_s24 + $0x8] sm:$0xf] }
  0x15   : > { %v316_v12 = vadd.bf16 %v304_v9, %v292_v6  ;;  %v317_v13 = vadd.bf16 %v305_v10, %v293_v7  ;;  %v291_v14 = vld [vmem:[%s965_s24 + $0xc] sm:$0xf]  ;;  %v302_v15 = vld [vmem:[%s971_s27 + $0x8] sm:$0xf]  ;;  %v294_v20 = vld [vmem:[%s965_s24 + $0x18] sm:$0xf] }
  0x16   : > { %v303_v16 = vld [vmem:[%s971_s27 + $0xc] sm:$0xf]  ;;  %v738_v17 = vcombine.low %v312_v5, %v313_v8  ;;  %v314_v18 = vadd.bf16 %v302_v15, %v290_v11  ;;  %v295_v21 = vld [vmem:[%s965_s24 + $0x1c] sm:$0xf]  ;;  %v306_v22 = vld [vmem:[%s971_s27 + $0x18] sm:$0xf] }
  0x17   : > { %v315_v19 = vadd.bf16 %v303_v16, %v291_v14  ;;  %v740_v23 = vcombine.low %v316_v12, %v317_v13  ;;  %v307_v24 = vld [vmem:[%s971_s27 + $0x1c] sm:$0xf]  ;;  %v318_v25 = vadd.bf16 %v306_v22, %v294_v20  ;;  %v296_v26 = vld [vmem:[%s965_s24 + $0x20] sm:$0xf]  ;;  %v297_v27 = vld [vmem:[%s965_s24 + $0x24] sm:$0xf] }
  0x18   : > { %798 = vmatprep.mubr.msk.bf16.mxu0 %vm369_vm0, %v738_v17  ;;  %v319_v29 = vadd.bf16 %v307_v24, %v295_v21  ;;  %v308_v30 = vld [vmem:[%s971_s27 + $0x20] sm:$0xf]  ;;  %v309_v31 = vld [vmem:[%s971_s27 + $0x24] sm:$0xf]  ;;  %v298_v32 = vld [vmem:[%s965_s24 + $0x28] sm:$0xf] }
  0x19   : > { %v739_v28 = vcombine.low %v314_v18, %v315_v19  ;;  %802 = vmatprep.mubr.msk.bf16.mxu1 %vm369_vm0, %v740_v23  ;;  %v320_v33 = vadd.bf16 %v308_v30, %v296_v26  ;;  %v321_v34 = vadd.bf16 %v309_v31, %v297_v27  ;;  %v299_v35 = vld [vmem:[%s965_s24 + $0x2c] sm:$0x1]  ;;  %v310_v36 = vld [vmem:[%s971_s27 + $0x28] sm:$0xf] }
  0x1a   : > { %v311_v37 = vld [vmem:[%s971_s27 + $0x2c] sm:$0x1]  ;;  %v741_v38 = vcombine.low %v318_v25, %v319_v29  ;;  %v322_v40 = vadd.bf16 %v310_v36, %v298_v32 }
  0x1b   : > { %799 = vmatmul.mubr.msk.bf16.vlgmr.msra.gmra.mrb[0].mxu0 %vm369_vm0, %v739_v28  ;;  %v742_v39 = vcombine.low %v320_v33, %v321_v34  ;;  %v323_v41 = vadd.bf16 %v311_v37, %v299_v35 }
  0x1c   : > { %803 = vmatmul.mubr.msk.bf16.vlgmr.msra.gmra.mrb[0].mxu1 %vm369_vm0, %v741_v38 }
  0x1d   : > { %806 = vmatprep.mubr.msk.bf16.mxu1 %vm369_vm0, %v742_v39  ;;  %v743_v42 = vcombine.low %v322_v40, %v323_v41 }
  0x24   : > { %807 = vmatmul.mubr.msk.bf16.gmra.mrb[4].mxu1 %vm369_vm0, %v743_v42 }
  0xee   : > { %v800_v44 = vpop.f32.mrb[0].mxu0 }
  0xef   : > { %v1007_v45 = vadd.f32 %v800_v44, %v737_v43  ;;  %v422_v46 = vpop.f32.mrb[1].mxu0  ;;  %v804_v47 = vpop.f32.mrb[0].mxu1 }
  0xf0   : > { %v1009_v48 = vadd.f32 %v737_v43, %v422_v46  ;;  %v801_v49 = vpop.f32.mrb[2].mxu0  ;;  %v1012_v51 = vadd.f32 %v804_v47, %v737_v43  ;;  %v438_v52 = vpop.f32.mrb[1].mxu1 }
  0xf1   : > { %v753_v50 = vmul.f32 -1.442695, %v1007_v45  ;;  %v1014_v53 = vadd.f32 %v801_v49, %v737_v43  ;;  %v425_v54 = vpop.f32.mrb[3].mxu0  ;;  %v1017_v56 = vadd.f32 %v737_v43, %v438_v52  ;;  %v805_v57 = vpop.f32.mrb[2].mxu1 }
  0xf2   : > { %v751_v55 = vmul.f32 -1.442695, %v1009_v48  ;;  %v1019_v58 = vadd.f32 %v737_v43, %v425_v54  ;;  %v757_v59 = vmul.f32 -1.442695, %v1012_v51  ;;  %v1023_v61 = vadd.f32 %v805_v57, %v737_v43  ;;  %v441_v62 = vpop.f32.mrb[3].mxu1 }
  0xf3   : > { %838 = vpow2.f32 %v753_v50  ;;  %v754_v60 = vmul.f32 -1.442695, %v1014_v53  ;;  %v755_v63 = vmul.f32 -1.442695, %v1017_v56  ;;  %v1026_v0 = vadd.f32 %v737_v43, %v441_v62 }
  0xf4   : > { %840 = vpow2.f32 %v751_v55  ;;  %v758_v1 = vmul.f32 -1.442695, %v1023_v61  ;;  %v752_v2 = vmul.f32 -1.442695, %v1019_v58 }
  0xf5   : > { %842 = vpow2.f32 %v757_v59  ;;  %v756_v3 = vmul.f32 -1.442695, %v1026_v0 }
  0xf6   : > { %844 = vpow2.f32 %v755_v63 }
  0xf7   : > { %846 = vpow2.f32 %v754_v60  ;;  %v808_v4 = vpop.f32.mrb[4].mxu1 }
  0xf8   : > { %848 = vpow2.f32 %v758_v1  ;;  %v1031_v5 = vadd.f32 %v808_v4, %v737_v43  ;;  %v454_v6 = vpop.f32.mrb[5].mxu1 }
  0xf9   : > { %850 = vpow2.f32 %v752_v2  ;;  %v1033_v7 = vadd.f32 %v737_v43, %v454_v6  ;;  %v809_v8 = vpop.f32.mrb[6].mxu1 }
  0xfa   : > { %852 = vpow2.f32 %v756_v3  ;;  %v761_v9 = vmul.f32 -1.442695, %v1031_v5  ;;  %v1036_v10 = vadd.f32 %v809_v8, %v737_v43  ;;  %v457_v11 = vpop.f32.mrb[7].mxu1 }
  0xfb   : > { %v759_v12 = vmul.f32 -1.442695, %v1033_v7  ;;  %v1039_v13 = vadd.f32 %v737_v43, %v457_v11 }
  0xfc   : > { %854 = vpow2.f32 %v761_v9  ;;  %v762_v15 = vmul.f32 -1.442695, %v1036_v10 }
  0xfd   : > { %v839_v14 = vpop.eup %838  ;;  %856 = vpow2.f32 %v759_v12  ;;  %v760_v30 = vmul.f32 -1.442695, %v1039_v13 }
  0xfe   : > { %v841_v16 = vpop.eup %840  ;;  %v507_v17 = vadd.f32 1.0, %v839_v14  ;;  %858 = vpow2.f32 %v762_v15 }
  0xff   : > { %v843_v18 = vpop.eup %842  ;;  %v505_v19 = vadd.f32 1.0, %v841_v16 }
 0x100   : > { %v845_v20 = vpop.eup %844  ;;  %860 = vrcp.f32 %v507_v17  ;;  %v511_v21 = vadd.f32 1.0, %v843_v18 }
 0x101   : > { %v847_v22 = vpop.eup %846  ;;  %862 = vrcp.f32 %v505_v19  ;;  %v509_v23 = vadd.f32 1.0, %v845_v20 }
 0x102   : > { %v849_v24 = vpop.eup %848  ;;  %864 = vrcp.f32 %v511_v21  ;;  %v508_v25 = vadd.f32 1.0, %v847_v22 }
 0x103   : > { %v851_v26 = vpop.eup %850  ;;  %866 = vrcp.f32 %v509_v23  ;;  %v512_v27 = vadd.f32 1.0, %v849_v24 }
 0x104   : > { %v853_v28 = vpop.eup %852  ;;  %868 = vrcp.f32 %v508_v25  ;;  %v506_v29 = vadd.f32 1.0, %v851_v26 }
 0x105   : > { %870 = vrcp.f32 %v512_v27  ;;  %v510_v31 = vadd.f32 1.0, %v853_v28 }
 0x106   : > { %872 = vrcp.f32 %v506_v29  ;;  %v855_v32 = vpop.eup %854 }
 0x107   : > { %874 = vrcp.f32 %v510_v31  ;;  %v857_v33 = vpop.eup %856  ;;  %v515_v34 = vadd.f32 1.0, %v855_v32 }
 0x108   : > { %876 = vpow2.f32 %v760_v30  ;;  %v859_v35 = vpop.eup %858  ;;  %v513_v36 = vadd.f32 1.0, %v857_v33 }
 0x109   : > { %878 = vrcp.f32 %v515_v34  ;;  %v516_v38 = vadd.f32 1.0, %v859_v35 }
 0x10a   : > { %v861_v37 = vpop.eup %860  ;;  %880 = vrcp.f32 %v513_v36 }
 0x10b   : > { %v863_v39 = vpop.eup %862  ;;  %v543_v40 = vmul.f32 %v861_v37, %v1007_v45  ;;  %882 = vrcp.f32 %v516_v38 }
 0x10c   : > { %v865_v41 = vpop.eup %864  ;;  %v541_v42 = vmul.f32 %v863_v39, %v1009_v48 }
 0x10d   : > { %v867_v43 = vpop.eup %866  ;;  %v779_v44 = vpack.c.bf16 %v543_v40, %v543_v40  ;;  %v547_v46 = vmul.f32 %v865_v41, %v1012_v51 }
 0x10e   : > { %v869_v47 = vpop.eup %868  ;;  %v777_v45 = vpack.c.bf16 %v541_v42, %v541_v42  ;;  %v545_v49 = vmul.f32 %v867_v43, %v1017_v56 }
 0x10f   : > { %v871_v50 = vpop.eup %870  ;;  %604 = vst.msk [vmem:[%s1048_s7 + $0x8] sm:$0xf] %vm601_vm1, %v779_v44  ;;  %v783_v52 = vpack.c.bf16 %v547_v46, %v547_v46  ;;  %v544_v54 = vmul.f32 %v869_v47, %v1014_v53 }
 0x110   : > { %v873_v55 = vpop.eup %872  ;;  %602 = vst.msk [vmem:[%s1048_s7] sm:$0xf] %vm601_vm1, %v777_v45  ;;  %v781_v48 = vpack.c.bf16 %v545_v49, %v545_v49  ;;  %v548_v57 = vmul.f32 %v871_v50, %v1023_v61 }
 0x111   : > { %v875_v51 = vpop.eup %874  ;;  %608 = vst.msk [vmem:[%s1048_s7 + $0x18] sm:$0xf] %vm601_vm1, %v783_v52  ;;  %v780_v59 = vpack.c.bf16 %v544_v54, %v544_v54  ;;  %v542_v56 = vmul.f32 %v873_v55, %v1019_v58 }
 0x112   : > { %v877_v60 = vpop.eup %876  ;;  %606 = vst.msk [vmem:[%s1048_s7 + $0x10] sm:$0xf] %vm601_vm1, %v781_v48  ;;  %v784_v62 = vpack.c.bf16 %v548_v57, %v548_v57  ;;  %v546_v53 = vmul.f32 %v875_v51, %v1026_v0 }
 0x113   : > { %605 = vst.msk [vmem:[%s1048_s7 + $0xc] sm:$0xf] %vm601_vm1, %v780_v59  ;;  %v778_v63 = vpack.c.bf16 %v542_v56, %v542_v56  ;;  %v514_v1 = vadd.f32 1.0, %v877_v60  ;;  %v879_v61 = vpop.eup %878 }
 0x114   : > { %609 = vst.msk [vmem:[%s1048_s7 + $0x1c] sm:$0xf] %vm601_vm1, %v784_v62  ;;  %v782_v2 = vpack.c.bf16 %v546_v53, %v546_v53  ;;  %v881_v3 = vpop.eup %880  ;;  %v551_v58 = vmul.f32 %v879_v61, %v1031_v5 }
 0x115   : > { %603 = vst.msk [vmem:[%s1048_s7 + $0x4] sm:$0xf] %vm601_vm1, %v778_v63  ;;  %884 = vrcp.f32 %v514_v1  ;;  %v883_v4 = vpop.eup %882  ;;  %v549_v0 = vmul.f32 %v881_v3, %v1033_v7 }
 0x116   : > { %607 = vst.msk [vmem:[%s1048_s7 + $0x14] sm:$0xf] %vm601_vm1, %v782_v2  ;;  %v787_v6 = vpack.c.bf16 %v551_v58, %v551_v58  ;;  %v552_v8 = vmul.f32 %v883_v4, %v1036_v10 }
 0x117   : > { %v785_v9 = vpack.c.bf16 %v549_v0, %v549_v0 }
 0x118   : > { %612 = vst.msk [vmem:[%s1048_s7 + $0x28] sm:$0xf] %vm601_vm1, %v787_v6  ;;  %v788_v11 = vpack.c.bf16 %v552_v8, %v552_v8 }
 0x119   : > { %610 = vst.msk [vmem:[%s1048_s7 + $0x20] sm:$0xf] %vm601_vm1, %v785_v9 }
 0x11a   : > { %614 = vst.msk [vmem:[%s1048_s7 + $0x2c] sm:$0x1] %vm613_vm2, %v788_v11 }
 0x11f   : > { %v885_v12 = vpop.eup %884 }
 0x120   : > { %v550_v5 = vmul.f32 %v885_v12, %v1039_v13 }
 0x122   : > { %v786_v14 = vpack.c.bf16 %v550_v5, %v550_v5 }
 0x124   : > { %611 = vst.msk [vmem:[%s1048_s7 + $0x24] sm:$0xf] %vm601_vm1, %v786_v14 }
 0x125 PF: > { %s14_s17 = sadd.s32 1, %s908_s17   ;;  %s1098_s15 = smov %s904_s16 }
 0x126   : > { %p11_p5 = scmp.ge.s32.totalorder %s14_s17, 4   ;;  %s1099_s16 = smov %s1101_s18 }
 0x128   :  { %13 = sbr.rel (!%p11_p5) target bundleno = 2 (0x2), region = 72 }

// kernel: dag_forward.21
= control target key start
LH: loop header
LB: loop body
LE: loop exit
PB: predicated region body
PF: predicated region fallthrough
CT: control target
= control target key end

     0   :  { %s1160_s15 = smov 0   ;;  %s1162_s16 = smov 0   ;;  %s1433_s0 = inlined_call_operand.vmem [shape: bf16[2,180,8], index: 0, kind: input, shape index: {}]   ;;  %s1434_s1 = inlined_call_operand.vmem [shape: bf16[2,180,8], index: 1, kind: input, shape index: {}]   ;;  %s1435_s2 = inlined_call_operand.vmem [shape: bf16[8,2], index: 2, kind: input, shape index: {}]   ;;  %s1436_s3 = inlined_call_operand.vmem [shape: f32[2,1,2], index: 3, kind: input, shape index: {}]   ;;  %s1437_s4 = inlined_call_operand.vmem [shape: f32[2,180,2], index: 4, kind: output, shape index: {}]  }
   0x1   :  { %s1164_s17 = smov 0  }
   0x2 LB: > { %s26_s18 = sadd.s32 1, %s1129_s16  ;;  %p896_p0 = scmp.ge.s32.totalorder %s1133_s17, 1  ;;  %s1133_s17 = sphi %s1164_s17, %s14_s17   ;;  %s1129_s16 = sphi %s1162_s16, %s1439_s16   ;;  %s1125_s15 = sphi %s1160_s15, %s1438_s15  }
   0x3   : > { %p28_p1 = scmp.ge.s32.totalorder %s26_s18, 2  ;;  %p208_p2 = scmp.lt.s32.totalorder %s1133_s17, 3 }
   0x5   : > { %s1441_s18 = smov (%p28_p1, %s26_s18), 0  ;;  %p209_p3 = pnand %p896_p0, %p208_p2 }
   0x6   : > { %v357_v0 = vld [vmem:[%s1435_s2] sm:$0xf] (!%p209_p3)  ;;  %vm460_vm0 = vcmask (!%p209_p3), 1043456   ;;  %p255_p4 = scmp.lt.s32.totalorder (!%p209_p3), %s1125_s15, 1  ;;  %vm423_vm1 = vcmask (!%p209_p3), 64512   ;;  %vm753_vm2 = vcmask (!%p209_p3), 15360  }
   0x7   : > { %212 = sbr.rel (%p209_p3) target bundleno = 306 (0x132), region = 36  ;;  %991 = vmatprep.subr.msk.bf16.mxu0 (!%p209_p3), %vm460_vm0, %v357_v0  ;;  %992 = vmatprep.subr.msk.bf16.mxu1 (!%p209_p3), %vm460_vm0, %v357_v0  ;;  %v462_v1 = vsel (!%p209_p3), %vm460_vm0, %v357_v0, 0  ;;  %vm776_vm3 = vcmask (!%p209_p3), 11264  }
   0x8   : > { %964 = vmatpush3.bf16.msra.mxu0 (!%p209_p3), %v462_v1  ;;  %990 = vmatpush3.bf16.msra.mxu1 (!%p209_p3), %v462_v1 }
   0xe   : > { %s1443_s15 = smov (!%p255_p4, %s1125_s15), 1 }
   0xf   : > { %s993_s21 = smul.u32 92, %s1443_s15  ;;  %s276_s30 = scalar_lea.vmem %s1436_s3, %s1443_s15 }
  0x10   : > { %s994_s5 = smul.u32 184, %s1443_s15 }
  0x11   : > { %s1187_s24 = scalar_lea.vmem %s1433_s0, %s993_s21  ;;  %s1192_s27 = scalar_lea.vmem %s1434_s1, %s993_s21 }
  0x12   : > { %v288_v2 = vld [vmem:[%s1187_s24] sm:$0xf]  ;;  %v289_v3 = vld [vmem:[%s1187_s24 + $0x4] sm:$0xf]  ;;  %v300_v7 = vld [vmem:[%s1187_s24 + $0x30] sm:$0xf]  ;;  %s1345_s8 = scalar_lea.vmem %s1437_s4, %s994_s5 }
  0x13   : > { %v311_v4 = vld [vmem:[%s1192_s27] sm:$0xf]  ;;  %v312_v5 = vld [vmem:[%s1192_s27 + $0x4] sm:$0xf]  ;;  %v301_v8 = vld [vmem:[%s1187_s24 + $0x34] sm:$0xf] }
  0x14   : > { %v334_v6 = vadd.bf16 %v311_v4, %v288_v2  ;;  %v335_v9 = vadd.bf16 %v312_v5, %v289_v3  ;;  %v323_v10 = vld [vmem:[%s1192_s27 + $0x30] sm:$0xf]  ;;  %v324_v11 = vld [vmem:[%s1192_s27 + $0x34] sm:$0xf]  ;;  %v290_v12 = vld [vmem:[%s1187_s24 + $0x8] sm:$0xf] }
  0x15   : > { %v346_v13 = vadd.bf16 %v323_v10, %v300_v7  ;;  %v347_v14 = vadd.bf16 %v324_v11, %v301_v8  ;;  %v291_v15 = vld [vmem:[%s1187_s24 + $0xc] sm:$0xf]  ;;  %v313_v16 = vld [vmem:[%s1192_s27 + $0x8] sm:$0xf]  ;;  %v302_v21 = vld [vmem:[%s1187_s24 + $0x38] sm:$0xf] }
  0x16   : > { %v314_v17 = vld [vmem:[%s1192_s27 + $0xc] sm:$0xf]  ;;  %v901_v18 = vcombine.low %v334_v6, %v335_v9  ;;  %v336_v19 = vadd.bf16 %v313_v16, %v290_v12  ;;  %v303_v22 = vld [vmem:[%s1187_s24 + $0x3c] sm:$0xf]  ;;  %v325_v23 = vld [vmem:[%s1192_s27 + $0x38] sm:$0xf] }
  0x17   : > { %v337_v20 = vadd.bf16 %v314_v17, %v291_v15  ;;  %v907_v24 = vcombine.low %v346_v13, %v347_v14  ;;  %v326_v25 = vld [vmem:[%s1192_s27 + $0x3c] sm:$0xf]  ;;  %v348_v26 = vadd.bf16 %v325_v23, %v302_v21  ;;  %v292_v27 = vld [vmem:[%s1187_s24 + $0x10] sm:$0xf]  ;;  %v293_v28 = vld [vmem:[%s1187_s24 + $0x14] sm:$0xf] }
  0x18   : > { %965 = vmatprep.mubr.msk.bf16.mxu0 %vm423_vm1, %v901_v18  ;;  %v349_v30 = vadd.bf16 %v326_v25, %v303_v22  ;;  %v315_v31 = vld [vmem:[%s1192_s27 + $0x10] sm:$0xf]  ;;  %v316_v32 = vld [vmem:[%s1192_s27 + $0x14] sm:$0xf]  ;;  %v304_v33 = vld [vmem:[%s1187_s24 + $0x40] sm:$0xf] }
  0x19   : > { %v902_v29 = vcombine.low %v336_v19, %v337_v20  ;;  %977 = vmatprep.mubr.msk.bf16.mxu1 %vm423_vm1, %v907_v24  ;;  %v338_v34 = vadd.bf16 %v315_v31, %v292_v27  ;;  %v339_v35 = vadd.bf16 %v316_v32, %v293_v28  ;;  %v305_v36 = vld [vmem:[%s1187_s24 + $0x44] sm:$0xf]  ;;  %v327_v37 = vld [vmem:[%s1192_s27 + $0x40] sm:$0xf]  ;;  %v294_v42 = vld [vmem:[%s1187_s24 + $0x18] sm:$0xf] }
  0x1a   : > { %v328_v38 = vld [vmem:[%s1192_s27 + $0x44] sm:$0xf]  ;;  %v908_v39 = vcombine.low %v348_v26, %v349_v30  ;;  %v350_v40 = vadd.bf16 %v327_v37, %v304_v33  ;;  %v295_v43 = vld [vmem:[%s1187_s24 + $0x1c] sm:$0xf]  ;;  %v317_v44 = vld [vmem:[%s1192_s27 + $0x18] sm:$0xf] }
  0x1b   : > { %966 = vmatmul.mubr.msk.bf16.vlgmr.msra.gmra.mrb[0].mxu0 %vm423_vm1, %v902_v29  ;;  %v351_v41 = vadd.bf16 %v328_v38, %v305_v36  ;;  %v903_v45 = vcombine.low %v338_v34, %v339_v35  ;;  %v318_v46 = vld [vmem:[%s1192_s27 + $0x1c] sm:$0xf]  ;;  %v340_v47 = vadd.bf16 %v317_v44, %v294_v42  ;;  %v306_v48 = vld [vmem:[%s1187_s24 + $0x48] sm:$0xf]  ;;  %v307_v49 = vld [vmem:[%s1187_s24 + $0x4c] sm:$0xf] }
  0x1c   : > { %978 = vmatmul.mubr.msk.bf16.vlgmr.msra.gmra.mrb[0].mxu1 %vm423_vm1, %v908_v39  ;;  %v341_v51 = vadd.bf16 %v318_v46, %v295_v43  ;;  %v329_v52 = vld [vmem:[%s1192_s27 + $0x48] sm:$0xf]  ;;  %v330_v53 = vld [vmem:[%s1192_s27 + $0x4c] sm:$0xf]  ;;  %v296_v54 = vld [vmem:[%s1187_s24 + $0x20] sm:$0xf] }
  0x1d   : > { %v909_v50 = vcombine.low %v350_v40, %v351_v41  ;;  %969 = vmatprep.mubr.msk.bf16.mxu0 %vm423_vm1, %v903_v45  ;;  %v352_v55 = vadd.bf16 %v329_v52, %v306_v48  ;;  %v353_v56 = vadd.bf16 %v330_v53, %v307_v49  ;;  %v297_v57 = vld [vmem:[%s1187_s24 + $0x24] sm:$0xf]  ;;  %v319_v58 = vld [vmem:[%s1192_s27 + $0x20] sm:$0xf]  ;;  %v308_v63 = vld [vmem:[%s1187_s24 + $0x50] sm:$0xf] }
  0x1e   : > { %v320_v59 = vld [vmem:[%s1192_s27 + $0x24] sm:$0xf]  ;;  %v904_v60 = vcombine.low %v340_v47, %v341_v51  ;;  %v342_v61 = vadd.bf16 %v319_v58, %v296_v54  ;;  %v309_v0 = vld [vmem:[%s1187_s24 + $0x54] sm:$0xf]  ;;  %v331_v1 = vld [vmem:[%s1192_s27 + $0x50] sm:$0xf] }
  0x1f   : > { %981 = vmatprep.mubr.msk.bf16.mxu1 %vm423_vm1, %v909_v50  ;;  %v343_v62 = vadd.bf16 %v320_v59, %v297_v57  ;;  %v332_v2 = vld [vmem:[%s1192_s27 + $0x54] sm:$0xf]  ;;  %v354_v3 = vadd.bf16 %v331_v1, %v308_v63  ;;  %v298_v4 = vld [vmem:[%s1187_s24 + $0x28] sm:$0xf]  ;;  %v299_v5 = vld [vmem:[%s1187_s24 + $0x2c] sm:$0xf]  ;;  %v910_v6 = vcombine.low %v352_v55, %v353_v56 }
  0x20   : > { %v355_v8 = vadd.bf16 %v332_v2, %v309_v0  ;;  %v321_v9 = vld [vmem:[%s1192_s27 + $0x28] sm:$0xf]  ;;  %v322_v10 = vld [vmem:[%s1192_s27 + $0x2c] sm:$0xf]  ;;  %v310_v11 = vld [vmem:[%s1187_s24 + $0x58] sm:$0x3] }
  0x21   : > { %v905_v7 = vcombine.low %v342_v61, %v343_v62  ;;  %v333_v12 = vld [vmem:[%s1192_s27 + $0x58] sm:$0x3]  ;;  %v344_v14 = vadd.bf16 %v321_v9, %v298_v4  ;;  %v345_v15 = vadd.bf16 %v322_v10, %v299_v5  ;;  %v1256_v19 = vld [vmem:[%s276_s30] ss:$0 sm:$0xff] }
  0x22   : > { %v911_v13 = vcombine.low %v354_v3, %v355_v8  ;;  %v356_v16 = vadd.bf16 %v333_v12, %v310_v11 }
  0x23   : > { %970 = vmatmul.mubr.msk.bf16.gmra.mrb[4].mxu0 %vm423_vm1, %v904_v60  ;;  %v906_v17 = vcombine.low %v344_v14, %v345_v15 }
  0x24   : > { %973 = vmatprep.mubr.msk.bf16.mxu0 %vm423_vm1, %v905_v7  ;;  %982 = vmatmul.mubr.msk.bf16.gmra.mrb[4].mxu1 %vm423_vm1, %v910_v6  ;;  %v912_v18 = vcombine.low %v356_v16, %v356_v16 }
  0x25   : > { %985 = vmatprep.mubr.msk.bf16.mxu1 %vm423_vm1, %v911_v13 }
  0x2b   : > { %974 = vmatmul.mubr.msk.bf16.gmra.mrb[8].mxu0 %vm423_vm1, %v906_v17 }
  0x2c   : > { %986 = vmatmul.mubr.msk.bf16.gmra.mrb[8].mxu1 %vm423_vm1, %v912_v18 }
  0xee   : > { %v967_v20 = vpop.f32.mrb[0].mxu0 }
  0xef   : > { %v1259_v21 = vadd.f32 %v967_v20, %v1256_v19  ;;  %v498_v22 = vpop.f32.mrb[1].mxu0  ;;  %v979_v23 = vpop.f32.mrb[0].mxu1 }
  0xf0   : > { %v1262_v24 = vadd.f32 %v1256_v19, %v498_v22  ;;  %v968_v25 = vpop.f32.mrb[2].mxu0  ;;  %v1266_v27 = vadd.f32 %v979_v23, %v1256_v19  ;;  %v546_v28 = vpop.f32.mrb[1].mxu1 }
  0xf1   : > { %v927_v26 = vmul.f32 -1.442695, %v1259_v21  ;;  %v1269_v29 = vadd.f32 %v968_v25, %v1256_v19  ;;  %v501_v30 = vpop.f32.mrb[3].mxu0  ;;  %v1273_v32 = vadd.f32 %v1256_v19, %v546_v28  ;;  %v980_v33 = vpop.f32.mrb[2].mxu1 }
  0xf2   : > { %v925_v31 = vmul.f32 -1.442695, %v1262_v24  ;;  %v1276_v34 = vadd.f32 %v1256_v19, %v501_v30  ;;  %v939_v35 = vmul.f32 -1.442695, %v1266_v27  ;;  %v1281_v37 = vadd.f32 %v980_v33, %v1256_v19  ;;  %v549_v38 = vpop.f32.mrb[3].mxu1 }
  0xf3   : > { %1019 = vpow2.f32 %v927_v26  ;;  %v928_v36 = vmul.f32 -1.442695, %v1269_v29  ;;  %v937_v39 = vmul.f32 -1.442695, %v1273_v32  ;;  %v1285_v40 = vadd.f32 %v1256_v19, %v549_v38 }
  0xf4   : > { %1021 = vpow2.f32 %v925_v31  ;;  %v940_v41 = vmul.f32 -1.442695, %v1281_v37  ;;  %v926_v42 = vmul.f32 -1.442695, %v1276_v34 }
  0xf5   : > { %1023 = vpow2.f32 %v939_v35  ;;  %v938_v43 = vmul.f32 -1.442695, %v1285_v40 }
  0xf6   : > { %1025 = vpow2.f32 %v937_v39  ;;  %v971_v44 = vpop.f32.mrb[4].mxu0 }
  0xf7   : > { %1027 = vpow2.f32 %v928_v36  ;;  %v1291_v45 = vadd.f32 %v971_v44, %v1256_v19  ;;  %v514_v46 = vpop.f32.mrb[5].mxu0  ;;  %v983_v47 = vpop.f32.mrb[4].mxu1 }
  0xf8   : > { %1029 = vpow2.f32 %v940_v41  ;;  %v1294_v48 = vadd.f32 %v1256_v19, %v514_v46  ;;  %v972_v49 = vpop.f32.mrb[6].mxu0  ;;  %v1298_v51 = vadd.f32 %v983_v47, %v1256_v19  ;;  %v562_v52 = vpop.f32.mrb[5].mxu1 }
  0xf9   : > { %1031 = vpow2.f32 %v926_v42  ;;  %v931_v50 = vmul.f32 -1.442695, %v1291_v45  ;;  %v1301_v53 = vadd.f32 %v972_v49, %v1256_v19  ;;  %v517_v54 = vpop.f32.mrb[7].mxu0  ;;  %v1305_v56 = vadd.f32 %v1256_v19, %v562_v52  ;;  %v984_v57 = vpop.f32.mrb[6].mxu1 }
  0xfa   : > { %1033 = vpow2.f32 %v938_v43  ;;  %v929_v55 = vmul.f32 -1.442695, %v1294_v48  ;;  %v1308_v58 = vadd.f32 %v1256_v19, %v517_v54  ;;  %v943_v59 = vmul.f32 -1.442695, %v1298_v51  ;;  %v565_v62 = vpop.f32.mrb[7].mxu1 }
  0xfb   : > { %1035 = vpow2.f32 %v931_v50  ;;  %v932_v60 = vmul.f32 -1.442695, %v1301_v53  ;;  %v1313_v61 = vadd.f32 %v984_v57, %v1256_v19  ;;  %v941_v63 = vmul.f32 -1.442695, %v1305_v56 }
  0xfc   : > { %1037 = vpow2.f32 %v929_v55  ;;  %v1317_v0 = vadd.f32 %v1256_v19, %v565_v62  ;;  %v930_v57 = vmul.f32 -1.442695, %v1308_v58 }
  0xfd   : > { %v1020_v1 = vpop.eup %1019  ;;  %1039 = vpow2.f32 %v943_v59  ;;  %v944_v54 = vmul.f32 -1.442695, %v1313_v61 }
  0xfe   : > { %v1022_v2 = vpop.eup %1021  ;;  %v663_v3 = vadd.f32 1.0, %v1020_v1  ;;  %1041 = vpow2.f32 %v941_v63  ;;  %v975_v4 = vpop.f32.mrb[8].mxu0  ;;  %v942_v62 = vmul.f32 -1.442695, %v1317_v0 }
  0xff   : > { %v1024_v5 = vpop.eup %1023  ;;  %v661_v6 = vadd.f32 1.0, %v1022_v2  ;;  %1043 = vpow2.f32 %v932_v60  ;;  %v1320_v7 = vadd.f32 %v975_v4, %v1256_v19  ;;  %v530_v8 = vpop.f32.mrb[9].mxu0 }
 0x100   : > { %v1026_v9 = vpop.eup %1025  ;;  %1045 = vrcp.f32 %v663_v3  ;;  %v675_v10 = vadd.f32 1.0, %v1024_v5  ;;  %v987_v11 = vpop.f32.mrb[8].mxu1  ;;  %v1323_v12 = vadd.f32 %v1256_v19, %v530_v8 }
 0x101   : > { %v976_v13 = vpop.f32.mrb[10].mxu0  ;;  %v1028_v14 = vpop.eup %1027  ;;  %1047 = vrcp.f32 %v661_v6  ;;  %v673_v15 = vadd.f32 1.0, %v1026_v9  ;;  %v1326_v16 = vadd.f32 %v987_v11, %v1256_v19  ;;  %v935_v2 = vmul.f32 -1.442695, %v1320_v7 }
 0x102   : > { %v578_v17 = vpop.f32.mrb[9].mxu1  ;;  %v533_v18 = vpop.f32.mrb[11].mxu0  ;;  %1049 = vrcp.f32 %v675_v10  ;;  %v664_v22 = vadd.f32 1.0, %v1028_v14  ;;  %v1332_v30 = vadd.f32 %v976_v13, %v1256_v19 }
 0x103   : > { %v1030_v20 = vpop.eup %1029  ;;  %v1329_v23 = vadd.f32 %v1256_v19, %v578_v17  ;;  %v988_v25 = vpop.f32.mrb[10].mxu1  ;;  %1051 = vrcp.f32 %v673_v15  ;;  %v1335_v36 = vadd.f32 %v1256_v19, %v533_v18  ;;  %v947_v5 = vmul.f32 -1.442695, %v1326_v16 }
 0x104   : > { %v1032_v26 = vpop.eup %1031  ;;  %v676_v28 = vadd.f32 1.0, %v1030_v20  ;;  %v581_v31 = vpop.f32.mrb[11].mxu1  ;;  %1053 = vrcp.f32 %v664_v22 }
 0x105   : > { %v1034_v33 = vpop.eup %1033  ;;  %v662_v35 = vadd.f32 1.0, %v1032_v26  ;;  %v1338_v41 = vadd.f32 %v1256_v19, %v581_v31 }
 0x106   : > { %v1036_v38 = vpop.eup %1035  ;;  %1055 = vrcp.f32 %v676_v28  ;;  %v674_v39 = vadd.f32 1.0, %v1034_v33 }
 0x107   : > { %v1038_v42 = vpop.eup %1037  ;;  %1057 = vrcp.f32 %v662_v35  ;;  %v667_v43 = vadd.f32 1.0, %v1036_v38 }
 0x108   : > { %v1040_v44 = vpop.eup %1039  ;;  %1059 = vrcp.f32 %v674_v39  ;;  %v665_v46 = vadd.f32 1.0, %v1038_v42 }
 0x109   : > { %v1042_v47 = vpop.eup %1041  ;;  %1061 = vrcp.f32 %v667_v43  ;;  %v679_v49 = vadd.f32 1.0, %v1040_v44 }
 0x10a   : > { %v1044_v50 = vpop.eup %1043  ;;  %1063 = vrcp.f32 %v665_v46  ;;  %v677_v52 = vadd.f32 1.0, %v1042_v47 }
 0x10b   : > { %v1046_v55 = vpop.eup %1045  ;;  %1065 = vrcp.f32 %v679_v49  ;;  %v668_v19 = vadd.f32 1.0, %v1044_v50 }
 0x10c   : > { %v1048_v59 = vpop.eup %1047  ;;  %v732_v60 = vmul.f32 %v1046_v55, %v1259_v21  ;;  %1067 = vrcp.f32 %v677_v52 }
 0x10d   : > { %v1050_v63 = vpop.eup %1049  ;;  %v730_v1 = vmul.f32 %v1048_v59, %v1262_v24  ;;  %1069 = vrcp.f32 %v668_v19  ;;  %v933_v24 = vmul.f32 -1.442695, %v1323_v12 }
 0x10e   : > { %v1052_v3 = vpop.eup %1051  ;;  %756 = vst.msk [vmem:[%s1345_s8 + $0x10] sm:$0xff] %vm753_vm2, %v732_v60  ;;  %v744_v4 = vmul.f32 %v1050_v63, %v1266_v27  ;;  %1071 = vpow2.f32 %v944_v54  ;;  %v945_v27 = vmul.f32 -1.442695, %v1329_v23 }
 0x10f   : > { %v1054_v21 = vpop.eup %1053  ;;  %754 = vst.msk [vmem:[%s1345_s8] sm:$0xff] %vm753_vm2, %v730_v1  ;;  %v742_v6 = vmul.f32 %v1052_v3, %v1273_v32  ;;  %1073 = vpow2.f32 %v930_v57  ;;  %v936_v32 = vmul.f32 -1.442695, %v1332_v30 }
 0x110   : > { %v1056_v8 = vpop.eup %1055  ;;  %768 = vst.msk [vmem:[%s1345_s8 + $0x70] sm:$0xff] %vm753_vm2, %v744_v4  ;;  %v733_v9 = vmul.f32 %v1054_v21, %v1269_v29  ;;  %1075 = vpow2.f32 %v942_v62  ;;  %v934_v29 = vmul.f32 -1.442695, %v1335_v36 }
 0x111   : > { %v1058_v10 = vpop.eup %1057  ;;  %766 = vst.msk [vmem:[%s1345_s8 + $0x60] sm:$0xff] %vm753_vm2, %v742_v6  ;;  %v745_v11 = vmul.f32 %v1056_v8, %v1281_v37  ;;  %1077 = vpow2.f32 %v935_v2  ;;  %v946_v37 = vmul.f32 -1.442695, %v1338_v41 }
 0x112   : > { %v1060_v13 = vpop.eup %1059  ;;  %757 = vst.msk [vmem:[%s1345_s8 + $0x18] sm:$0xff] %vm753_vm2, %v733_v9  ;;  %v731_v14 = vmul.f32 %v1058_v10, %v1276_v34  ;;  %1079 = vpow2.f32 %v947_v5 }
 0x113   : > { %v1062_v15 = vpop.eup %1061  ;;  %769 = vst.msk [vmem:[%s1345_s8 + $0x78] sm:$0xff] %vm753_vm2, %v745_v11  ;;  %v743_v17 = vmul.f32 %v1060_v13, %v1285_v40  ;;  %1081 = vpow2.f32 %v933_v24 }
 0x114   : > { %v1064_v18 = vpop.eup %1063  ;;  %755 = vst.msk [vmem:[%s1345_s8 + $0x8] sm:$0xff] %vm753_vm2, %v731_v14  ;;  %v736_v20 = vmul.f32 %v1062_v15, %v1291_v45  ;;  %1083 = vpow2.f32 %v945_v27 }
 0x115   : > { %v1066_v34 = vpop.eup %1065  ;;  %767 = vst.msk [vmem:[%s1345_s8 + $0x68] sm:$0xff] %vm753_vm2, %v743_v17  ;;  %v734_v22 = vmul.f32 %v1064_v18, %v1294_v48  ;;  %1085 = vpow2.f32 %v936_v32 }
 0x116   : > { %v1068_v40 = vpop.eup %1067  ;;  %760 = vst.msk [vmem:[%s1345_s8 + $0x30] sm:$0xff] %vm753_vm2, %v736_v20  ;;  %v748_v25 = vmul.f32 %v1066_v34, %v1298_v51  ;;  %1087 = vpow2.f32 %v934_v29 }
 0x117   : > { %v1070_v26 = vpop.eup %1069  ;;  %758 = vst.msk [vmem:[%s1345_s8 + $0x20] sm:$0xff] %vm753_vm2, %v734_v22  ;;  %v746_v45 = vmul.f32 %v1068_v40, %v1305_v56  ;;  %1089 = vpow2.f32 %v946_v37 }
 0x118   : > { %v1072_v28 = vpop.eup %1071  ;;  %772 = vst.msk [vmem:[%s1345_s8 + $0x90] sm:$0xff] %vm753_vm2, %v748_v25  ;;  %v737_v31 = vmul.f32 %v1070_v26, %v1301_v53 }
 0x119   : > { %v1074_v48 = vpop.eup %1073  ;;  %770 = vst.msk [vmem:[%s1345_s8 + $0x80] sm:$0xff] %vm753_vm2, %v746_v45  ;;  %v680_v33 = vadd.f32 1.0, %v1072_v28 }
 0x11a   : > { %v1076_v35 = vpop.eup %1075  ;;  %761 = vst.msk [vmem:[%s1345_s8 + $0x38] sm:$0xff] %vm753_vm2, %v737_v31  ;;  %v666_v51 = vadd.f32 1.0, %v1074_v48 }
 0x11b   : > { %v1078_v38 = vpop.eup %1077  ;;  %1091 = vrcp.f32 %v680_v33  ;;  %v678_v39 = vadd.f32 1.0, %v1076_v35 }
 0x11c   : > { %v1080_v42 = vpop.eup %1079  ;;  %1093 = vrcp.f32 %v666_v51  ;;  %v671_v56 = vadd.f32 1.0, %v1078_v38 }
 0x11d   : > { %v1082_v43 = vpop.eup %1081  ;;  %1095 = vrcp.f32 %v678_v39  ;;  %v683_v44 = vadd.f32 1.0, %v1080_v42 }
 0x11e   : > { %v1084_v46 = vpop.eup %1083  ;;  %1097 = vrcp.f32 %v671_v56  ;;  %v669_v53 = vadd.f32 1.0, %v1082_v43 }
 0x11f   : > { %v1086_v47 = vpop.eup %1085  ;;  %1099 = vrcp.f32 %v683_v44  ;;  %v681_v49 = vadd.f32 1.0, %v1084_v46 }
 0x120   : > { %v1088_v50 = vpop.eup %1087  ;;  %1101 = vrcp.f32 %v669_v53  ;;  %v672_v52 = vadd.f32 1.0, %v1086_v47 }
 0x121   : > { %v1090_v54 = vpop.eup %1089  ;;  %1103 = vrcp.f32 %v681_v49  ;;  %v670_v55 = vadd.f32 1.0, %v1088_v50 }
 0x122   : > { %1105 = vrcp.f32 %v672_v52  ;;  %v682_v19 = vadd.f32 1.0, %v1090_v54 }
 0x123   : > { %1107 = vrcp.f32 %v670_v55 }
 0x124   : > { %1109 = vrcp.f32 %v682_v19 }
 0x125   : > { %v1092_v57 = vpop.eup %1091 }
 0x126   : > { %v1094_v59 = vpop.eup %1093  ;;  %v749_v60 = vmul.f32 %v1092_v57, %v1313_v61 }
 0x127   : > { %v1096_v62 = vpop.eup %1095  ;;  %v735_v63 = vmul.f32 %v1094_v59, %v1308_v58 }
 0x128   : > { %v1098_v1 = vpop.eup %1097  ;;  %773 = vst.msk [vmem:[%s1345_s8 + $0x98] sm:$0xff] %vm753_vm2, %v749_v60  ;;  %v747_v2 = vmul.f32 %v1096_v62, %v1317_v0 }
 0x129   : > { %v1100_v3 = vpop.eup %1099  ;;  %759 = vst.msk [vmem:[%s1345_s8 + $0x28] sm:$0xff] %vm753_vm2, %v735_v63  ;;  %v740_v4 = vmul.f32 %v1098_v1, %v1320_v7 }
 0x12a   : > { %v1102_v5 = vpop.eup %1101  ;;  %771 = vst.msk [vmem:[%s1345_s8 + $0x88] sm:$0xff] %vm753_vm2, %v747_v2  ;;  %v752_v58 = vmul.f32 %v1100_v3, %v1326_v16 }
 0x12b   : > { %v1104_v61 = vpop.eup %1103  ;;  %764 = vst.msk [vmem:[%s1345_s8 + $0x50] sm:$0xff] %vm753_vm2, %v740_v4  ;;  %v738_v0 = vmul.f32 %v1102_v5, %v1323_v12 }
 0x12c   : > { %v1106_v21 = vpop.eup %1105  ;;  %777 = vst.msk [vmem:[%s1345_s8 + $0xb0] sm:$0xf] %vm776_vm3, %v752_v58  ;;  %v750_v6 = vmul.f32 %v1104_v61, %v1329_v23 }
 0x12d   : > { %v1108_v24 = vpop.eup %1107  ;;  %762 = vst.msk [vmem:[%s1345_s8 + $0x40] sm:$0xff] %vm753_vm2, %v738_v0  ;;  %v741_v7 = vmul.f32 %v1106_v21, %v1332_v30 }
 0x12e   : > { %v1110_v8 = vpop.eup %1109  ;;  %774 = vst.msk [vmem:[%s1345_s8 + $0xa0] sm:$0xff] %vm753_vm2, %v750_v6  ;;  %v739_v16 = vmul.f32 %v1108_v24, %v1335_v36 }
 0x12f   : > { %765 = vst.msk [vmem:[%s1345_s8 + $0x58] sm:$0xff] %vm753_vm2, %v741_v7  ;;  %v751_v9 = vmul.f32 %v1110_v8, %v1338_v41 }
 0x130   : > { %763 = vst.msk [vmem:[%s1345_s8 + $0x48] sm:$0xff] %vm753_vm2, %v739_v16 }
 0x131   : > { %775 = vst.msk [vmem:[%s1345_s8 + $0xa8] sm:$0xff] %vm753_vm2, %v751_v9 }
 0x132 PF: > { %s14_s17 = sadd.s32 1, %s1133_s17   ;;  %s1438_s15 = smov %s1129_s16 }
 0x133   : > { %p11_p5 = scmp.ge.s32.totalorder %s14_s17, 4   ;;  %s1439_s16 = smov %s1441_s18 }
 0x135   :  { %13 = sbr.rel (!%p11_p5) target bundleno = 2 (0x2), region = 72 }

</bundles_post_ra>
